<compile_context>
chip_gen: v7x
topology: tpu7x:2x2x1
jax: 0.10.0
libtpu: 0.0.40
codegen_flags: <defaults>
</compile_context>

<pallas_src>
import math
import functools

import jax
import jax.numpy as jnp
from jax.experimental import pallas as pl
from jax.experimental.pallas import tpu as pltpu


# ----------------------------------------------------------------------------
# In-kernel helpers (traced inside the fused Pallas kernel)
# ----------------------------------------------------------------------------
def _silu(x):
    return x * jax.nn.sigmoid(x)


def _layernorm(x, p, eps=1e-5):
    # PyTorch nn.LayerNorm: biased variance, eps inside rsqrt, affine (w, b).
    mu = jnp.mean(x, axis=-1, keepdims=True)
    var = jnp.mean((x - mu) ** 2, axis=-1, keepdims=True)
    return (x - mu) * jax.lax.rsqrt(var + eps) * p["w"] + p["b"]


def _linear(x, p):
    # Weights are stored (in, out): no transpose inside the kernel.
    return jnp.dot(x, p["w"], preferred_element_type=jnp.float32) + p["b"]


def _resnet(x, temb_act, p):
    # temb_act is silu(temb), hoisted out of the per-block bodies.
    h = _layernorm(x, p["ln1"])
    h = _silu(h)
    # fc1 + temb_proj with the two biases pre-folded into p["b1"].
    h = (jnp.dot(h, p["fc1_w"], preferred_element_type=jnp.float32)
         + jnp.dot(temb_act, p["temb_w"], preferred_element_type=jnp.float32)
         + p["b1"])
    h = _layernorm(h, p["ln2"])
    h = _silu(h)
    # nn.Dropout(p=0.0) is the identity in this forward pass.
    h = _linear(h, p["fc2"])
    x_skip = _linear(x, p["adjust"]) if "adjust" in p else x
    return x_skip + h


def _attn(x, p):
    # softmax over a length-1 key axis is exactly 1.0 -> attn_output == v,
    # and (v-projection ∘ proj_out) was composed into a single affine map
    # p["vp"] at init time.
    h = _layernorm(x, p["ln"])
    return x + _linear(h, p["vp"])


# ----------------------------------------------------------------------------
# Fused forward kernel: one pallas_call for the whole model
# ----------------------------------------------------------------------------
def _fused_kernel(treedef, n_leaves, has_context, *refs):
    idx = 0
    x = refs[idx][...]; idx += 1
    if has_context:
        x = x + refs[idx][...]; idx += 1
    temb_raw = refs[idx][...]; idx += 1
    param_refs = refs[idx: idx + n_leaves]
    o_ref = refs[idx + n_leaves]

    # Rebuild the parameter pytree from the flat list of VMEM refs.
    p = jax.tree_util.tree_unflatten(treedef, [r[...] for r in param_refs])

    # temb MLP: Linear -> SiLU -> Linear, then hoist the nonlinearity that
    # every ResnetBlock applies before temb_proj.
    temb = _linear(temb_raw, p["temb1"])
    temb = _linear(_silu(temb), p["temb2"])
    temb_act = _silu(temb)

    hs = []
    for blk in p["down"]:
        x = _linear(x, blk["fc"])
        x = _resnet(x, temb_act, blk["res"])
        x = _attn(x, blk["attn"])
        hs.append(x)

    x = _resnet(x, temb_act, p["mid1"])
    x = _attn(x, p["mid_attn"])
    x = _resnet(x, temb_act, p["mid2"])

    for blk in p["up"]:
        x = _linear(x, blk["fc"])
        h = hs.pop()
        x = jnp.concatenate([x, h], axis=-1)   # skip connection, stays in VMEM
        x = _resnet(x, temb_act, blk["res"])
        x = _attn(x, blk["attn"])

    o_ref[...] = _linear(x, p["fc_out"])


# ----------------------------------------------------------------------------
# Parameter initialization (deterministic, PyTorch-equivalent distributions,
# weights stored pre-transposed as (in, out), with init-time algebraic folds)
# ----------------------------------------------------------------------------
def _key_iter(key):
    i = 0
    while True:
        yield jax.random.fold_in(key, i)
        i += 1


def init_linear(key, in_f, out_f):
    kw, kb = jax.random.split(key)
    bound = 1.0 / math.sqrt(in_f)
    return {
        "w": jax.random.uniform(kw, (in_f, out_f), jnp.float32, -bound, bound),
        "b": jax.random.uniform(kb, (1, out_f), jnp.float32, -bound, bound),
    }


def init_layernorm(dim):
    return {"w": jnp.ones((1, dim), jnp.float32), "b": jnp.zeros((1, dim), jnp.float32)}


def init_resnet(key, in_f, out_f, temb_f):
    ks = jax.random.split(key, 4)
    fc1 = init_linear(ks[0], in_f, out_f)
    temb_proj = init_linear(ks[1], temb_f, out_f)
    p = {
        "ln1": init_layernorm(in_f),
        "fc1_w": fc1["w"],
        "temb_w": temb_proj["w"],
        # fold the two biases (fc1 + temb_proj) into a single vector add
        "b1": fc1["b"] + temb_proj["b"],
        "ln2": init_layernorm(out_f),
        "fc2": init_linear(ks[2], out_f, out_f),
    }
    if in_f != out_f:
        p["adjust"] = init_linear(ks[3], in_f, out_f)
    return p


def init_attn(key, dim):
    k1, k2 = jax.random.split(key)
    qkv = init_linear(k1, dim, 3 * dim)
    proj = init_linear(k2, dim, dim)
    # Only the v slice of the fused qkv projection contributes (length-1
    # softmax is identically 1).  Compose v-projection and proj_out — two
    # affine maps with no nonlinearity between — into one matmul at init time.
    wv = qkv["w"][:, 2 * dim:]
    bv = qkv["b"][:, 2 * dim:]
    return {
        "ln": init_layernorm(dim),
        "vp": {"w": wv @ proj["w"], "b": bv @ proj["w"] + proj["b"]},
    }


def init_diffcdr(key, in_features, hidden_dims):
    temb_f = in_features * 4
    kit = _key_iter(key)           # inexhaustible key stream
    params = {
        "temb1": init_linear(next(kit), temb_f, temb_f),
        "temb2": init_linear(next(kit), temb_f, temb_f),
        "down": [],
        "up": [],
    }
    prev = in_features
    hs_dims = []
    for dim in hidden_dims:
        params["down"].append({
            "fc": init_linear(next(kit), prev, dim),
            "res": init_resnet(next(kit), dim, dim, temb_f),
            "attn": init_attn(next(kit), dim),
        })
        hs_dims.append(dim)
        prev = dim
    hs_dims = hs_dims[::-1]
    params["mid1"] = init_resnet(next(kit), prev, prev, temb_f)
    params["mid_attn"] = init_attn(next(kit), prev)
    params["mid2"] = init_resnet(next(kit), prev, prev, temb_f)
    for i, dim in enumerate(reversed(hidden_dims)):
        h_dim = hs_dims[i]
        params["up"].append({
            "fc": init_linear(next(kit), prev, dim),
            "res": init_resnet(next(kit), dim + h_dim, dim, temb_f),
            "attn": init_attn(next(kit), dim),
        })
        prev = dim
    params["fc_out"] = init_linear(next(kit), prev, in_features)
    return params


# ----------------------------------------------------------------------------
# Forward pass wrapper
# ----------------------------------------------------------------------------
def get_timestep_embedding(t, embedding_dim):
    t = t.astype(jnp.float32)
    half = embedding_dim // 2
    scale = math.log(10000.0) / (half - 1)
    freqs = jnp.exp(jnp.arange(half, dtype=jnp.float32) * -scale)
    emb = t[:, None] * freqs[None, :]
    return jnp.concatenate([jnp.sin(emb), jnp.cos(emb)], axis=1)


def diffcdr_forward(params, x, t, in_features, context=None):
    temb_f = in_features * 4
    temb_raw = get_timestep_embedding(t, temb_f)   # glue: sin/cos embedding

    # Pad batch (sublane axis) to a multiple of 8; padded rows are sliced off.
    B = x.shape[0]
    Bp = max(8, ((B + 7) // 8) * 8)
    pad = ((0, Bp - B), (0, 0))
    x_p = jnp.pad(x.astype(jnp.float32), pad)
    t_p = jnp.pad(temb_raw, pad)

    has_context = context is not None
    inputs = [x_p]
    if has_context:
        inputs.append(jnp.pad(context.astype(jnp.float32), pad))
    inputs.append(t_p)

    leaves, treedef = jax.tree_util.tree_flatten(params)
    kernel = functools.partial(_fused_kernel, treedef, len(leaves), has_context)

    out = pl.pallas_call(
        kernel,
        out_shape=jax.ShapeDtypeStruct((Bp, in_features), jnp.float32),
        in_specs=[pl.BlockSpec(memory_space=pltpu.MemorySpace.VMEM)]
        * (len(inputs) + len(leaves)),
        out_specs=pl.BlockSpec(memory_space=pltpu.MemorySpace.VMEM),
    )(*inputs, *leaves)
    return out[:B]


# ----------------------------------------------------------------------------
# Main
# ----------------------------------------------------------------------------
if __name__ == "__main__":
    # Small config consistent with the module: x is (batch, in_features), t is (batch,).
    B = 2
    in_features = 32
    hidden_dims = [64, 32]
    num_steps = 100   # scheduler buffers (betas/alphas/...) are unused in forward()
    # TODO(synk): nn.Dropout(p=0.0) is the identity; not emitted as a kernel op.

    key = jax.random.PRNGKey(0)
    k_param, k_x, k_ctx, k_t = jax.random.split(key, 4)

    params = init_diffcdr(k_param, in_features, hidden_dims)
    x = jax.random.normal(k_x, (B, in_features), dtype=jnp.float32)
    context = jax.random.normal(k_ctx, (B, in_features), dtype=jnp.float32)
    t = jax.random.randint(k_t, (B,), 0, num_steps)

    fwd = jax.jit(diffcdr_forward, static_argnames=("in_features",))
    out = fwd(params, x, t, in_features=in_features, context=context)
    out = jax.block_until_ready(out)

    assert out.shape == (B, in_features)
    assert out.dtype == jnp.float32
    assert bool(jnp.all(jnp.isfinite(out)))
    print("KERNEL_OK")
</pallas_src>

<mosaic_0001>
module attributes {stable_mosaic.version = 11 : i64} {
  func.func @_fused_kernel(%arg0: memref<8x32xf32, #tpu.memory_space<vmem>>, %arg1: memref<8x32xf32, #tpu.memory_space<vmem>>, %arg2: memref<8x128xf32, #tpu.memory_space<vmem>>, %arg3: memref<1x64xf32, #tpu.memory_space<vmem>>, %arg4: memref<1x64xf32, #tpu.memory_space<vmem>>, %arg5: memref<1x64xf32, #tpu.memory_space<vmem>>, %arg6: memref<64x64xf32, #tpu.memory_space<vmem>>, %arg7: memref<1x64xf32, #tpu.memory_space<vmem>>, %arg8: memref<32x64xf32, #tpu.memory_space<vmem>>, %arg9: memref<1x64xf32, #tpu.memory_space<vmem>>, %arg10: memref<64x64xf32, #tpu.memory_space<vmem>>, %arg11: memref<1x64xf32, #tpu.memory_space<vmem>>, %arg12: memref<64x64xf32, #tpu.memory_space<vmem>>, %arg13: memref<1x64xf32, #tpu.memory_space<vmem>>, %arg14: memref<1x64xf32, #tpu.memory_space<vmem>>, %arg15: memref<1x64xf32, #tpu.memory_space<vmem>>, %arg16: memref<1x64xf32, #tpu.memory_space<vmem>>, %arg17: memref<128x64xf32, #tpu.memory_space<vmem>>, %arg18: memref<1x32xf32, #tpu.memory_space<vmem>>, %arg19: memref<1x32xf32, #tpu.memory_space<vmem>>, %arg20: memref<1x32xf32, #tpu.memory_space<vmem>>, %arg21: memref<32x32xf32, #tpu.memory_space<vmem>>, %arg22: memref<1x32xf32, #tpu.memory_space<vmem>>, %arg23: memref<64x32xf32, #tpu.memory_space<vmem>>, %arg24: memref<1x32xf32, #tpu.memory_space<vmem>>, %arg25: memref<32x32xf32, #tpu.memory_space<vmem>>, %arg26: memref<1x32xf32, #tpu.memory_space<vmem>>, %arg27: memref<32x32xf32, #tpu.memory_space<vmem>>, %arg28: memref<1x32xf32, #tpu.memory_space<vmem>>, %arg29: memref<1x32xf32, #tpu.memory_space<vmem>>, %arg30: memref<1x32xf32, #tpu.memory_space<vmem>>, %arg31: memref<1x32xf32, #tpu.memory_space<vmem>>, %arg32: memref<128x32xf32, #tpu.memory_space<vmem>>, %arg33: memref<1x32xf32, #tpu.memory_space<vmem>>, %arg34: memref<64x32xf32, #tpu.memory_space<vmem>>, %arg35: memref<1x32xf32, #tpu.memory_space<vmem>>, %arg36: memref<32x32xf32, #tpu.memory_space<vmem>>, %arg37: memref<1x32xf32, #tpu.memory_space<vmem>>, %arg38: memref<32x32xf32, #tpu.memory_space<vmem>>, %arg39: memref<1x32xf32, #tpu.memory_space<vmem>>, %arg40: memref<1x32xf32, #tpu.memory_space<vmem>>, %arg41: memref<1x32xf32, #tpu.memory_space<vmem>>, %arg42: memref<1x32xf32, #tpu.memory_space<vmem>>, %arg43: memref<128x32xf32, #tpu.memory_space<vmem>>, %arg44: memref<1x32xf32, #tpu.memory_space<vmem>>, %arg45: memref<32x32xf32, #tpu.memory_space<vmem>>, %arg46: memref<1x32xf32, #tpu.memory_space<vmem>>, %arg47: memref<32x32xf32, #tpu.memory_space<vmem>>, %arg48: memref<1x32xf32, #tpu.memory_space<vmem>>, %arg49: memref<1x32xf32, #tpu.memory_space<vmem>>, %arg50: memref<1x32xf32, #tpu.memory_space<vmem>>, %arg51: memref<1x32xf32, #tpu.memory_space<vmem>>, %arg52: memref<128x32xf32, #tpu.memory_space<vmem>>, %arg53: memref<1x32xf32, #tpu.memory_space<vmem>>, %arg54: memref<1x32xf32, #tpu.memory_space<vmem>>, %arg55: memref<1x32xf32, #tpu.memory_space<vmem>>, %arg56: memref<32x32xf32, #tpu.memory_space<vmem>>, %arg57: memref<1x128xf32, #tpu.memory_space<vmem>>, %arg58: memref<128x128xf32, #tpu.memory_space<vmem>>, %arg59: memref<1x128xf32, #tpu.memory_space<vmem>>, %arg60: memref<128x128xf32, #tpu.memory_space<vmem>>, %arg61: memref<1x32xf32, #tpu.memory_space<vmem>>, %arg62: memref<1x32xf32, #tpu.memory_space<vmem>>, %arg63: memref<1x32xf32, #tpu.memory_space<vmem>>, %arg64: memref<32x32xf32, #tpu.memory_space<vmem>>, %arg65: memref<1x32xf32, #tpu.memory_space<vmem>>, %arg66: memref<32x32xf32, #tpu.memory_space<vmem>>, %arg67: memref<1x32xf32, #tpu.memory_space<vmem>>, %arg68: memref<64x32xf32, #tpu.memory_space<vmem>>, %arg69: memref<1x32xf32, #tpu.memory_space<vmem>>, %arg70: memref<64x32xf32, #tpu.memory_space<vmem>>, %arg71: memref<1x32xf32, #tpu.memory_space<vmem>>, %arg72: memref<32x32xf32, #tpu.memory_space<vmem>>, %arg73: memref<1x64xf32, #tpu.memory_space<vmem>>, %arg74: memref<1x64xf32, #tpu.memory_space<vmem>>, %arg75: memref<1x32xf32, #tpu.memory_space<vmem>>, %arg76: memref<1x32xf32, #tpu.memory_space<vmem>>, %arg77: memref<128x32xf32, #tpu.memory_space<vmem>>, %arg78: memref<1x64xf32, #tpu.memory_space<vmem>>, %arg79: memref<1x64xf32, #tpu.memory_space<vmem>>, %arg80: memref<1x64xf32, #tpu.memory_space<vmem>>, %arg81: memref<64x64xf32, #tpu.memory_space<vmem>>, %arg82: memref<1x64xf32, #tpu.memory_space<vmem>>, %arg83: memref<32x64xf32, #tpu.memory_space<vmem>>, %arg84: memref<1x64xf32, #tpu.memory_space<vmem>>, %arg85: memref<128x64xf32, #tpu.memory_space<vmem>>, %arg86: memref<1x64xf32, #tpu.memory_space<vmem>>, %arg87: memref<128x64xf32, #tpu.memory_space<vmem>>, %arg88: memref<1x64xf32, #tpu.memory_space<vmem>>, %arg89: memref<64x64xf32, #tpu.memory_space<vmem>>, %arg90: memref<1x128xf32, #tpu.memory_space<vmem>>, %arg91: memref<1x128xf32, #tpu.memory_space<vmem>>, %arg92: memref<1x64xf32, #tpu.memory_space<vmem>>, %arg93: memref<1x64xf32, #tpu.memory_space<vmem>>, %arg94: memref<128x64xf32, #tpu.memory_space<vmem>>, %arg95: memref<8x32xf32, #tpu.memory_space<vmem>>) attributes {dimension_semantics = [], scalar_prefetch = 0 : i64, scratch_operands = 0 : i64, tpu.core_type = #tpu.core_type<tc>} {
    %c0 = arith.constant 0 : index
    %c0_0 = arith.constant 0 : index
    %0 = vector.load %arg0[%c0, %c0_0] : memref<8x32xf32, #tpu.memory_space<vmem>>, vector<8x32xf32>
    %c0_1 = arith.constant 0 : index
    %c0_2 = arith.constant 0 : index
    %1 = vector.load %arg1[%c0_1, %c0_2] : memref<8x32xf32, #tpu.memory_space<vmem>>, vector<8x32xf32>
    %2 = arith.addf %0, %1 : vector<8x32xf32>
    %c0_3 = arith.constant 0 : index
    %c0_4 = arith.constant 0 : index
    %3 = vector.load %arg2[%c0_3, %c0_4] : memref<8x128xf32, #tpu.memory_space<vmem>>, vector<8x128xf32>
    %c0_5 = arith.constant 0 : index
    %c0_6 = arith.constant 0 : index
    %4 = vector.load %arg3[%c0_5, %c0_6] : memref<1x64xf32, #tpu.memory_space<vmem>>, vector<1x64xf32>
    %c0_7 = arith.constant 0 : index
    %c0_8 = arith.constant 0 : index
    %5 = vector.load %arg4[%c0_7, %c0_8] : memref<1x64xf32, #tpu.memory_space<vmem>>, vector<1x64xf32>
    %c0_9 = arith.constant 0 : index
    %c0_10 = arith.constant 0 : index
    %6 = vector.load %arg5[%c0_9, %c0_10] : memref<1x64xf32, #tpu.memory_space<vmem>>, vector<1x64xf32>
    %c0_11 = arith.constant 0 : index
    %c0_12 = arith.constant 0 : index
    %7 = vector.load %arg6[%c0_11, %c0_12] : memref<64x64xf32, #tpu.memory_space<vmem>>, vector<64x64xf32>
    %c0_13 = arith.constant 0 : index
    %c0_14 = arith.constant 0 : index
    %8 = vector.load %arg7[%c0_13, %c0_14] : memref<1x64xf32, #tpu.memory_space<vmem>>, vector<1x64xf32>
    %c0_15 = arith.constant 0 : index
    %c0_16 = arith.constant 0 : index
    %9 = vector.load %arg8[%c0_15, %c0_16] : memref<32x64xf32, #tpu.memory_space<vmem>>, vector<32x64xf32>
    %c0_17 = arith.constant 0 : index
    %c0_18 = arith.constant 0 : index
    %10 = vector.load %arg9[%c0_17, %c0_18] : memref<1x64xf32, #tpu.memory_space<vmem>>, vector<1x64xf32>
    %c0_19 = arith.constant 0 : index
    %c0_20 = arith.constant 0 : index
    %11 = vector.load %arg10[%c0_19, %c0_20] : memref<64x64xf32, #tpu.memory_space<vmem>>, vector<64x64xf32>
    %c0_21 = arith.constant 0 : index
    %c0_22 = arith.constant 0 : index
    %12 = vector.load %arg11[%c0_21, %c0_22] : memref<1x64xf32, #tpu.memory_space<vmem>>, vector<1x64xf32>
    %c0_23 = arith.constant 0 : index
    %c0_24 = arith.constant 0 : index
    %13 = vector.load %arg12[%c0_23, %c0_24] : memref<64x64xf32, #tpu.memory_space<vmem>>, vector<64x64xf32>
    %c0_25 = arith.constant 0 : index
    %c0_26 = arith.constant 0 : index
    %14 = vector.load %arg13[%c0_25, %c0_26] : memref<1x64xf32, #tpu.memory_space<vmem>>, vector<1x64xf32>
    %c0_27 = arith.constant 0 : index
    %c0_28 = arith.constant 0 : index
    %15 = vector.load %arg14[%c0_27, %c0_28] : memref<1x64xf32, #tpu.memory_space<vmem>>, vector<1x64xf32>
    %c0_29 = arith.constant 0 : index
    %c0_30 = arith.constant 0 : index
    %16 = vector.load %arg15[%c0_29, %c0_30] : memref<1x64xf32, #tpu.memory_space<vmem>>, vector<1x64xf32>
    %c0_31 = arith.constant 0 : index
    %c0_32 = arith.constant 0 : index
    %17 = vector.load %arg16[%c0_31, %c0_32] : memref<1x64xf32, #tpu.memory_space<vmem>>, vector<1x64xf32>
    %c0_33 = arith.constant 0 : index
    %c0_34 = arith.constant 0 : index
    %18 = vector.load %arg17[%c0_33, %c0_34] : memref<128x64xf32, #tpu.memory_space<vmem>>, vector<128x64xf32>
    %c0_35 = arith.constant 0 : index
    %c0_36 = arith.constant 0 : index
    %19 = vector.load %arg18[%c0_35, %c0_36] : memref<1x32xf32, #tpu.memory_space<vmem>>, vector<1x32xf32>
    %c0_37 = arith.constant 0 : index
    %c0_38 = arith.constant 0 : index
    %20 = vector.load %arg19[%c0_37, %c0_38] : memref<1x32xf32, #tpu.memory_space<vmem>>, vector<1x32xf32>
    %c0_39 = arith.constant 0 : index
    %c0_40 = arith.constant 0 : index
    %21 = vector.load %arg20[%c0_39, %c0_40] : memref<1x32xf32, #tpu.memory_space<vmem>>, vector<1x32xf32>
    %c0_41 = arith.constant 0 : index
    %c0_42 = arith.constant 0 : index
    %22 = vector.load %arg21[%c0_41, %c0_42] : memref<32x32xf32, #tpu.memory_space<vmem>>, vector<32x32xf32>
    %c0_43 = arith.constant 0 : index
    %c0_44 = arith.constant 0 : index
    %23 = vector.load %arg22[%c0_43, %c0_44] : memref<1x32xf32, #tpu.memory_space<vmem>>, vector<1x32xf32>
    %c0_45 = arith.constant 0 : index
    %c0_46 = arith.constant 0 : index
    %24 = vector.load %arg23[%c0_45, %c0_46] : memref<64x32xf32, #tpu.memory_space<vmem>>, vector<64x32xf32>
    %c0_47 = arith.constant 0 : index
    %c0_48 = arith.constant 0 : index
    %25 = vector.load %arg24[%c0_47, %c0_48] : memref<1x32xf32, #tpu.memory_space<vmem>>, vector<1x32xf32>
    %c0_49 = arith.constant 0 : index
    %c0_50 = arith.constant 0 : index
    %26 = vector.load %arg25[%c0_49, %c0_50] : memref<32x32xf32, #tpu.memory_space<vmem>>, vector<32x32xf32>
    %c0_51 = arith.constant 0 : index
    %c0_52 = arith.constant 0 : index
    %27 = vector.load %arg26[%c0_51, %c0_52] : memref<1x32xf32, #tpu.memory_space<vmem>>, vector<1x32xf32>
    %c0_53 = arith.constant 0 : index
    %c0_54 = arith.constant 0 : index
    %28 = vector.load %arg27[%c0_53, %c0_54] : memref<32x32xf32, #tpu.memory_space<vmem>>, vector<32x32xf32>
    %c0_55 = arith.constant 0 : index
    %c0_56 = arith.constant 0 : index
    %29 = vector.load %arg28[%c0_55, %c0_56] : memref<1x32xf32, #tpu.memory_space<vmem>>, vector<1x32xf32>
    %c0_57 = arith.constant 0 : index
    %c0_58 = arith.constant 0 : index
    %30 = vector.load %arg29[%c0_57, %c0_58] : memref<1x32xf32, #tpu.memory_space<vmem>>, vector<1x32xf32>
    %c0_59 = arith.constant 0 : index
    %c0_60 = arith.constant 0 : index
    %31 = vector.load %arg30[%c0_59, %c0_60] : memref<1x32xf32, #tpu.memory_space<vmem>>, vector<1x32xf32>
    %c0_61 = arith.constant 0 : index
    %c0_62 = arith.constant 0 : index
    %32 = vector.load %arg31[%c0_61, %c0_62] : memref<1x32xf32, #tpu.memory_space<vmem>>, vector<1x32xf32>
    %c0_63 = arith.constant 0 : index
    %c0_64 = arith.constant 0 : index
    %33 = vector.load %arg32[%c0_63, %c0_64] : memref<128x32xf32, #tpu.memory_space<vmem>>, vector<128x32xf32>
    %c0_65 = arith.constant 0 : index
    %c0_66 = arith.constant 0 : index
    %34 = vector.load %arg33[%c0_65, %c0_66] : memref<1x32xf32, #tpu.memory_space<vmem>>, vector<1x32xf32>
    %c0_67 = arith.constant 0 : index
    %c0_68 = arith.constant 0 : index
    %35 = vector.load %arg34[%c0_67, %c0_68] : memref<64x32xf32, #tpu.memory_space<vmem>>, vector<64x32xf32>
    %c0_69 = arith.constant 0 : index
    %c0_70 = arith.constant 0 : index
    %36 = vector.load %arg35[%c0_69, %c0_70] : memref<1x32xf32, #tpu.memory_space<vmem>>, vector<1x32xf32>
    %c0_71 = arith.constant 0 : index
    %c0_72 = arith.constant 0 : index
    %37 = vector.load %arg36[%c0_71, %c0_72] : memref<32x32xf32, #tpu.memory_space<vmem>>, vector<32x32xf32>
    %c0_73 = arith.constant 0 : index
    %c0_74 = arith.constant 0 : index
    %38 = vector.load %arg37[%c0_73, %c0_74] : memref<1x32xf32, #tpu.memory_space<vmem>>, vector<1x32xf32>
    %c0_75 = arith.constant 0 : index
    %c0_76 = arith.constant 0 : index
    %39 = vector.load %arg38[%c0_75, %c0_76] : memref<32x32xf32, #tpu.memory_space<vmem>>, vector<32x32xf32>
    %c0_77 = arith.constant 0 : index
    %c0_78 = arith.constant 0 : index
    %40 = vector.load %arg39[%c0_77, %c0_78] : memref<1x32xf32, #tpu.memory_space<vmem>>, vector<1x32xf32>
    %c0_79 = arith.constant 0 : index
    %c0_80 = arith.constant 0 : index
    %41 = vector.load %arg40[%c0_79, %c0_80] : memref<1x32xf32, #tpu.memory_space<vmem>>, vector<1x32xf32>
    %c0_81 = arith.constant 0 : index
    %c0_82 = arith.constant 0 : index
    %42 = vector.load %arg41[%c0_81, %c0_82] : memref<1x32xf32, #tpu.memory_space<vmem>>, vector<1x32xf32>
    %c0_83 = arith.constant 0 : index
    %c0_84 = arith.constant 0 : index
    %43 = vector.load %arg42[%c0_83, %c0_84] : memref<1x32xf32, #tpu.memory_space<vmem>>, vector<1x32xf32>
    %c0_85 = arith.constant 0 : index
    %c0_86 = arith.constant 0 : index
    %44 = vector.load %arg43[%c0_85, %c0_86] : memref<128x32xf32, #tpu.memory_space<vmem>>, vector<128x32xf32>
    %c0_87 = arith.constant 0 : index
    %c0_88 = arith.constant 0 : index
    %45 = vector.load %arg44[%c0_87, %c0_88] : memref<1x32xf32, #tpu.memory_space<vmem>>, vector<1x32xf32>
    %c0_89 = arith.constant 0 : index
    %c0_90 = arith.constant 0 : index
    %46 = vector.load %arg45[%c0_89, %c0_90] : memref<32x32xf32, #tpu.memory_space<vmem>>, vector<32x32xf32>
    %c0_91 = arith.constant 0 : index
    %c0_92 = arith.constant 0 : index
    %47 = vector.load %arg46[%c0_91, %c0_92] : memref<1x32xf32, #tpu.memory_space<vmem>>, vector<1x32xf32>
    %c0_93 = arith.constant 0 : index
    %c0_94 = arith.constant 0 : index
    %48 = vector.load %arg47[%c0_93, %c0_94] : memref<32x32xf32, #tpu.memory_space<vmem>>, vector<32x32xf32>
    %c0_95 = arith.constant 0 : index
    %c0_96 = arith.constant 0 : index
    %49 = vector.load %arg48[%c0_95, %c0_96] : memref<1x32xf32, #tpu.memory_space<vmem>>, vector<1x32xf32>
    %c0_97 = arith.constant 0 : index
    %c0_98 = arith.constant 0 : index
    %50 = vector.load %arg49[%c0_97, %c0_98] : memref<1x32xf32, #tpu.memory_space<vmem>>, vector<1x32xf32>
    %c0_99 = arith.constant 0 : index
    %c0_100 = arith.constant 0 : index
    %51 = vector.load %arg50[%c0_99, %c0_100] : memref<1x32xf32, #tpu.memory_space<vmem>>, vector<1x32xf32>
    %c0_101 = arith.constant 0 : index
    %c0_102 = arith.constant 0 : index
    %52 = vector.load %arg51[%c0_101, %c0_102] : memref<1x32xf32, #tpu.memory_space<vmem>>, vector<1x32xf32>
    %c0_103 = arith.constant 0 : index
    %c0_104 = arith.constant 0 : index
    %53 = vector.load %arg52[%c0_103, %c0_104] : memref<128x32xf32, #tpu.memory_space<vmem>>, vector<128x32xf32>
    %c0_105 = arith.constant 0 : index
    %c0_106 = arith.constant 0 : index
    %54 = vector.load %arg53[%c0_105, %c0_106] : memref<1x32xf32, #tpu.memory_space<vmem>>, vector<1x32xf32>
    %c0_107 = arith.constant 0 : index
    %c0_108 = arith.constant 0 : index
    %55 = vector.load %arg54[%c0_107, %c0_108] : memref<1x32xf32, #tpu.memory_space<vmem>>, vector<1x32xf32>
    %c0_109 = arith.constant 0 : index
    %c0_110 = arith.constant 0 : index
    %56 = vector.load %arg55[%c0_109, %c0_110] : memref<1x32xf32, #tpu.memory_space<vmem>>, vector<1x32xf32>
    %c0_111 = arith.constant 0 : index
    %c0_112 = arith.constant 0 : index
    %57 = vector.load %arg56[%c0_111, %c0_112] : memref<32x32xf32, #tpu.memory_space<vmem>>, vector<32x32xf32>
    %c0_113 = arith.constant 0 : index
    %c0_114 = arith.constant 0 : index
    %58 = vector.load %arg57[%c0_113, %c0_114] : memref<1x128xf32, #tpu.memory_space<vmem>>, vector<1x128xf32>
    %c0_115 = arith.constant 0 : index
    %c0_116 = arith.constant 0 : index
    %59 = vector.load %arg58[%c0_115, %c0_116] : memref<128x128xf32, #tpu.memory_space<vmem>>, vector<128x128xf32>
    %c0_117 = arith.constant 0 : index
    %c0_118 = arith.constant 0 : index
    %60 = vector.load %arg59[%c0_117, %c0_118] : memref<1x128xf32, #tpu.memory_space<vmem>>, vector<1x128xf32>
    %c0_119 = arith.constant 0 : index
    %c0_120 = arith.constant 0 : index
    %61 = vector.load %arg60[%c0_119, %c0_120] : memref<128x128xf32, #tpu.memory_space<vmem>>, vector<128x128xf32>
    %c0_121 = arith.constant 0 : index
    %c0_122 = arith.constant 0 : index
    %62 = vector.load %arg61[%c0_121, %c0_122] : memref<1x32xf32, #tpu.memory_space<vmem>>, vector<1x32xf32>
    %c0_123 = arith.constant 0 : index
    %c0_124 = arith.constant 0 : index
    %63 = vector.load %arg62[%c0_123, %c0_124] : memref<1x32xf32, #tpu.memory_space<vmem>>, vector<1x32xf32>
    %c0_125 = arith.constant 0 : index
    %c0_126 = arith.constant 0 : index
    %64 = vector.load %arg63[%c0_125, %c0_126] : memref<1x32xf32, #tpu.memory_space<vmem>>, vector<1x32xf32>
    %c0_127 = arith.constant 0 : index
    %c0_128 = arith.constant 0 : index
    %65 = vector.load %arg64[%c0_127, %c0_128] : memref<32x32xf32, #tpu.memory_space<vmem>>, vector<32x32xf32>
    %c0_129 = arith.constant 0 : index
    %c0_130 = arith.constant 0 : index
    %66 = vector.load %arg65[%c0_129, %c0_130] : memref<1x32xf32, #tpu.memory_space<vmem>>, vector<1x32xf32>
    %c0_131 = arith.constant 0 : index
    %c0_132 = arith.constant 0 : index
    %67 = vector.load %arg66[%c0_131, %c0_132] : memref<32x32xf32, #tpu.memory_space<vmem>>, vector<32x32xf32>
    %c0_133 = arith.constant 0 : index
    %c0_134 = arith.constant 0 : index
    %68 = vector.load %arg67[%c0_133, %c0_134] : memref<1x32xf32, #tpu.memory_space<vmem>>, vector<1x32xf32>
    %c0_135 = arith.constant 0 : index
    %c0_136 = arith.constant 0 : index
    %69 = vector.load %arg68[%c0_135, %c0_136] : memref<64x32xf32, #tpu.memory_space<vmem>>, vector<64x32xf32>
    %c0_137 = arith.constant 0 : index
    %c0_138 = arith.constant 0 : index
    %70 = vector.load %arg69[%c0_137, %c0_138] : memref<1x32xf32, #tpu.memory_space<vmem>>, vector<1x32xf32>
    %c0_139 = arith.constant 0 : index
    %c0_140 = arith.constant 0 : index
    %71 = vector.load %arg70[%c0_139, %c0_140] : memref<64x32xf32, #tpu.memory_space<vmem>>, vector<64x32xf32>
    %c0_141 = arith.constant 0 : index
    %c0_142 = arith.constant 0 : index
    %72 = vector.load %arg71[%c0_141, %c0_142] : memref<1x32xf32, #tpu.memory_space<vmem>>, vector<1x32xf32>
    %c0_143 = arith.constant 0 : index
    %c0_144 = arith.constant 0 : index
    %73 = vector.load %arg72[%c0_143, %c0_144] : memref<32x32xf32, #tpu.memory_space<vmem>>, vector<32x32xf32>
    %c0_145 = arith.constant 0 : index
    %c0_146 = arith.constant 0 : index
    %74 = vector.load %arg73[%c0_145, %c0_146] : memref<1x64xf32, #tpu.memory_space<vmem>>, vector<1x64xf32>
    %c0_147 = arith.constant 0 : index
    %c0_148 = arith.constant 0 : index
    %75 = vector.load %arg74[%c0_147, %c0_148] : memref<1x64xf32, #tpu.memory_space<vmem>>, vector<1x64xf32>
    %c0_149 = arith.constant 0 : index
    %c0_150 = arith.constant 0 : index
    %76 = vector.load %arg75[%c0_149, %c0_150] : memref<1x32xf32, #tpu.memory_space<vmem>>, vector<1x32xf32>
    %c0_151 = arith.constant 0 : index
    %c0_152 = arith.constant 0 : index
    %77 = vector.load %arg76[%c0_151, %c0_152] : memref<1x32xf32, #tpu.memory_space<vmem>>, vector<1x32xf32>
    %c0_153 = arith.constant 0 : index
    %c0_154 = arith.constant 0 : index
    %78 = vector.load %arg77[%c0_153, %c0_154] : memref<128x32xf32, #tpu.memory_space<vmem>>, vector<128x32xf32>
    %c0_155 = arith.constant 0 : index
    %c0_156 = arith.constant 0 : index
    %79 = vector.load %arg78[%c0_155, %c0_156] : memref<1x64xf32, #tpu.memory_space<vmem>>, vector<1x64xf32>
    %c0_157 = arith.constant 0 : index
    %c0_158 = arith.constant 0 : index
    %80 = vector.load %arg79[%c0_157, %c0_158] : memref<1x64xf32, #tpu.memory_space<vmem>>, vector<1x64xf32>
    %c0_159 = arith.constant 0 : index
    %c0_160 = arith.constant 0 : index
    %81 = vector.load %arg80[%c0_159, %c0_160] : memref<1x64xf32, #tpu.memory_space<vmem>>, vector<1x64xf32>
    %c0_161 = arith.constant 0 : index
    %c0_162 = arith.constant 0 : index
    %82 = vector.load %arg81[%c0_161, %c0_162] : memref<64x64xf32, #tpu.memory_space<vmem>>, vector<64x64xf32>
    %c0_163 = arith.constant 0 : index
    %c0_164 = arith.constant 0 : index
    %83 = vector.load %arg82[%c0_163, %c0_164] : memref<1x64xf32, #tpu.memory_space<vmem>>, vector<1x64xf32>
    %c0_165 = arith.constant 0 : index
    %c0_166 = arith.constant 0 : index
    %84 = vector.load %arg83[%c0_165, %c0_166] : memref<32x64xf32, #tpu.memory_space<vmem>>, vector<32x64xf32>
    %c0_167 = arith.constant 0 : index
    %c0_168 = arith.constant 0 : index
    %85 = vector.load %arg84[%c0_167, %c0_168] : memref<1x64xf32, #tpu.memory_space<vmem>>, vector<1x64xf32>
    %c0_169 = arith.constant 0 : index
    %c0_170 = arith.constant 0 : index
    %86 = vector.load %arg85[%c0_169, %c0_170] : memref<128x64xf32, #tpu.memory_space<vmem>>, vector<128x64xf32>
    %c0_171 = arith.constant 0 : index
    %c0_172 = arith.constant 0 : index
    %87 = vector.load %arg86[%c0_171, %c0_172] : memref<1x64xf32, #tpu.memory_space<vmem>>, vector<1x64xf32>
    %c0_173 = arith.constant 0 : index
    %c0_174 = arith.constant 0 : index
    %88 = vector.load %arg87[%c0_173, %c0_174] : memref<128x64xf32, #tpu.memory_space<vmem>>, vector<128x64xf32>
    %c0_175 = arith.constant 0 : index
    %c0_176 = arith.constant 0 : index
    %89 = vector.load %arg88[%c0_175, %c0_176] : memref<1x64xf32, #tpu.memory_space<vmem>>, vector<1x64xf32>
    %c0_177 = arith.constant 0 : index
    %c0_178 = arith.constant 0 : index
    %90 = vector.load %arg89[%c0_177, %c0_178] : memref<64x64xf32, #tpu.memory_space<vmem>>, vector<64x64xf32>
    %c0_179 = arith.constant 0 : index
    %c0_180 = arith.constant 0 : index
    %91 = vector.load %arg90[%c0_179, %c0_180] : memref<1x128xf32, #tpu.memory_space<vmem>>, vector<1x128xf32>
    %c0_181 = arith.constant 0 : index
    %c0_182 = arith.constant 0 : index
    %92 = vector.load %arg91[%c0_181, %c0_182] : memref<1x128xf32, #tpu.memory_space<vmem>>, vector<1x128xf32>
    %c0_183 = arith.constant 0 : index
    %c0_184 = arith.constant 0 : index
    %93 = vector.load %arg92[%c0_183, %c0_184] : memref<1x64xf32, #tpu.memory_space<vmem>>, vector<1x64xf32>
    %c0_185 = arith.constant 0 : index
    %c0_186 = arith.constant 0 : index
    %94 = vector.load %arg93[%c0_185, %c0_186] : memref<1x64xf32, #tpu.memory_space<vmem>>, vector<1x64xf32>
    %c0_187 = arith.constant 0 : index
    %c0_188 = arith.constant 0 : index
    %95 = vector.load %arg94[%c0_187, %c0_188] : memref<128x64xf32, #tpu.memory_space<vmem>>, vector<128x64xf32>
    %cst = arith.constant dense<0.000000e+00> : vector<8x128xf32>
    %96 = tpu.matmul %3, %59, %cst {dimension_numbers = #tpu.dot_dimension_numbers<[1], [0], [0], [1], [0, 0, 1, 1], [], []>} : vector<8x128xf32>, vector<128x128xf32>, vector<8x128xf32> -> vector<8x128xf32>
    %97 = vector.broadcast %58 : vector<1x128xf32> to vector<8x128xf32>
    %98 = arith.addf %96, %97 : vector<8x128xf32>
    %99 = arith.negf %98 : vector<8x128xf32>
    %100 = math.exp %99 : vector<8x128xf32>
    %cst_189 = arith.constant 1.000000e+00 : f32
    %101 = vector.broadcast %cst_189 : f32 to vector<8x128xf32>
    %102 = arith.addf %101, %100 : vector<8x128xf32>
    %103 = arith.divf %101, %102 : vector<8x128xf32>
    %104 = arith.mulf %98, %103 : vector<8x128xf32>
    %cst_190 = arith.constant dense<0.000000e+00> : vector<8x128xf32>
    %105 = tpu.matmul %104, %61, %cst_190 {dimension_numbers = #tpu.dot_dimension_numbers<[1], [0], [0], [1], [0, 0, 1, 1], [], []>} : vector<8x128xf32>, vector<128x128xf32>, vector<8x128xf32> -> vector<8x128xf32>
    %106 = vector.broadcast %60 : vector<1x128xf32> to vector<8x128xf32>
    %107 = arith.addf %105, %106 : vector<8x128xf32>
    %108 = arith.negf %107 : vector<8x128xf32>
    %109 = math.exp %108 : vector<8x128xf32>
    %cst_191 = arith.constant 1.000000e+00 : f32
    %110 = vector.broadcast %cst_191 : f32 to vector<8x128xf32>
    %111 = arith.addf %110, %109 : vector<8x128xf32>
    %112 = arith.divf %110, %111 : vector<8x128xf32>
    %113 = arith.mulf %107, %112 : vector<8x128xf32>
    %cst_192 = arith.constant dense<0.000000e+00> : vector<8x64xf32>
    %114 = tpu.matmul %2, %9, %cst_192 {dimension_numbers = #tpu.dot_dimension_numbers<[1], [0], [0], [1], [0, 0, 1, 1], [], []>} : vector<8x32xf32>, vector<32x64xf32>, vector<8x64xf32> -> vector<8x64xf32>
    %115 = vector.broadcast %8 : vector<1x64xf32> to vector<8x64xf32>
    %116 = arith.addf %114, %115 : vector<8x64xf32>
    %cst_193 = arith.constant dense<0.000000e+00> : vector<8xf32>
    %117 = vector.multi_reduction <add>, %116, %cst_193 [1] : vector<8x64xf32> to vector<8xf32>
    %118 = vector.shape_cast %117 : vector<8xf32> to vector<8x1xf32>
    %cst_194 = arith.constant 6.400000e+01 : f32
    %119 = vector.broadcast %cst_194 : f32 to vector<8x1xf32>
    %120 = arith.divf %118, %119 : vector<8x1xf32>
    %121 = vector.broadcast %120 : vector<8x1xf32> to vector<8x64xf32>
    %122 = arith.subf %116, %121 : vector<8x64xf32>
    %123 = arith.mulf %122, %122 : vector<8x64xf32>
    %cst_195 = arith.constant dense<0.000000e+00> : vector<8xf32>
    %124 = vector.multi_reduction <add>, %123, %cst_195 [1] : vector<8x64xf32> to vector<8xf32>
    %125 = vector.shape_cast %124 : vector<8xf32> to vector<8x1xf32>
    %cst_196 = arith.constant 6.400000e+01 : f32
    %126 = vector.broadcast %cst_196 : f32 to vector<8x1xf32>
    %127 = arith.divf %125, %126 : vector<8x1xf32>
    %128 = vector.broadcast %120 : vector<8x1xf32> to vector<8x64xf32>
    %129 = arith.subf %116, %128 : vector<8x64xf32>
    %cst_197 = arith.constant 9.99999974E-6 : f32
    %130 = vector.broadcast %cst_197 : f32 to vector<8x1xf32>
    %131 = arith.addf %127, %130 : vector<8x1xf32>
    %132 = math.rsqrt %131 : vector<8x1xf32>
    %133 = vector.broadcast %132 : vector<8x1xf32> to vector<8x64xf32>
    %134 = arith.mulf %129, %133 : vector<8x64xf32>
    %135 = vector.broadcast %15 : vector<1x64xf32> to vector<8x64xf32>
    %136 = arith.mulf %134, %135 : vector<8x64xf32>
    %137 = vector.broadcast %14 : vector<1x64xf32> to vector<8x64xf32>
    %138 = arith.addf %136, %137 : vector<8x64xf32>
    %139 = arith.negf %138 : vector<8x64xf32>
    %140 = math.exp %139 : vector<8x64xf32>
    %cst_198 = arith.constant 1.000000e+00 : f32
    %141 = vector.broadcast %cst_198 : f32 to vector<8x64xf32>
    %142 = arith.addf %141, %140 : vector<8x64xf32>
    %143 = arith.divf %141, %142 : vector<8x64xf32>
    %144 = arith.mulf %138, %143 : vector<8x64xf32>
    %cst_199 = arith.constant dense<0.000000e+00> : vector<8x64xf32>
    %145 = tpu.matmul %144, %11, %cst_199 {dimension_numbers = #tpu.dot_dimension_numbers<[1], [0], [0], [1], [0, 0, 1, 1], [], []>} : vector<8x64xf32>, vector<64x64xf32>, vector<8x64xf32> -> vector<8x64xf32>
    %cst_200 = arith.constant dense<0.000000e+00> : vector<8x64xf32>
    %146 = tpu.matmul %113, %18, %cst_200 {dimension_numbers = #tpu.dot_dimension_numbers<[1], [0], [0], [1], [0, 0, 1, 1], [], []>} : vector<8x128xf32>, vector<128x64xf32>, vector<8x64xf32> -> vector<8x64xf32>
    %147 = arith.addf %145, %146 : vector<8x64xf32>
    %148 = vector.broadcast %10 : vector<1x64xf32> to vector<8x64xf32>
    %149 = arith.addf %147, %148 : vector<8x64xf32>
    %cst_201 = arith.constant dense<0.000000e+00> : vector<8xf32>
    %150 = vector.multi_reduction <add>, %149, %cst_201 [1] : vector<8x64xf32> to vector<8xf32>
    %151 = vector.shape_cast %150 : vector<8xf32> to vector<8x1xf32>
    %cst_202 = arith.constant 6.400000e+01 : f32
    %152 = vector.broadcast %cst_202 : f32 to vector<8x1xf32>
    %153 = arith.divf %151, %152 : vector<8x1xf32>
    %154 = vector.broadcast %153 : vector<8x1xf32> to vector<8x64xf32>
    %155 = arith.subf %149, %154 : vector<8x64xf32>
    %156 = arith.mulf %155, %155 : vector<8x64xf32>
    %cst_203 = arith.constant dense<0.000000e+00> : vector<8xf32>
    %157 = vector.multi_reduction <add>, %156, %cst_203 [1] : vector<8x64xf32> to vector<8xf32>
    %158 = vector.shape_cast %157 : vector<8xf32> to vector<8x1xf32>
    %cst_204 = arith.constant 6.400000e+01 : f32
    %159 = vector.broadcast %cst_204 : f32 to vector<8x1xf32>
    %160 = arith.divf %158, %159 : vector<8x1xf32>
    %161 = vector.broadcast %153 : vector<8x1xf32> to vector<8x64xf32>
    %162 = arith.subf %149, %161 : vector<8x64xf32>
    %cst_205 = arith.constant 9.99999974E-6 : f32
    %163 = vector.broadcast %cst_205 : f32 to vector<8x1xf32>
    %164 = arith.addf %160, %163 : vector<8x1xf32>
    %165 = math.rsqrt %164 : vector<8x1xf32>
    %166 = vector.broadcast %165 : vector<8x1xf32> to vector<8x64xf32>
    %167 = arith.mulf %162, %166 : vector<8x64xf32>
    %168 = vector.broadcast %17 : vector<1x64xf32> to vector<8x64xf32>
    %169 = arith.mulf %167, %168 : vector<8x64xf32>
    %170 = vector.broadcast %16 : vector<1x64xf32> to vector<8x64xf32>
    %171 = arith.addf %169, %170 : vector<8x64xf32>
    %172 = arith.negf %171 : vector<8x64xf32>
    %173 = math.exp %172 : vector<8x64xf32>
    %cst_206 = arith.constant 1.000000e+00 : f32
    %174 = vector.broadcast %cst_206 : f32 to vector<8x64xf32>
    %175 = arith.addf %174, %173 : vector<8x64xf32>
    %176 = arith.divf %174, %175 : vector<8x64xf32>
    %177 = arith.mulf %171, %176 : vector<8x64xf32>
    %cst_207 = arith.constant dense<0.000000e+00> : vector<8x64xf32>
    %178 = tpu.matmul %177, %13, %cst_207 {dimension_numbers = #tpu.dot_dimension_numbers<[1], [0], [0], [1], [0, 0, 1, 1], [], []>} : vector<8x64xf32>, vector<64x64xf32>, vector<8x64xf32> -> vector<8x64xf32>
    %179 = vector.broadcast %12 : vector<1x64xf32> to vector<8x64xf32>
    %180 = arith.addf %178, %179 : vector<8x64xf32>
    %181 = arith.addf %116, %180 : vector<8x64xf32>
    %cst_208 = arith.constant dense<0.000000e+00> : vector<8xf32>
    %182 = vector.multi_reduction <add>, %181, %cst_208 [1] : vector<8x64xf32> to vector<8xf32>
    %183 = vector.shape_cast %182 : vector<8xf32> to vector<8x1xf32>
    %cst_209 = arith.constant 6.400000e+01 : f32
    %184 = vector.broadcast %cst_209 : f32 to vector<8x1xf32>
    %185 = arith.divf %183, %184 : vector<8x1xf32>
    %186 = vector.broadcast %185 : vector<8x1xf32> to vector<8x64xf32>
    %187 = arith.subf %181, %186 : vector<8x64xf32>
    %188 = arith.mulf %187, %187 : vector<8x64xf32>
    %cst_210 = arith.constant dense<0.000000e+00> : vector<8xf32>
    %189 = vector.multi_reduction <add>, %188, %cst_210 [1] : vector<8x64xf32> to vector<8xf32>
    %190 = vector.shape_cast %189 : vector<8xf32> to vector<8x1xf32>
    %cst_211 = arith.constant 6.400000e+01 : f32
    %191 = vector.broadcast %cst_211 : f32 to vector<8x1xf32>
    %192 = arith.divf %190, %191 : vector<8x1xf32>
    %193 = vector.broadcast %185 : vector<8x1xf32> to vector<8x64xf32>
    %194 = arith.subf %181, %193 : vector<8x64xf32>
    %cst_212 = arith.constant 9.99999974E-6 : f32
    %195 = vector.broadcast %cst_212 : f32 to vector<8x1xf32>
    %196 = arith.addf %192, %195 : vector<8x1xf32>
    %197 = math.rsqrt %196 : vector<8x1xf32>
    %198 = vector.broadcast %197 : vector<8x1xf32> to vector<8x64xf32>
    %199 = arith.mulf %194, %198 : vector<8x64xf32>
    %200 = vector.broadcast %5 : vector<1x64xf32> to vector<8x64xf32>
    %201 = arith.mulf %199, %200 : vector<8x64xf32>
    %202 = vector.broadcast %4 : vector<1x64xf32> to vector<8x64xf32>
    %203 = arith.addf %201, %202 : vector<8x64xf32>
    %cst_213 = arith.constant dense<0.000000e+00> : vector<8x64xf32>
    %204 = tpu.matmul %203, %7, %cst_213 {dimension_numbers = #tpu.dot_dimension_numbers<[1], [0], [0], [1], [0, 0, 1, 1], [], []>} : vector<8x64xf32>, vector<64x64xf32>, vector<8x64xf32> -> vector<8x64xf32>
    %205 = vector.broadcast %6 : vector<1x64xf32> to vector<8x64xf32>
    %206 = arith.addf %204, %205 : vector<8x64xf32>
    %207 = arith.addf %181, %206 : vector<8x64xf32>
    %cst_214 = arith.constant dense<0.000000e+00> : vector<8x32xf32>
    %208 = tpu.matmul %207, %24, %cst_214 {dimension_numbers = #tpu.dot_dimension_numbers<[1], [0], [0], [1], [0, 0, 1, 1], [], []>} : vector<8x64xf32>, vector<64x32xf32>, vector<8x32xf32> -> vector<8x32xf32>
    %209 = vector.broadcast %23 : vector<1x32xf32> to vector<8x32xf32>
    %210 = arith.addf %208, %209 : vector<8x32xf32>
    %cst_215 = arith.constant dense<0.000000e+00> : vector<8xf32>
    %211 = vector.multi_reduction <add>, %210, %cst_215 [1] : vector<8x32xf32> to vector<8xf32>
    %212 = vector.shape_cast %211 : vector<8xf32> to vector<8x1xf32>
    %cst_216 = arith.constant 3.200000e+01 : f32
    %213 = vector.broadcast %cst_216 : f32 to vector<8x1xf32>
    %214 = arith.divf %212, %213 : vector<8x1xf32>
    %215 = vector.broadcast %214 : vector<8x1xf32> to vector<8x32xf32>
    %216 = arith.subf %210, %215 : vector<8x32xf32>
    %217 = arith.mulf %216, %216 : vector<8x32xf32>
    %cst_217 = arith.constant dense<0.000000e+00> : vector<8xf32>
    %218 = vector.multi_reduction <add>, %217, %cst_217 [1] : vector<8x32xf32> to vector<8xf32>
    %219 = vector.shape_cast %218 : vector<8xf32> to vector<8x1xf32>
    %cst_218 = arith.constant 3.200000e+01 : f32
    %220 = vector.broadcast %cst_218 : f32 to vector<8x1xf32>
    %221 = arith.divf %219, %220 : vector<8x1xf32>
    %222 = vector.broadcast %214 : vector<8x1xf32> to vector<8x32xf32>
    %223 = arith.subf %210, %222 : vector<8x32xf32>
    %cst_219 = arith.constant 9.99999974E-6 : f32
    %224 = vector.broadcast %cst_219 : f32 to vector<8x1xf32>
    %225 = arith.addf %221, %224 : vector<8x1xf32>
    %226 = math.rsqrt %225 : vector<8x1xf32>
    %227 = vector.broadcast %226 : vector<8x1xf32> to vector<8x32xf32>
    %228 = arith.mulf %223, %227 : vector<8x32xf32>
    %229 = vector.broadcast %30 : vector<1x32xf32> to vector<8x32xf32>
    %230 = arith.mulf %228, %229 : vector<8x32xf32>
    %231 = vector.broadcast %29 : vector<1x32xf32> to vector<8x32xf32>
    %232 = arith.addf %230, %231 : vector<8x32xf32>
    %233 = arith.negf %232 : vector<8x32xf32>
    %234 = math.exp %233 : vector<8x32xf32>
    %cst_220 = arith.constant 1.000000e+00 : f32
    %235 = vector.broadcast %cst_220 : f32 to vector<8x32xf32>
    %236 = arith.addf %235, %234 : vector<8x32xf32>
    %237 = arith.divf %235, %236 : vector<8x32xf32>
    %238 = arith.mulf %232, %237 : vector<8x32xf32>
    %cst_221 = arith.constant dense<0.000000e+00> : vector<8x32xf32>
    %239 = tpu.matmul %238, %26, %cst_221 {dimension_numbers = #tpu.dot_dimension_numbers<[1], [0], [0], [1], [0, 0, 1, 1], [], []>} : vector<8x32xf32>, vector<32x32xf32>, vector<8x32xf32> -> vector<8x32xf32>
    %cst_222 = arith.constant dense<0.000000e+00> : vector<8x32xf32>
    %240 = tpu.matmul %113, %33, %cst_222 {dimension_numbers = #tpu.dot_dimension_numbers<[1], [0], [0], [1], [0, 0, 1, 1], [], []>} : vector<8x128xf32>, vector<128x32xf32>, vector<8x32xf32> -> vector<8x32xf32>
    %241 = arith.addf %239, %240 : vector<8x32xf32>
    %242 = vector.broadcast %25 : vector<1x32xf32> to vector<8x32xf32>
    %243 = arith.addf %241, %242 : vector<8x32xf32>
    %cst_223 = arith.constant dense<0.000000e+00> : vector<8xf32>
    %244 = vector.multi_reduction <add>, %243, %cst_223 [1] : vector<8x32xf32> to vector<8xf32>
    %245 = vector.shape_cast %244 : vector<8xf32> to vector<8x1xf32>
    %cst_224 = arith.constant 3.200000e+01 : f32
    %246 = vector.broadcast %cst_224 : f32 to vector<8x1xf32>
    %247 = arith.divf %245, %246 : vector<8x1xf32>
    %248 = vector.broadcast %247 : vector<8x1xf32> to vector<8x32xf32>
    %249 = arith.subf %243, %248 : vector<8x32xf32>
    %250 = arith.mulf %249, %249 : vector<8x32xf32>
    %cst_225 = arith.constant dense<0.000000e+00> : vector<8xf32>
    %251 = vector.multi_reduction <add>, %250, %cst_225 [1] : vector<8x32xf32> to vector<8xf32>
    %252 = vector.shape_cast %251 : vector<8xf32> to vector<8x1xf32>
    %cst_226 = arith.constant 3.200000e+01 : f32
    %253 = vector.broadcast %cst_226 : f32 to vector<8x1xf32>
    %254 = arith.divf %252, %253 : vector<8x1xf32>
    %255 = vector.broadcast %247 : vector<8x1xf32> to vector<8x32xf32>
    %256 = arith.subf %243, %255 : vector<8x32xf32>
    %cst_227 = arith.constant 9.99999974E-6 : f32
    %257 = vector.broadcast %cst_227 : f32 to vector<8x1xf32>
    %258 = arith.addf %254, %257 : vector<8x1xf32>
    %259 = math.rsqrt %258 : vector<8x1xf32>
    %260 = vector.broadcast %259 : vector<8x1xf32> to vector<8x32xf32>
    %261 = arith.mulf %256, %260 : vector<8x32xf32>
    %262 = vector.broadcast %32 : vector<1x32xf32> to vector<8x32xf32>
    %263 = arith.mulf %261, %262 : vector<8x32xf32>
    %264 = vector.broadcast %31 : vector<1x32xf32> to vector<8x32xf32>
    %265 = arith.addf %263, %264 : vector<8x32xf32>
    %266 = arith.negf %265 : vector<8x32xf32>
    %267 = math.exp %266 : vector<8x32xf32>
    %cst_228 = arith.constant 1.000000e+00 : f32
    %268 = vector.broadcast %cst_228 : f32 to vector<8x32xf32>
    %269 = arith.addf %268, %267 : vector<8x32xf32>
    %270 = arith.divf %268, %269 : vector<8x32xf32>
    %271 = arith.mulf %265, %270 : vector<8x32xf32>
    %cst_229 = arith.constant dense<0.000000e+00> : vector<8x32xf32>
    %272 = tpu.matmul %271, %28, %cst_229 {dimension_numbers = #tpu.dot_dimension_numbers<[1], [0], [0], [1], [0, 0, 1, 1], [], []>} : vector<8x32xf32>, vector<32x32xf32>, vector<8x32xf32> -> vector<8x32xf32>
    %273 = vector.broadcast %27 : vector<1x32xf32> to vector<8x32xf32>
    %274 = arith.addf %272, %273 : vector<8x32xf32>
    %275 = arith.addf %210, %274 : vector<8x32xf32>
    %cst_230 = arith.constant dense<0.000000e+00> : vector<8xf32>
    %276 = vector.multi_reduction <add>, %275, %cst_230 [1] : vector<8x32xf32> to vector<8xf32>
    %277 = vector.shape_cast %276 : vector<8xf32> to vector<8x1xf32>
    %cst_231 = arith.constant 3.200000e+01 : f32
    %278 = vector.broadcast %cst_231 : f32 to vector<8x1xf32>
    %279 = arith.divf %277, %278 : vector<8x1xf32>
    %280 = vector.broadcast %279 : vector<8x1xf32> to vector<8x32xf32>
    %281 = arith.subf %275, %280 : vector<8x32xf32>
    %282 = arith.mulf %281, %281 : vector<8x32xf32>
    %cst_232 = arith.constant dense<0.000000e+00> : vector<8xf32>
    %283 = vector.multi_reduction <add>, %282, %cst_232 [1] : vector<8x32xf32> to vector<8xf32>
    %284 = vector.shape_cast %283 : vector<8xf32> to vector<8x1xf32>
    %cst_233 = arith.constant 3.200000e+01 : f32
    %285 = vector.broadcast %cst_233 : f32 to vector<8x1xf32>
    %286 = arith.divf %284, %285 : vector<8x1xf32>
    %287 = vector.broadcast %279 : vector<8x1xf32> to vector<8x32xf32>
    %288 = arith.subf %275, %287 : vector<8x32xf32>
    %cst_234 = arith.constant 9.99999974E-6 : f32
    %289 = vector.broadcast %cst_234 : f32 to vector<8x1xf32>
    %290 = arith.addf %286, %289 : vector<8x1xf32>
    %291 = math.rsqrt %290 : vector<8x1xf32>
    %292 = vector.broadcast %291 : vector<8x1xf32> to vector<8x32xf32>
    %293 = arith.mulf %288, %292 : vector<8x32xf32>
    %294 = vector.broadcast %20 : vector<1x32xf32> to vector<8x32xf32>
    %295 = arith.mulf %293, %294 : vector<8x32xf32>
    %296 = vector.broadcast %19 : vector<1x32xf32> to vector<8x32xf32>
    %297 = arith.addf %295, %296 : vector<8x32xf32>
    %cst_235 = arith.constant dense<0.000000e+00> : vector<8x32xf32>
    %298 = tpu.matmul %297, %22, %cst_235 {dimension_numbers = #tpu.dot_dimension_numbers<[1], [0], [0], [1], [0, 0, 1, 1], [], []>} : vector<8x32xf32>, vector<32x32xf32>, vector<8x32xf32> -> vector<8x32xf32>
    %299 = vector.broadcast %21 : vector<1x32xf32> to vector<8x32xf32>
    %300 = arith.addf %298, %299 : vector<8x32xf32>
    %301 = arith.addf %275, %300 : vector<8x32xf32>
    %cst_236 = arith.constant dense<0.000000e+00> : vector<8xf32>
    %302 = vector.multi_reduction <add>, %301, %cst_236 [1] : vector<8x32xf32> to vector<8xf32>
    %303 = vector.shape_cast %302 : vector<8xf32> to vector<8x1xf32>
    %cst_237 = arith.constant 3.200000e+01 : f32
    %304 = vector.broadcast %cst_237 : f32 to vector<8x1xf32>
    %305 = arith.divf %303, %304 : vector<8x1xf32>
    %306 = vector.broadcast %305 : vector<8x1xf32> to vector<8x32xf32>
    %307 = arith.subf %301, %306 : vector<8x32xf32>
    %308 = arith.mulf %307, %307 : vector<8x32xf32>
    %cst_238 = arith.constant dense<0.000000e+00> : vector<8xf32>
    %309 = vector.multi_reduction <add>, %308, %cst_238 [1] : vector<8x32xf32> to vector<8xf32>
    %310 = vector.shape_cast %309 : vector<8xf32> to vector<8x1xf32>
    %cst_239 = arith.constant 3.200000e+01 : f32
    %311 = vector.broadcast %cst_239 : f32 to vector<8x1xf32>
    %312 = arith.divf %310, %311 : vector<8x1xf32>
    %313 = vector.broadcast %305 : vector<8x1xf32> to vector<8x32xf32>
    %314 = arith.subf %301, %313 : vector<8x32xf32>
    %cst_240 = arith.constant 9.99999974E-6 : f32
    %315 = vector.broadcast %cst_240 : f32 to vector<8x1xf32>
    %316 = arith.addf %312, %315 : vector<8x1xf32>
    %317 = math.rsqrt %316 : vector<8x1xf32>
    %318 = vector.broadcast %317 : vector<8x1xf32> to vector<8x32xf32>
    %319 = arith.mulf %314, %318 : vector<8x32xf32>
    %320 = vector.broadcast %41 : vector<1x32xf32> to vector<8x32xf32>
    %321 = arith.mulf %319, %320 : vector<8x32xf32>
    %322 = vector.broadcast %40 : vector<1x32xf32> to vector<8x32xf32>
    %323 = arith.addf %321, %322 : vector<8x32xf32>
    %324 = arith.negf %323 : vector<8x32xf32>
    %325 = math.exp %324 : vector<8x32xf32>
    %cst_241 = arith.constant 1.000000e+00 : f32
    %326 = vector.broadcast %cst_241 : f32 to vector<8x32xf32>
    %327 = arith.addf %326, %325 : vector<8x32xf32>
    %328 = arith.divf %326, %327 : vector<8x32xf32>
    %329 = arith.mulf %323, %328 : vector<8x32xf32>
    %cst_242 = arith.constant dense<0.000000e+00> : vector<8x32xf32>
    %330 = tpu.matmul %329, %37, %cst_242 {dimension_numbers = #tpu.dot_dimension_numbers<[1], [0], [0], [1], [0, 0, 1, 1], [], []>} : vector<8x32xf32>, vector<32x32xf32>, vector<8x32xf32> -> vector<8x32xf32>
    %cst_243 = arith.constant dense<0.000000e+00> : vector<8x32xf32>
    %331 = tpu.matmul %113, %44, %cst_243 {dimension_numbers = #tpu.dot_dimension_numbers<[1], [0], [0], [1], [0, 0, 1, 1], [], []>} : vector<8x128xf32>, vector<128x32xf32>, vector<8x32xf32> -> vector<8x32xf32>
    %332 = arith.addf %330, %331 : vector<8x32xf32>
    %333 = vector.broadcast %36 : vector<1x32xf32> to vector<8x32xf32>
    %334 = arith.addf %332, %333 : vector<8x32xf32>
    %cst_244 = arith.constant dense<0.000000e+00> : vector<8xf32>
    %335 = vector.multi_reduction <add>, %334, %cst_244 [1] : vector<8x32xf32> to vector<8xf32>
    %336 = vector.shape_cast %335 : vector<8xf32> to vector<8x1xf32>
    %cst_245 = arith.constant 3.200000e+01 : f32
    %337 = vector.broadcast %cst_245 : f32 to vector<8x1xf32>
    %338 = arith.divf %336, %337 : vector<8x1xf32>
    %339 = vector.broadcast %338 : vector<8x1xf32> to vector<8x32xf32>
    %340 = arith.subf %334, %339 : vector<8x32xf32>
    %341 = arith.mulf %340, %340 : vector<8x32xf32>
    %cst_246 = arith.constant dense<0.000000e+00> : vector<8xf32>
    %342 = vector.multi_reduction <add>, %341, %cst_246 [1] : vector<8x32xf32> to vector<8xf32>
    %343 = vector.shape_cast %342 : vector<8xf32> to vector<8x1xf32>
    %cst_247 = arith.constant 3.200000e+01 : f32
    %344 = vector.broadcast %cst_247 : f32 to vector<8x1xf32>
    %345 = arith.divf %343, %344 : vector<8x1xf32>
    %346 = vector.broadcast %338 : vector<8x1xf32> to vector<8x32xf32>
    %347 = arith.subf %334, %346 : vector<8x32xf32>
    %cst_248 = arith.constant 9.99999974E-6 : f32
    %348 = vector.broadcast %cst_248 : f32 to vector<8x1xf32>
    %349 = arith.addf %345, %348 : vector<8x1xf32>
    %350 = math.rsqrt %349 : vector<8x1xf32>
    %351 = vector.broadcast %350 : vector<8x1xf32> to vector<8x32xf32>
    %352 = arith.mulf %347, %351 : vector<8x32xf32>
    %353 = vector.broadcast %43 : vector<1x32xf32> to vector<8x32xf32>
    %354 = arith.mulf %352, %353 : vector<8x32xf32>
    %355 = vector.broadcast %42 : vector<1x32xf32> to vector<8x32xf32>
    %356 = arith.addf %354, %355 : vector<8x32xf32>
    %357 = arith.negf %356 : vector<8x32xf32>
    %358 = math.exp %357 : vector<8x32xf32>
    %cst_249 = arith.constant 1.000000e+00 : f32
    %359 = vector.broadcast %cst_249 : f32 to vector<8x32xf32>
    %360 = arith.addf %359, %358 : vector<8x32xf32>
    %361 = arith.divf %359, %360 : vector<8x32xf32>
    %362 = arith.mulf %356, %361 : vector<8x32xf32>
    %cst_250 = arith.constant dense<0.000000e+00> : vector<8x32xf32>
    %363 = tpu.matmul %362, %39, %cst_250 {dimension_numbers = #tpu.dot_dimension_numbers<[1], [0], [0], [1], [0, 0, 1, 1], [], []>} : vector<8x32xf32>, vector<32x32xf32>, vector<8x32xf32> -> vector<8x32xf32>
    %364 = vector.broadcast %38 : vector<1x32xf32> to vector<8x32xf32>
    %365 = arith.addf %363, %364 : vector<8x32xf32>
    %366 = arith.addf %301, %365 : vector<8x32xf32>
    %cst_251 = arith.constant dense<0.000000e+00> : vector<8xf32>
    %367 = vector.multi_reduction <add>, %366, %cst_251 [1] : vector<8x32xf32> to vector<8xf32>
    %368 = vector.shape_cast %367 : vector<8xf32> to vector<8x1xf32>
    %cst_252 = arith.constant 3.200000e+01 : f32
    %369 = vector.broadcast %cst_252 : f32 to vector<8x1xf32>
    %370 = arith.divf %368, %369 : vector<8x1xf32>
    %371 = vector.broadcast %370 : vector<8x1xf32> to vector<8x32xf32>
    %372 = arith.subf %366, %371 : vector<8x32xf32>
    %373 = arith.mulf %372, %372 : vector<8x32xf32>
    %cst_253 = arith.constant dense<0.000000e+00> : vector<8xf32>
    %374 = vector.multi_reduction <add>, %373, %cst_253 [1] : vector<8x32xf32> to vector<8xf32>
    %375 = vector.shape_cast %374 : vector<8xf32> to vector<8x1xf32>
    %cst_254 = arith.constant 3.200000e+01 : f32
    %376 = vector.broadcast %cst_254 : f32 to vector<8x1xf32>
    %377 = arith.divf %375, %376 : vector<8x1xf32>
    %378 = vector.broadcast %370 : vector<8x1xf32> to vector<8x32xf32>
    %379 = arith.subf %366, %378 : vector<8x32xf32>
    %cst_255 = arith.constant 9.99999974E-6 : f32
    %380 = vector.broadcast %cst_255 : f32 to vector<8x1xf32>
    %381 = arith.addf %377, %380 : vector<8x1xf32>
    %382 = math.rsqrt %381 : vector<8x1xf32>
    %383 = vector.broadcast %382 : vector<8x1xf32> to vector<8x32xf32>
    %384 = arith.mulf %379, %383 : vector<8x32xf32>
    %385 = vector.broadcast %55 : vector<1x32xf32> to vector<8x32xf32>
    %386 = arith.mulf %384, %385 : vector<8x32xf32>
    %387 = vector.broadcast %54 : vector<1x32xf32> to vector<8x32xf32>
    %388 = arith.addf %386, %387 : vector<8x32xf32>
    %cst_256 = arith.constant dense<0.000000e+00> : vector<8x32xf32>
    %389 = tpu.matmul %388, %57, %cst_256 {dimension_numbers = #tpu.dot_dimension_numbers<[1], [0], [0], [1], [0, 0, 1, 1], [], []>} : vector<8x32xf32>, vector<32x32xf32>, vector<8x32xf32> -> vector<8x32xf32>
    %390 = vector.broadcast %56 : vector<1x32xf32> to vector<8x32xf32>
    %391 = arith.addf %389, %390 : vector<8x32xf32>
    %392 = arith.addf %366, %391 : vector<8x32xf32>
    %cst_257 = arith.constant dense<0.000000e+00> : vector<8xf32>
    %393 = vector.multi_reduction <add>, %392, %cst_257 [1] : vector<8x32xf32> to vector<8xf32>
    %394 = vector.shape_cast %393 : vector<8xf32> to vector<8x1xf32>
    %cst_258 = arith.constant 3.200000e+01 : f32
    %395 = vector.broadcast %cst_258 : f32 to vector<8x1xf32>
    %396 = arith.divf %394, %395 : vector<8x1xf32>
    %397 = vector.broadcast %396 : vector<8x1xf32> to vector<8x32xf32>
    %398 = arith.subf %392, %397 : vector<8x32xf32>
    %399 = arith.mulf %398, %398 : vector<8x32xf32>
    %cst_259 = arith.constant dense<0.000000e+00> : vector<8xf32>
    %400 = vector.multi_reduction <add>, %399, %cst_259 [1] : vector<8x32xf32> to vector<8xf32>
    %401 = vector.shape_cast %400 : vector<8xf32> to vector<8x1xf32>
    %cst_260 = arith.constant 3.200000e+01 : f32
    %402 = vector.broadcast %cst_260 : f32 to vector<8x1xf32>
    %403 = arith.divf %401, %402 : vector<8x1xf32>
    %404 = vector.broadcast %396 : vector<8x1xf32> to vector<8x32xf32>
    %405 = arith.subf %392, %404 : vector<8x32xf32>
    %cst_261 = arith.constant 9.99999974E-6 : f32
    %406 = vector.broadcast %cst_261 : f32 to vector<8x1xf32>
    %407 = arith.addf %403, %406 : vector<8x1xf32>
    %408 = math.rsqrt %407 : vector<8x1xf32>
    %409 = vector.broadcast %408 : vector<8x1xf32> to vector<8x32xf32>
    %410 = arith.mulf %405, %409 : vector<8x32xf32>
    %411 = vector.broadcast %50 : vector<1x32xf32> to vector<8x32xf32>
    %412 = arith.mulf %410, %411 : vector<8x32xf32>
    %413 = vector.broadcast %49 : vector<1x32xf32> to vector<8x32xf32>
    %414 = arith.addf %412, %413 : vector<8x32xf32>
    %415 = arith.negf %414 : vector<8x32xf32>
    %416 = math.exp %415 : vector<8x32xf32>
    %cst_262 = arith.constant 1.000000e+00 : f32
    %417 = vector.broadcast %cst_262 : f32 to vector<8x32xf32>
    %418 = arith.addf %417, %416 : vector<8x32xf32>
    %419 = arith.divf %417, %418 : vector<8x32xf32>
    %420 = arith.mulf %414, %419 : vector<8x32xf32>
    %cst_263 = arith.constant dense<0.000000e+00> : vector<8x32xf32>
    %421 = tpu.matmul %420, %46, %cst_263 {dimension_numbers = #tpu.dot_dimension_numbers<[1], [0], [0], [1], [0, 0, 1, 1], [], []>} : vector<8x32xf32>, vector<32x32xf32>, vector<8x32xf32> -> vector<8x32xf32>
    %cst_264 = arith.constant dense<0.000000e+00> : vector<8x32xf32>
    %422 = tpu.matmul %113, %53, %cst_264 {dimension_numbers = #tpu.dot_dimension_numbers<[1], [0], [0], [1], [0, 0, 1, 1], [], []>} : vector<8x128xf32>, vector<128x32xf32>, vector<8x32xf32> -> vector<8x32xf32>
    %423 = arith.addf %421, %422 : vector<8x32xf32>
    %424 = vector.broadcast %45 : vector<1x32xf32> to vector<8x32xf32>
    %425 = arith.addf %423, %424 : vector<8x32xf32>
    %cst_265 = arith.constant dense<0.000000e+00> : vector<8xf32>
    %426 = vector.multi_reduction <add>, %425, %cst_265 [1] : vector<8x32xf32> to vector<8xf32>
    %427 = vector.shape_cast %426 : vector<8xf32> to vector<8x1xf32>
    %cst_266 = arith.constant 3.200000e+01 : f32
    %428 = vector.broadcast %cst_266 : f32 to vector<8x1xf32>
    %429 = arith.divf %427, %428 : vector<8x1xf32>
    %430 = vector.broadcast %429 : vector<8x1xf32> to vector<8x32xf32>
    %431 = arith.subf %425, %430 : vector<8x32xf32>
    %432 = arith.mulf %431, %431 : vector<8x32xf32>
    %cst_267 = arith.constant dense<0.000000e+00> : vector<8xf32>
    %433 = vector.multi_reduction <add>, %432, %cst_267 [1] : vector<8x32xf32> to vector<8xf32>
    %434 = vector.shape_cast %433 : vector<8xf32> to vector<8x1xf32>
    %cst_268 = arith.constant 3.200000e+01 : f32
    %435 = vector.broadcast %cst_268 : f32 to vector<8x1xf32>
    %436 = arith.divf %434, %435 : vector<8x1xf32>
    %437 = vector.broadcast %429 : vector<8x1xf32> to vector<8x32xf32>
    %438 = arith.subf %425, %437 : vector<8x32xf32>
    %cst_269 = arith.constant 9.99999974E-6 : f32
    %439 = vector.broadcast %cst_269 : f32 to vector<8x1xf32>
    %440 = arith.addf %436, %439 : vector<8x1xf32>
    %441 = math.rsqrt %440 : vector<8x1xf32>
    %442 = vector.broadcast %441 : vector<8x1xf32> to vector<8x32xf32>
    %443 = arith.mulf %438, %442 : vector<8x32xf32>
    %444 = vector.broadcast %52 : vector<1x32xf32> to vector<8x32xf32>
    %445 = arith.mulf %443, %444 : vector<8x32xf32>
    %446 = vector.broadcast %51 : vector<1x32xf32> to vector<8x32xf32>
    %447 = arith.addf %445, %446 : vector<8x32xf32>
    %448 = arith.negf %447 : vector<8x32xf32>
    %449 = math.exp %448 : vector<8x32xf32>
    %cst_270 = arith.constant 1.000000e+00 : f32
    %450 = vector.broadcast %cst_270 : f32 to vector<8x32xf32>
    %451 = arith.addf %450, %449 : vector<8x32xf32>
    %452 = arith.divf %450, %451 : vector<8x32xf32>
    %453 = arith.mulf %447, %452 : vector<8x32xf32>
    %cst_271 = arith.constant dense<0.000000e+00> : vector<8x32xf32>
    %454 = tpu.matmul %453, %48, %cst_271 {dimension_numbers = #tpu.dot_dimension_numbers<[1], [0], [0], [1], [0, 0, 1, 1], [], []>} : vector<8x32xf32>, vector<32x32xf32>, vector<8x32xf32> -> vector<8x32xf32>
    %455 = vector.broadcast %47 : vector<1x32xf32> to vector<8x32xf32>
    %456 = arith.addf %454, %455 : vector<8x32xf32>
    %457 = arith.addf %392, %456 : vector<8x32xf32>
    %cst_272 = arith.constant dense<0.000000e+00> : vector<8x32xf32>
    %458 = tpu.matmul %457, %67, %cst_272 {dimension_numbers = #tpu.dot_dimension_numbers<[1], [0], [0], [1], [0, 0, 1, 1], [], []>} : vector<8x32xf32>, vector<32x32xf32>, vector<8x32xf32> -> vector<8x32xf32>
    %459 = vector.broadcast %66 : vector<1x32xf32> to vector<8x32xf32>
    %460 = arith.addf %458, %459 : vector<8x32xf32>
    %461 = tpu.concatenate %460, %301 in 1 : vector<8x32xf32>, vector<8x32xf32> -> vector<8x64xf32>
    %cst_273 = arith.constant dense<0.000000e+00> : vector<8xf32>
    %462 = vector.multi_reduction <add>, %461, %cst_273 [1] : vector<8x64xf32> to vector<8xf32>
    %463 = vector.shape_cast %462 : vector<8xf32> to vector<8x1xf32>
    %cst_274 = arith.constant 6.400000e+01 : f32
    %464 = vector.broadcast %cst_274 : f32 to vector<8x1xf32>
    %465 = arith.divf %463, %464 : vector<8x1xf32>
    %466 = vector.broadcast %465 : vector<8x1xf32> to vector<8x64xf32>
    %467 = arith.subf %461, %466 : vector<8x64xf32>
    %468 = arith.mulf %467, %467 : vector<8x64xf32>
    %cst_275 = arith.constant dense<0.000000e+00> : vector<8xf32>
    %469 = vector.multi_reduction <add>, %468, %cst_275 [1] : vector<8x64xf32> to vector<8xf32>
    %470 = vector.shape_cast %469 : vector<8xf32> to vector<8x1xf32>
    %cst_276 = arith.constant 6.400000e+01 : f32
    %471 = vector.broadcast %cst_276 : f32 to vector<8x1xf32>
    %472 = arith.divf %470, %471 : vector<8x1xf32>
    %473 = vector.broadcast %465 : vector<8x1xf32> to vector<8x64xf32>
    %474 = arith.subf %461, %473 : vector<8x64xf32>
    %cst_277 = arith.constant 9.99999974E-6 : f32
    %475 = vector.broadcast %cst_277 : f32 to vector<8x1xf32>
    %476 = arith.addf %472, %475 : vector<8x1xf32>
    %477 = math.rsqrt %476 : vector<8x1xf32>
    %478 = vector.broadcast %477 : vector<8x1xf32> to vector<8x64xf32>
    %479 = arith.mulf %474, %478 : vector<8x64xf32>
    %480 = vector.broadcast %75 : vector<1x64xf32> to vector<8x64xf32>
    %481 = arith.mulf %479, %480 : vector<8x64xf32>
    %482 = vector.broadcast %74 : vector<1x64xf32> to vector<8x64xf32>
    %483 = arith.addf %481, %482 : vector<8x64xf32>
    %484 = arith.negf %483 : vector<8x64xf32>
    %485 = math.exp %484 : vector<8x64xf32>
    %cst_278 = arith.constant 1.000000e+00 : f32
    %486 = vector.broadcast %cst_278 : f32 to vector<8x64xf32>
    %487 = arith.addf %486, %485 : vector<8x64xf32>
    %488 = arith.divf %486, %487 : vector<8x64xf32>
    %489 = arith.mulf %483, %488 : vector<8x64xf32>
    %cst_279 = arith.constant dense<0.000000e+00> : vector<8x32xf32>
    %490 = tpu.matmul %489, %71, %cst_279 {dimension_numbers = #tpu.dot_dimension_numbers<[1], [0], [0], [1], [0, 0, 1, 1], [], []>} : vector<8x64xf32>, vector<64x32xf32>, vector<8x32xf32> -> vector<8x32xf32>
    %cst_280 = arith.constant dense<0.000000e+00> : vector<8x32xf32>
    %491 = tpu.matmul %113, %78, %cst_280 {dimension_numbers = #tpu.dot_dimension_numbers<[1], [0], [0], [1], [0, 0, 1, 1], [], []>} : vector<8x128xf32>, vector<128x32xf32>, vector<8x32xf32> -> vector<8x32xf32>
    %492 = arith.addf %490, %491 : vector<8x32xf32>
    %493 = vector.broadcast %70 : vector<1x32xf32> to vector<8x32xf32>
    %494 = arith.addf %492, %493 : vector<8x32xf32>
    %cst_281 = arith.constant dense<0.000000e+00> : vector<8xf32>
    %495 = vector.multi_reduction <add>, %494, %cst_281 [1] : vector<8x32xf32> to vector<8xf32>
    %496 = vector.shape_cast %495 : vector<8xf32> to vector<8x1xf32>
    %cst_282 = arith.constant 3.200000e+01 : f32
    %497 = vector.broadcast %cst_282 : f32 to vector<8x1xf32>
    %498 = arith.divf %496, %497 : vector<8x1xf32>
    %499 = vector.broadcast %498 : vector<8x1xf32> to vector<8x32xf32>
    %500 = arith.subf %494, %499 : vector<8x32xf32>
    %501 = arith.mulf %500, %500 : vector<8x32xf32>
    %cst_283 = arith.constant dense<0.000000e+00> : vector<8xf32>
    %502 = vector.multi_reduction <add>, %501, %cst_283 [1] : vector<8x32xf32> to vector<8xf32>
    %503 = vector.shape_cast %502 : vector<8xf32> to vector<8x1xf32>
    %cst_284 = arith.constant 3.200000e+01 : f32
    %504 = vector.broadcast %cst_284 : f32 to vector<8x1xf32>
    %505 = arith.divf %503, %504 : vector<8x1xf32>
    %506 = vector.broadcast %498 : vector<8x1xf32> to vector<8x32xf32>
    %507 = arith.subf %494, %506 : vector<8x32xf32>
    %cst_285 = arith.constant 9.99999974E-6 : f32
    %508 = vector.broadcast %cst_285 : f32 to vector<8x1xf32>
    %509 = arith.addf %505, %508 : vector<8x1xf32>
    %510 = math.rsqrt %509 : vector<8x1xf32>
    %511 = vector.broadcast %510 : vector<8x1xf32> to vector<8x32xf32>
    %512 = arith.mulf %507, %511 : vector<8x32xf32>
    %513 = vector.broadcast %77 : vector<1x32xf32> to vector<8x32xf32>
    %514 = arith.mulf %512, %513 : vector<8x32xf32>
    %515 = vector.broadcast %76 : vector<1x32xf32> to vector<8x32xf32>
    %516 = arith.addf %514, %515 : vector<8x32xf32>
    %517 = arith.negf %516 : vector<8x32xf32>
    %518 = math.exp %517 : vector<8x32xf32>
    %cst_286 = arith.constant 1.000000e+00 : f32
    %519 = vector.broadcast %cst_286 : f32 to vector<8x32xf32>
    %520 = arith.addf %519, %518 : vector<8x32xf32>
    %521 = arith.divf %519, %520 : vector<8x32xf32>
    %522 = arith.mulf %516, %521 : vector<8x32xf32>
    %cst_287 = arith.constant dense<0.000000e+00> : vector<8x32xf32>
    %523 = tpu.matmul %522, %73, %cst_287 {dimension_numbers = #tpu.dot_dimension_numbers<[1], [0], [0], [1], [0, 0, 1, 1], [], []>} : vector<8x32xf32>, vector<32x32xf32>, vector<8x32xf32> -> vector<8x32xf32>
    %524 = vector.broadcast %72 : vector<1x32xf32> to vector<8x32xf32>
    %525 = arith.addf %523, %524 : vector<8x32xf32>
    %cst_288 = arith.constant dense<0.000000e+00> : vector<8x32xf32>
    %526 = tpu.matmul %461, %69, %cst_288 {dimension_numbers = #tpu.dot_dimension_numbers<[1], [0], [0], [1], [0, 0, 1, 1], [], []>} : vector<8x64xf32>, vector<64x32xf32>, vector<8x32xf32> -> vector<8x32xf32>
    %527 = vector.broadcast %68 : vector<1x32xf32> to vector<8x32xf32>
    %528 = arith.addf %526, %527 : vector<8x32xf32>
    %529 = arith.addf %528, %525 : vector<8x32xf32>
    %cst_289 = arith.constant dense<0.000000e+00> : vector<8xf32>
    %530 = vector.multi_reduction <add>, %529, %cst_289 [1] : vector<8x32xf32> to vector<8xf32>
    %531 = vector.shape_cast %530 : vector<8xf32> to vector<8x1xf32>
    %cst_290 = arith.constant 3.200000e+01 : f32
    %532 = vector.broadcast %cst_290 : f32 to vector<8x1xf32>
    %533 = arith.divf %531, %532 : vector<8x1xf32>
    %534 = vector.broadcast %533 : vector<8x1xf32> to vector<8x32xf32>
    %535 = arith.subf %529, %534 : vector<8x32xf32>
    %536 = arith.mulf %535, %535 : vector<8x32xf32>
    %cst_291 = arith.constant dense<0.000000e+00> : vector<8xf32>
    %537 = vector.multi_reduction <add>, %536, %cst_291 [1] : vector<8x32xf32> to vector<8xf32>
    %538 = vector.shape_cast %537 : vector<8xf32> to vector<8x1xf32>
    %cst_292 = arith.constant 3.200000e+01 : f32
    %539 = vector.broadcast %cst_292 : f32 to vector<8x1xf32>
    %540 = arith.divf %538, %539 : vector<8x1xf32>
    %541 = vector.broadcast %533 : vector<8x1xf32> to vector<8x32xf32>
    %542 = arith.subf %529, %541 : vector<8x32xf32>
    %cst_293 = arith.constant 9.99999974E-6 : f32
    %543 = vector.broadcast %cst_293 : f32 to vector<8x1xf32>
    %544 = arith.addf %540, %543 : vector<8x1xf32>
    %545 = math.rsqrt %544 : vector<8x1xf32>
    %546 = vector.broadcast %545 : vector<8x1xf32> to vector<8x32xf32>
    %547 = arith.mulf %542, %546 : vector<8x32xf32>
    %548 = vector.broadcast %63 : vector<1x32xf32> to vector<8x32xf32>
    %549 = arith.mulf %547, %548 : vector<8x32xf32>
    %550 = vector.broadcast %62 : vector<1x32xf32> to vector<8x32xf32>
    %551 = arith.addf %549, %550 : vector<8x32xf32>
    %cst_294 = arith.constant dense<0.000000e+00> : vector<8x32xf32>
    %552 = tpu.matmul %551, %65, %cst_294 {dimension_numbers = #tpu.dot_dimension_numbers<[1], [0], [0], [1], [0, 0, 1, 1], [], []>} : vector<8x32xf32>, vector<32x32xf32>, vector<8x32xf32> -> vector<8x32xf32>
    %553 = vector.broadcast %64 : vector<1x32xf32> to vector<8x32xf32>
    %554 = arith.addf %552, %553 : vector<8x32xf32>
    %555 = arith.addf %529, %554 : vector<8x32xf32>
    %cst_295 = arith.constant dense<0.000000e+00> : vector<8x64xf32>
    %556 = tpu.matmul %555, %84, %cst_295 {dimension_numbers = #tpu.dot_dimension_numbers<[1], [0], [0], [1], [0, 0, 1, 1], [], []>} : vector<8x32xf32>, vector<32x64xf32>, vector<8x64xf32> -> vector<8x64xf32>
    %557 = vector.broadcast %83 : vector<1x64xf32> to vector<8x64xf32>
    %558 = arith.addf %556, %557 : vector<8x64xf32>
    %559 = tpu.concatenate %558, %207 in 1 : vector<8x64xf32>, vector<8x64xf32> -> vector<8x128xf32>
    %cst_296 = arith.constant dense<0.000000e+00> : vector<8xf32>
    %560 = vector.multi_reduction <add>, %559, %cst_296 [1] : vector<8x128xf32> to vector<8xf32>
    %561 = vector.shape_cast %560 : vector<8xf32> to vector<8x1xf32>
    %cst_297 = arith.constant 1.280000e+02 : f32
    %562 = vector.broadcast %cst_297 : f32 to vector<8x1xf32>
    %563 = arith.divf %561, %562 : vector<8x1xf32>
    %564 = vector.broadcast %563 : vector<8x1xf32> to vector<8x128xf32>
    %565 = arith.subf %559, %564 : vector<8x128xf32>
    %566 = arith.mulf %565, %565 : vector<8x128xf32>
    %cst_298 = arith.constant dense<0.000000e+00> : vector<8xf32>
    %567 = vector.multi_reduction <add>, %566, %cst_298 [1] : vector<8x128xf32> to vector<8xf32>
    %568 = vector.shape_cast %567 : vector<8xf32> to vector<8x1xf32>
    %cst_299 = arith.constant 1.280000e+02 : f32
    %569 = vector.broadcast %cst_299 : f32 to vector<8x1xf32>
    %570 = arith.divf %568, %569 : vector<8x1xf32>
    %571 = vector.broadcast %563 : vector<8x1xf32> to vector<8x128xf32>
    %572 = arith.subf %559, %571 : vector<8x128xf32>
    %cst_300 = arith.constant 9.99999974E-6 : f32
    %573 = vector.broadcast %cst_300 : f32 to vector<8x1xf32>
    %574 = arith.addf %570, %573 : vector<8x1xf32>
    %575 = math.rsqrt %574 : vector<8x1xf32>
    %576 = vector.broadcast %575 : vector<8x1xf32> to vector<8x128xf32>
    %577 = arith.mulf %572, %576 : vector<8x128xf32>
    %578 = vector.broadcast %92 : vector<1x128xf32> to vector<8x128xf32>
    %579 = arith.mulf %577, %578 : vector<8x128xf32>
    %580 = vector.broadcast %91 : vector<1x128xf32> to vector<8x128xf32>
    %581 = arith.addf %579, %580 : vector<8x128xf32>
    %582 = arith.negf %581 : vector<8x128xf32>
    %583 = math.exp %582 : vector<8x128xf32>
    %cst_301 = arith.constant 1.000000e+00 : f32
    %584 = vector.broadcast %cst_301 : f32 to vector<8x128xf32>
    %585 = arith.addf %584, %583 : vector<8x128xf32>
    %586 = arith.divf %584, %585 : vector<8x128xf32>
    %587 = arith.mulf %581, %586 : vector<8x128xf32>
    %cst_302 = arith.constant dense<0.000000e+00> : vector<8x64xf32>
    %588 = tpu.matmul %587, %88, %cst_302 {dimension_numbers = #tpu.dot_dimension_numbers<[1], [0], [0], [1], [0, 0, 1, 1], [], []>} : vector<8x128xf32>, vector<128x64xf32>, vector<8x64xf32> -> vector<8x64xf32>
    %cst_303 = arith.constant dense<0.000000e+00> : vector<8x64xf32>
    %589 = tpu.matmul %113, %95, %cst_303 {dimension_numbers = #tpu.dot_dimension_numbers<[1], [0], [0], [1], [0, 0, 1, 1], [], []>} : vector<8x128xf32>, vector<128x64xf32>, vector<8x64xf32> -> vector<8x64xf32>
    %590 = arith.addf %588, %589 : vector<8x64xf32>
    %591 = vector.broadcast %87 : vector<1x64xf32> to vector<8x64xf32>
    %592 = arith.addf %590, %591 : vector<8x64xf32>
    %cst_304 = arith.constant dense<0.000000e+00> : vector<8xf32>
    %593 = vector.multi_reduction <add>, %592, %cst_304 [1] : vector<8x64xf32> to vector<8xf32>
    %594 = vector.shape_cast %593 : vector<8xf32> to vector<8x1xf32>
    %cst_305 = arith.constant 6.400000e+01 : f32
    %595 = vector.broadcast %cst_305 : f32 to vector<8x1xf32>
    %596 = arith.divf %594, %595 : vector<8x1xf32>
    %597 = vector.broadcast %596 : vector<8x1xf32> to vector<8x64xf32>
    %598 = arith.subf %592, %597 : vector<8x64xf32>
    %599 = arith.mulf %598, %598 : vector<8x64xf32>
    %cst_306 = arith.constant dense<0.000000e+00> : vector<8xf32>
    %600 = vector.multi_reduction <add>, %599, %cst_306 [1] : vector<8x64xf32> to vector<8xf32>
    %601 = vector.shape_cast %600 : vector<8xf32> to vector<8x1xf32>
    %cst_307 = arith.constant 6.400000e+01 : f32
    %602 = vector.broadcast %cst_307 : f32 to vector<8x1xf32>
    %603 = arith.divf %601, %602 : vector<8x1xf32>
    %604 = vector.broadcast %596 : vector<8x1xf32> to vector<8x64xf32>
    %605 = arith.subf %592, %604 : vector<8x64xf32>
    %cst_308 = arith.constant 9.99999974E-6 : f32
    %606 = vector.broadcast %cst_308 : f32 to vector<8x1xf32>
    %607 = arith.addf %603, %606 : vector<8x1xf32>
    %608 = math.rsqrt %607 : vector<8x1xf32>
    %609 = vector.broadcast %608 : vector<8x1xf32> to vector<8x64xf32>
    %610 = arith.mulf %605, %609 : vector<8x64xf32>
    %611 = vector.broadcast %94 : vector<1x64xf32> to vector<8x64xf32>
    %612 = arith.mulf %610, %611 : vector<8x64xf32>
    %613 = vector.broadcast %93 : vector<1x64xf32> to vector<8x64xf32>
    %614 = arith.addf %612, %613 : vector<8x64xf32>
    %615 = arith.negf %614 : vector<8x64xf32>
    %616 = math.exp %615 : vector<8x64xf32>
    %cst_309 = arith.constant 1.000000e+00 : f32
    %617 = vector.broadcast %cst_309 : f32 to vector<8x64xf32>
    %618 = arith.addf %617, %616 : vector<8x64xf32>
    %619 = arith.divf %617, %618 : vector<8x64xf32>
    %620 = arith.mulf %614, %619 : vector<8x64xf32>
    %cst_310 = arith.constant dense<0.000000e+00> : vector<8x64xf32>
    %621 = tpu.matmul %620, %90, %cst_310 {dimension_numbers = #tpu.dot_dimension_numbers<[1], [0], [0], [1], [0, 0, 1, 1], [], []>} : vector<8x64xf32>, vector<64x64xf32>, vector<8x64xf32> -> vector<8x64xf32>
    %622 = vector.broadcast %89 : vector<1x64xf32> to vector<8x64xf32>
    %623 = arith.addf %621, %622 : vector<8x64xf32>
    %cst_311 = arith.constant dense<0.000000e+00> : vector<8x64xf32>
    %624 = tpu.matmul %559, %86, %cst_311 {dimension_numbers = #tpu.dot_dimension_numbers<[1], [0], [0], [1], [0, 0, 1, 1], [], []>} : vector<8x128xf32>, vector<128x64xf32>, vector<8x64xf32> -> vector<8x64xf32>
    %625 = vector.broadcast %85 : vector<1x64xf32> to vector<8x64xf32>
    %626 = arith.addf %624, %625 : vector<8x64xf32>
    %627 = arith.addf %626, %623 : vector<8x64xf32>
    %cst_312 = arith.constant dense<0.000000e+00> : vector<8xf32>
    %628 = vector.multi_reduction <add>, %627, %cst_312 [1] : vector<8x64xf32> to vector<8xf32>
    %629 = vector.shape_cast %628 : vector<8xf32> to vector<8x1xf32>
    %cst_313 = arith.constant 6.400000e+01 : f32
    %630 = vector.broadcast %cst_313 : f32 to vector<8x1xf32>
    %631 = arith.divf %629, %630 : vector<8x1xf32>
    %632 = vector.broadcast %631 : vector<8x1xf32> to vector<8x64xf32>
    %633 = arith.subf %627, %632 : vector<8x64xf32>
    %634 = arith.mulf %633, %633 : vector<8x64xf32>
    %cst_314 = arith.constant dense<0.000000e+00> : vector<8xf32>
    %635 = vector.multi_reduction <add>, %634, %cst_314 [1] : vector<8x64xf32> to vector<8xf32>
    %636 = vector.shape_cast %635 : vector<8xf32> to vector<8x1xf32>
    %cst_315 = arith.constant 6.400000e+01 : f32
    %637 = vector.broadcast %cst_315 : f32 to vector<8x1xf32>
    %638 = arith.divf %636, %637 : vector<8x1xf32>
    %639 = vector.broadcast %631 : vector<8x1xf32> to vector<8x64xf32>
    %640 = arith.subf %627, %639 : vector<8x64xf32>
    %cst_316 = arith.constant 9.99999974E-6 : f32
    %641 = vector.broadcast %cst_316 : f32 to vector<8x1xf32>
    %642 = arith.addf %638, %641 : vector<8x1xf32>
    %643 = math.rsqrt %642 : vector<8x1xf32>
    %644 = vector.broadcast %643 : vector<8x1xf32> to vector<8x64xf32>
    %645 = arith.mulf %640, %644 : vector<8x64xf32>
    %646 = vector.broadcast %80 : vector<1x64xf32> to vector<8x64xf32>
    %647 = arith.mulf %645, %646 : vector<8x64xf32>
    %648 = vector.broadcast %79 : vector<1x64xf32> to vector<8x64xf32>
    %649 = arith.addf %647, %648 : vector<8x64xf32>
    %cst_317 = arith.constant dense<0.000000e+00> : vector<8x64xf32>
    %650 = tpu.matmul %649, %82, %cst_317 {dimension_numbers = #tpu.dot_dimension_numbers<[1], [0], [0], [1], [0, 0, 1, 1], [], []>} : vector<8x64xf32>, vector<64x64xf32>, vector<8x64xf32> -> vector<8x64xf32>
    %651 = vector.broadcast %81 : vector<1x64xf32> to vector<8x64xf32>
    %652 = arith.addf %650, %651 : vector<8x64xf32>
    %653 = arith.addf %627, %652 : vector<8x64xf32>
    %cst_318 = arith.constant dense<0.000000e+00> : vector<8x32xf32>
    %654 = tpu.matmul %653, %35, %cst_318 {dimension_numbers = #tpu.dot_dimension_numbers<[1], [0], [0], [1], [0, 0, 1, 1], [], []>} : vector<8x64xf32>, vector<64x32xf32>, vector<8x32xf32> -> vector<8x32xf32>
    %655 = vector.broadcast %34 : vector<1x32xf32> to vector<8x32xf32>
    %656 = arith.addf %654, %655 : vector<8x32xf32>
    %c0_319 = arith.constant 0 : index
    %c0_320 = arith.constant 0 : index
    %657 = vector.load %arg95[%c0_319, %c0_320] : memref<8x32xf32, #tpu.memory_space<vmem>>, vector<8x32xf32>
    tpu.vector_store %arg95[%c0_319, %c0_320], %656 {strides = array<i32>} : memref<8x32xf32, #tpu.memory_space<vmem>>, vector<8x32xf32>,
    return
  }
}

</mosaic_0001>

<bundles_post_ra>
// kernel: diffcdr_forward.1
= control target key start
LH: loop header
LB: loop body
LE: loop exit
PB: predicated region body
PF: predicated region fallthrough
CT: control target
= control target key end

     0   :  { %s7348_s6 = smov 1   ;;  %s7349_s10 = smov 2   ;;  %s8806_s0 = inlined_call_operand.smem [shape: u32[96], index: -1, kind: input, shape index: {}] }
   0x1   :  { %s7505_s5 = sld [smem:[%s8806_s0]]   ;;  %s7350_s14 = smov 3  }
   0x2   :  { %s7510_s9 = sld [smem:[%s8806_s0 + %s7348_s6]]   ;;  %s7351_s18 = smov 4  }
   0x3   :  { %s7515_s13 = sld [smem:[%s8806_s0 + %s7349_s10]]   ;;  %s7352_s22 = smov 5  }
   0x4   :  { %s7520_s17 = sld [smem:[%s8806_s0 + %s7350_s14]]   ;;  %s7353_s26 = smov 6  }
   0x5   :  { %s7525_s21 = sld [smem:[%s8806_s0 + %s7351_s18]]   ;;  %s7354_s30 = smov 7  }
   0x6   :  { %s7530_s25 = sld [smem:[%s8806_s0 + %s7352_s22]]   ;;  %s7355_s4 = smov 8  }
   0x7   :  { %8871 = sst [smem:[#allocation101_spill]] %s7505_s5  ;;  %s7356_s10 = smov 9  }
   0x8   :  { %8872 = sst [smem:[#allocation102_spill]] %s7510_s9  ;;  %s7357_s15 = smov 10  }
   0x9   :  { %8873 = sst [smem:[#allocation103_spill]] %s7515_s13  ;;  %s7358_s20 = smov 11  }
   0xa   :  { %8874 = sst [smem:[#allocation104_spill]] %s7520_s17  ;;  %s7360_s1 = smov 13  }
   0xb   :  { %8875 = sst [smem:[#allocation105_spill]] %s7525_s21  ;;  %s7361_s7 = smov 14  }
   0xc   :  { %8876 = sst [smem:[#allocation106_spill]] %s7530_s25  ;;  %s7363_s22 = smov 16  }
   0xd   :  { %s7535_s29 = sld [smem:[%s8806_s0 + %s7353_s26]]   ;;  %s7359_s26 = smov 12  }
   0xe   :  { %s7540_s3 = sld [smem:[%s8806_s0 + %s7354_s30]]   ;;  %s7364_s28 = smov 17  }
   0xf   :  { %s7545_s8 = sld [smem:[%s8806_s0 + %s7355_s4]]  }
  0x10   :  { %s7550_s14 = sld [smem:[%s8806_s0 + %s7356_s10]]  }
  0x11   :  { %s7555_s19 = sld [smem:[%s8806_s0 + %s7357_s15]]   ;;  %s7362_s15 = smov 15  }
  0x12   :  { %s7560_s24 = sld [smem:[%s8806_s0 + %s7358_s20]]  }
  0x13   :  { %8877 = sst [smem:[#allocation107_spill]] %s7535_s29 }
  0x14   :  { %8878 = sst [smem:[#allocation108_spill]] %s7540_s3 }
  0x15   :  { %8879 = sst [smem:[#allocation109_spill]] %s7545_s8 }
  0x16   :  { %8880 = sst [smem:[#allocation110_spill]] %s7550_s14 }
  0x17   :  { %8881 = sst [smem:[#allocation111_spill]] %s7555_s19 }
  0x18   :  { %8882 = sst [smem:[#allocation112_spill]] %s7560_s24 }
  0x19   :  { %s7565_s30 = sld [smem:[%s8806_s0 + %s7359_s26]]  }
  0x1a   :  { %s7570_s6 = sld [smem:[%s8806_s0 + %s7360_s1]]  }
  0x1b   :  { %s7575_s12 = sld [smem:[%s8806_s0 + %s7361_s7]]   ;;  %s7365_s7 = smov 18  }
  0x1c   :  { %s7580_s20 = sld [smem:[%s8806_s0 + %s7362_s15]]   ;;  %s7366_s15 = smov 19  }
  0x1d   :  { %s7585_s27 = sld [smem:[%s8806_s0 + %s7363_s22]]   ;;  %s7367_s22 = smov 20  }
  0x1e   :  { %s7590_s4 = sld [smem:[%s8806_s0 + %s7364_s28]]   ;;  %s7368_s28 = smov 21  }
  0x1f   :  { %8883 = sst [smem:[#allocation113_spill]] %s7565_s30 }
  0x20   :  { %8884 = sst [smem:[#allocation114_spill]] %s7570_s6 }
  0x21   :  { %8885 = sst [smem:[#allocation115_spill]] %s7575_s12 }
  0x22   :  { %8886 = sst [smem:[#allocation116_spill]] %s7580_s20 }
  0x23   :  { %8887 = sst [smem:[#allocation117_spill]] %s7585_s27 }
  0x24   :  { %8888 = sst [smem:[#allocation118_spill]] %s7590_s4 }
  0x25   :  { %s7595_s25 = sld [smem:[%s8806_s0 + %s7365_s7]]   ;;  %s7369_s7 = smov 22  }
  0x26   :  { %s7600_s17 = sld [smem:[%s8806_s0 + %s7366_s15]]   ;;  %s7370_s15 = smov 23  }
  0x27   :  { %s7605_s21 = sld [smem:[%s8806_s0 + %s7367_s22]]   ;;  %s7371_s22 = smov 24  }
  0x28   :  { %s7610_s29 = sld [smem:[%s8806_s0 + %s7368_s28]]   ;;  %s7372_s28 = smov 25  }
  0x29   :  { %s7620_s24 = sld [smem:[%s8806_s0 + %s7370_s15]]   ;;  %s7374_s15 = smov 27  }
  0x2a   :  { %s7625_s20 = sld [smem:[%s8806_s0 + %s7371_s22]]   ;;  %s7375_s22 = smov 28  }
  0x2b   :  { %8889 = sst [smem:[#allocation119_spill]] %s7595_s25 }
  0x2c   :  { %8890 = sst [smem:[#allocation120_spill]] %s7600_s17 }
  0x2d   :  { %s7615_s25 = sld [smem:[%s8806_s0 + %s7369_s7]]   ;;  %s7373_s7 = smov 26  }
  0x2e   :  { %8891 = sst [smem:[#allocation121_spill]] %s7610_s29 }
  0x2f   :  { %8893 = sst [smem:[#allocation123_spill]] %s7620_s24 }
  0x30   :  { %s7630_s29 = sld [smem:[%s8806_s0 + %s7372_s28]]   ;;  %s7376_s28 = smov 29  }
  0x31   :  { %s7635_s27 = sld [smem:[%s8806_s0 + %s7373_s7]]   ;;  %s7377_s7 = smov 30  }
  0x32   :  { %s7640_s24 = sld [smem:[%s8806_s0 + %s7374_s15]]   ;;  %s7378_s15 = smov 31  }
  0x33   :  { %8892 = sst [smem:[#allocation122_spill]] %s7615_s25 }
  0x34   :  { %s7645_s30 = sld [smem:[%s8806_s0 + %s7375_s22]]   ;;  %s7379_s22 = smov 32  }
  0x35   :  { %s7655_s14 = sld [smem:[%s8806_s0 + %s7377_s7]]   ;;  %s7381_s7 = smov 34  }
  0x36   :  { %8894 = sst [smem:[#allocation124_spill]] %s7630_s29 }
  0x37   :  { %8895 = sst [smem:[#allocation125_spill]] %s7635_s27 }
  0x38   :  { %8896 = sst [smem:[#allocation126_spill]] %s7640_s24 }
  0x39   :  { %s7650_s29 = sld [smem:[%s8806_s0 + %s7376_s28]]   ;;  %s7380_s28 = smov 33  }
  0x3a   :  { %s7660_s24 = sld [smem:[%s8806_s0 + %s7378_s15]]   ;;  %s7382_s15 = smov 35  }
  0x3b   :  { %s7665_s6 = sld [smem:[%s8806_s0 + %s7379_s22]]   ;;  %s7383_s22 = smov 36  }
  0x3c   :  { %s7670_s12 = sld [smem:[%s8806_s0 + %s7380_s28]]   ;;  %s7384_s28 = smov 37  }
  0x3d   :  { %s7675_s19 = sld [smem:[%s8806_s0 + %s7381_s7]]   ;;  %s7385_s7 = smov 38  }
  0x3e   :  { %s7680_s4 = sld [smem:[%s8806_s0 + %s7382_s15]]   ;;  %s7386_s15 = smov 39  }
  0x3f   :  { %8897 = sst [smem:[#allocation127_spill]] %s7650_s29 }
  0x40   :  { %8898 = sst [smem:[#allocation128_spill]] %s7660_s24 }
  0x41   :  { %8899 = sst [smem:[#allocation129_spill]] %s7665_s6 }
  0x42   :  { %s7685_s6 = sld [smem:[%s8806_s0 + %s7383_s22]]   ;;  %s7387_s22 = smov 40  }
  0x43   :  { %8900 = sst [smem:[#allocation130_spill]] %s7675_s19 }
  0x44   :  { %8901 = sst [smem:[#allocation131_spill]] %s7680_s4 }
  0x45   :  { %s7690_s3 = sld [smem:[%s8806_s0 + %s7384_s28]]   ;;  %s7388_s28 = smov 41  }
  0x46   :  { %s7695_s19 = sld [smem:[%s8806_s0 + %s7385_s7]]   ;;  %s7389_s7 = smov 42  }
  0x47   :  { %s7700_s9 = sld [smem:[%s8806_s0 + %s7386_s15]]   ;;  %s7390_s15 = smov 43  }
  0x48   :  { %8902 = sst [smem:[#allocation132_spill]] %s7685_s6 }
  0x49   :  { %s7705_s6 = sld [smem:[%s8806_s0 + %s7387_s22]]   ;;  %s7391_s22 = smov 44  }
  0x4a   :  { %s7710_s5 = sld [smem:[%s8806_s0 + %s7388_s28]]   ;;  %s7392_s28 = smov 45  }
  0x4b   :  { %s7720_s13 = sld [smem:[%s8806_s0 + %s7390_s15]]   ;;  %s7394_s15 = smov 47  }
  0x4c   :  { %8903 = sst [smem:[#allocation133_spill]] %s7695_s19 }
  0x4d   :  { %8904 = sst [smem:[#allocation134_spill]] %s7700_s9 }
  0x4e   :  { %s7715_s19 = sld [smem:[%s8806_s0 + %s7389_s7]]   ;;  %s7393_s7 = smov 46  }
  0x4f   :  { %s7725_s8 = sld [smem:[%s8806_s0 + %s7391_s22]]   ;;  %s7395_s22 = smov 48  }
  0x50   :  { %8905 = sst [smem:[#allocation135_spill]] %s7710_s5 }
  0x51   :  { %8906 = sst [smem:[#allocation136_spill]] %s7720_s13 }
  0x52   :  { %s7730_s5 = sld [smem:[%s8806_s0 + %s7392_s28]]   ;;  %s7396_s28 = smov 49  }
  0x53   :  { %s7735_s9 = sld [smem:[%s8806_s0 + %s7393_s7]]   ;;  %s7397_s7 = smov 50  }
  0x54   :  { %s7740_s13 = sld [smem:[%s8806_s0 + %s7394_s15]]   ;;  %s7398_s15 = smov 51  }
  0x55   :  { %8907 = sst [smem:[#allocation137_spill]] %s7725_s8 }
  0x56   :  { %s7745_s8 = sld [smem:[%s8806_s0 + %s7395_s22]]   ;;  %s7399_s22 = smov 52  }
  0x57   :  { %s7755_s4 = sld [smem:[%s8806_s0 + %s7397_s7]]   ;;  %s7401_s7 = smov 54  }
  0x58   :  { %8908 = sst [smem:[#allocation138_spill]] %s7730_s5 }
  0x59   :  { %s7750_s5 = sld [smem:[%s8806_s0 + %s7396_s28]]   ;;  %s7400_s28 = smov 53  }
  0x5a   :  { %8909 = sst [smem:[#allocation139_spill]] %s7740_s13 }
  0x5b   :  { %s7760_s13 = sld [smem:[%s8806_s0 + %s7398_s15]]   ;;  %s7402_s15 = smov 55  }
  0x5c   :  { %8910 = sst [smem:[#allocation140_spill]] %s7745_s8 }
  0x5d   :  { %8911 = sst [smem:[#allocation141_spill]] %s7755_s4 }
  0x5e   :  { %s7765_s8 = sld [smem:[%s8806_s0 + %s7399_s22]]   ;;  %s7403_s22 = smov 56  }
  0x5f   :  { %s7770_s24 = sld [smem:[%s8806_s0 + %s7400_s28]]   ;;  %s7404_s28 = smov 57  }
  0x60   :  { %s7775_s4 = sld [smem:[%s8806_s0 + %s7401_s7]]   ;;  %s7405_s7 = smov 58  }
  0x61   :  { %s7780_s29 = sld [smem:[%s8806_s0 + %s7402_s15]]   ;;  %s7406_s15 = smov 59  }
  0x62   :  { %s7795_s27 = sld [smem:[%s8806_s0 + %s7405_s7]]   ;;  %s7409_s7 = smov 62  }
  0x64   :  { %8912 = sst [smem:[#allocation142_spill]] %s7765_s8 }
  0x65   :  { %8913 = sst [smem:[#allocation143_spill]] %s7770_s24 }
  0x66   :  { %s7785_s8 = sld [smem:[%s8806_s0 + %s7403_s22]]   ;;  %s7407_s22 = smov 60  }
  0x67   :  { %8914 = sst [smem:[#allocation144_spill]] %s7780_s29 }
  0x68   :  { %s7790_s24 = sld [smem:[%s8806_s0 + %s7404_s28]]   ;;  %s7408_s28 = smov 61  }
  0x69   :  { %8916 = sst [smem:[#allocation146_spill]] %s7795_s27 }
  0x6a   :  { %s7800_s29 = sld [smem:[%s8806_s0 + %s7406_s15]]   ;;  %s7410_s15 = smov 63  }
  0x6b   :  { %s7810_s25 = sld [smem:[%s8806_s0 + %s7408_s28]]   ;;  %s7412_s28 = smov 65  }
  0x6c   :  { %8915 = sst [smem:[#allocation145_spill]] %s7785_s8 }
  0x6d   :  { %s7805_s8 = sld [smem:[%s8806_s0 + %s7407_s22]]   ;;  %s7411_s22 = smov 64  }
  0x6e   :  { %s7815_s27 = sld [smem:[%s8806_s0 + %s7409_s7]]   ;;  %s7413_s7 = smov 66  }
  0x6f   :  { %s7830_s17 = sld [smem:[%s8806_s0 + %s7412_s28]]   ;;  %s7416_s28 = smov 69  }
  0x70   :  { %8917 = sst [smem:[#allocation147_spill]] %s7800_s29 }
  0x71   :  { %s7820_s29 = sld [smem:[%s8806_s0 + %s7410_s15]]   ;;  %s7414_s15 = smov 67  }
  0x73   :  { %8918 = sst [smem:[#allocation148_spill]] %s7805_s8 }
  0x74   :  { %8919 = sst [smem:[#allocation149_spill]] %s7815_s27 }
  0x75   :  { %s7825_s8 = sld [smem:[%s8806_s0 + %s7411_s22]]   ;;  %s7415_s22 = smov 68  }
  0x76   :  { %8922 = sst [smem:[#allocation152_spill]] %s7830_s17 }
  0x77   :  { %8920 = sst [smem:[#allocation150_spill]] %s7820_s29 }
  0x78   :  { %s7835_s27 = sld [smem:[%s8806_s0 + %s7413_s7]]   ;;  %s7417_s7 = smov 70  }
  0x79   :  { %s7840_s29 = sld [smem:[%s8806_s0 + %s7414_s15]]   ;;  %s7418_s15 = smov 71  }
  0x7a   :  { %s7850_s17 = sld [smem:[%s8806_s0 + %s7416_s28]]   ;;  %s7420_s28 = smov 73  }
  0x7b   :  { %8921 = sst [smem:[#allocation151_spill]] %s7825_s8 }
  0x7c   :  { %s7845_s8 = sld [smem:[%s8806_s0 + %s7415_s22]]   ;;  %s7419_s22 = smov 72  }
  0x7e   :  { %8923 = sst [smem:[#allocation153_spill]] %s7835_s27 }
  0x7f   :  { %8924 = sst [smem:[#allocation154_spill]] %s7840_s29 }
  0x80   :  { %8926 = sst [smem:[#allocation156_spill]] %s7850_s17 }
  0x81   :  { %s7855_s27 = sld [smem:[%s8806_s0 + %s7417_s7]]   ;;  %s7421_s7 = smov 74  }
  0x82   :  { %8925 = sst [smem:[#allocation155_spill]] %s7845_s8 }
  0x83   :  { %s7860_s29 = sld [smem:[%s8806_s0 + %s7418_s15]]   ;;  %s7422_s15 = smov 75  }
  0x84   :  { %s7865_s8 = sld [smem:[%s8806_s0 + %s7419_s22]]   ;;  %s7423_s22 = smov 76  }
  0x85   :  { %s7870_s17 = sld [smem:[%s8806_s0 + %s7420_s28]]   ;;  %s7424_s28 = smov 77  }
  0x87   :  { %8927 = sst [smem:[#allocation157_spill]] %s7855_s27 }
  0x88   :  { %s7875_s27 = sld [smem:[%s8806_s0 + %s7421_s7]]   ;;  %s7425_s7 = smov 78  }
  0x89   :  { %8928 = sst [smem:[#allocation158_spill]] %s7860_s29 }
  0x8a   :  { %8929 = sst [smem:[#allocation159_spill]] %s7865_s8 }
  0x8b   :  { %8930 = sst [smem:[#allocation160_spill]] %s7870_s17 }
  0x8c   :  { %s7880_s29 = sld [smem:[%s8806_s0 + %s7422_s15]]   ;;  %s7426_s15 = smov 79  }
  0x8d   :  { %s7885_s8 = sld [smem:[%s8806_s0 + %s7423_s22]]   ;;  %s7427_s22 = smov 80  }
  0x8e   :  { %8931 = sst [smem:[#allocation161_spill]] %s7875_s27 }
  0x8f   :  { %s7890_s17 = sld [smem:[%s8806_s0 + %s7424_s28]]   ;;  %s7428_s28 = smov 81  }
  0x90   :  { %s7895_s27 = sld [smem:[%s8806_s0 + %s7425_s7]]   ;;  %s7429_s7 = smov 82  }
  0x92   :  { %8932 = sst [smem:[#allocation162_spill]] %s7880_s29 }
  0x93   :  { %8933 = sst [smem:[#allocation163_spill]] %s7885_s8 }
  0x94   :  { %s7900_s29 = sld [smem:[%s8806_s0 + %s7426_s15]]   ;;  %s7430_s15 = smov 83  }
  0x95   :  { %8934 = sst [smem:[#allocation164_spill]] %s7890_s17 }
  0x96   :  { %8935 = sst [smem:[#allocation165_spill]] %s7895_s27 }
  0x97   :  { %s7905_s8 = sld [smem:[%s8806_s0 + %s7427_s22]]   ;;  %s7431_s22 = smov 84  }
  0x98   :  { %s7910_s17 = sld [smem:[%s8806_s0 + %s7428_s28]]   ;;  %s7432_s28 = smov 85  }
  0x99   :  { %s7915_s27 = sld [smem:[%s8806_s0 + %s7429_s7]]   ;;  %s7433_s7 = smov 86  }
  0x9a   :  { %8936 = sst [smem:[#allocation166_spill]] %s7900_s29 }
  0x9b   :  { %s7920_s29 = sld [smem:[%s8806_s0 + %s7430_s15]]   ;;  %s7434_s15 = smov 87  }
  0x9d   :  { %8937 = sst [smem:[#allocation167_spill]] %s7905_s8 }
  0x9e   :  { %8938 = sst [smem:[#allocation168_spill]] %s7910_s17 }
  0x9f   :  { %8939 = sst [smem:[#allocation169_spill]] %s7915_s27 }
  0xa0   :  { %s7925_s8 = sld [smem:[%s8806_s0 + %s7431_s22]]   ;;  %s7435_s22 = smov 88  }
  0xa1   :  { %8940 = sst [smem:[#allocation170_spill]] %s7920_s29 }
  0xa2   :  { %s7930_s17 = sld [smem:[%s8806_s0 + %s7432_s28]]   ;;  %s7436_s28 = smov 89  }
  0xa3   :  { %s7935_s27 = sld [smem:[%s8806_s0 + %s7433_s7]]   ;;  %s7437_s7 = smov 90  }
  0xa4   :  { %s7940_s29 = sld [smem:[%s8806_s0 + %s7434_s15]]   ;;  %s7438_s15 = smov 91  }
  0xa6   :  { %8941 = sst [smem:[#allocation171_spill]] %s7925_s8 }
  0xa7   :  { %s7945_s8 = sld [smem:[%s8806_s0 + %s7435_s22]]   ;;  %s7439_s22 = smov 92  }
  0xa8   :  { %8942 = sst [smem:[#allocation172_spill]] %s7930_s17 }
  0xa9   :  { %8943 = sst [smem:[#allocation173_spill]] %s7935_s27 }
  0xaa   :  { %8944 = sst [smem:[#allocation174_spill]] %s7940_s29 }
  0xab   :  { %s7950_s17 = sld [smem:[%s8806_s0 + %s7436_s28]]   ;;  %s7440_s28 = smov 93  }
  0xac   :  { %s7955_s27 = sld [smem:[%s8806_s0 + %s7437_s7]]   ;;  %s7441_s7 = smov 94  }
  0xad   :  { %8945 = sst [smem:[#allocation175_spill]] %s7945_s8 }
  0xae   :  { %s7960_s29 = sld [smem:[%s8806_s0 + %s7438_s15]]   ;;  %s7442_s15 = smov 95  }
  0xaf   :  { %s7965_s8 = sld [smem:[%s8806_s0 + %s7439_s22]]  }
  0xb1   :  { %8946 = sst [smem:[#allocation176_spill]] %s7950_s17 }
  0xb2   :  { %8947 = sst [smem:[#allocation177_spill]] %s7955_s27 }
  0xb3   :  { %s7970_s17 = sld [smem:[%s8806_s0 + %s7440_s28]]  }
  0xb4   :  { %8948 = sst [smem:[#allocation178_spill]] %s7960_s29 }
  0xb5   :  { %s7975_s27 = sld [smem:[%s8806_s0 + %s7441_s7]]  }
  0xb6   :  { %s7980_s29 = sld [smem:[%s8806_s0 + %s7442_s15]]  }
  0xb7   :  { %196 = vsyncpa [#allocation3], 0 }
  0xb8   :  { %197 = vsyncpa [#allocation5], 0 }
  0xb9   :  { %198 = vsyncpa [#allocation8], 0 }
  0xba   :  { %199 = vsyncpa [#allocation11], 0 }
  0xbb   :  { %200 = vsyncpa [#allocation14], 0 }
  0xbc   :  { %201 = vsyncpa [#allocation17], 0 }
  0xbd   :  { %202 = vsyncpa [#allocation20], 0 }
  0xbe   :  { %203 = vsyncpa [#allocation23], 0 }
  0xbf   :  { %204 = vsyncpa [#allocation26], 0 }
  0xc0   :  { %205 = vsyncpa [#allocation29], 0 }
  0xc1   :  { %206 = vsyncpa [#allocation32], 0 }
  0xc2   :  { %207 = vsyncpa [#allocation35], 0 }
  0xc3   :  { %208 = vsyncpa [#allocation38], 0 }
  0xc4   :  { %209 = vsyncpa [#allocation41], 0 }
  0xc5   :  { %210 = vsyncpa [#allocation44], 0 }
  0xc6   :  { %211 = vsyncpa [#allocation47], 0 }
  0xc7   :  { %212 = vsyncpa [#allocation50], 0 }
  0xc8   :  { %213 = vsyncpa [#allocation53], 0 }
  0xc9   :  { %214 = vsyncpa [#allocation56], 0 }
  0xca   :  { %215 = vsyncpa [#allocation59], 0 }
  0xcb   :  { %216 = vsyncpa [#allocation62], 0 }
  0xcc   :  { %217 = vsyncpa [#allocation65], 0 }
  0xcd   :  { %218 = vsyncpa [#allocation68], 0 }
  0xce   :  { %219 = vsyncpa [#allocation71], 0 }
  0xcf   :  { %220 = vsyncpa [#allocation74], 0  ;;  %s7443_s0 = smov [#allocation4]   ;;  %s7444_s23 = smov [#allocation7]  }
  0xd0   :  { %s275_s22 = sshll.u32 %s7443_s0, 4  ;;  %s299_s26 = sshll.u32 %s7444_s23, 4  ;;  %s276_s22 = int_to_ptr.vmem [resolvable:$true] %s275_s22  ;;  %s300_s26 = int_to_ptr.vmem [resolvable:$true] %s299_s26 }
  0xd1   :  { %s6220_s28 = scalar_lea.hbm %s7605_s21, 16 }
  0xd2   :  { %p6221_p0 = scmp.ne.s32.totalorder %s7605_s21, %s6220_s28  ;;  %p6224_p1 = scmp.lt.u32.totalorder %s6220_s28, %s7605_s21 }
  0xd4   :  { %p6226_p2 = pnand %p6224_p1, %p6221_p0 }
  0xd6   :  { %6229 = shalt.err (!%p6226_p2)
}
  0xd7   :  { %s6230_s1 = scalar_lea.vmem %s276_s22, 16  ;;  %s6234_s2 = scalar_lea.vmem %s276_s22, 32 }
  0xd8   :  { %p6231_p3 = scmp.ne.s32.totalorder %s276_s22, %s6230_s1  ;;  %p6235_p4 = scmp.lt.s32.totalorder %s276_s22, %s276_s22 }
  0xd9   :  { %p6236_p5 = scmp.lt.s32.totalorder %s6234_s2, %s6230_s1 }
  0xdb   :  { %p6237_p6 = por %p6236_p5, %p6235_p4 }
  0xdd   :  { %p6238_p7 = pnand %p6237_p6, %p6231_p3 }
  0xdf   :  { %6241 = shalt.err (!%p6238_p7)
}
  0xe0   :  { %278 = dma.hbm_to_vmem [thread:$0]  %s7605_s21, 16, %s276_s22, [#allocation5]  }
  0xe1   :  { %s6242_s7 = scalar_lea.hbm %s7625_s20, 16 }
  0xe2   :  { %p6243_p8 = scmp.ne.s32.totalorder %s7625_s20, %s6242_s7  ;;  %p6246_p9 = scmp.lt.u32.totalorder %s6242_s7, %s7625_s20 }
  0xe4   :  { %p6248_p10 = pnand %p6246_p9, %p6243_p8 }
  0xe6   :  { %6251 = shalt.err (!%p6248_p10)
}
  0xe7   :  { %s6252_s10 = scalar_lea.vmem %s300_s26, 16  ;;  %s6256_s11 = scalar_lea.vmem %s300_s26, 32 }
  0xe8   :  { %p6253_p11 = scmp.ne.s32.totalorder %s300_s26, %s6252_s10  ;;  %p6257_p12 = scmp.lt.s32.totalorder %s300_s26, %s300_s26 }
  0xe9   :  { %p6258_p13 = scmp.lt.s32.totalorder %s6256_s11, %s6252_s10 }
  0xeb   :  { %p6259_p0 = por %p6258_p13, %p6257_p12 }
  0xed   :  { %p6260_p1 = pnand %p6259_p0, %p6253_p11 }
  0xef   :  { %6263 = shalt.err (!%p6260_p1)
}
  0xf0   :  { %302 = dma.hbm_to_vmem [thread:$0]  %s7625_s20, 16, %s300_s26, [#allocation8]  }
  0xf1   :  { %s7445_s15 = smov [#allocation10]   ;;  %s7446_s16 = smov [#allocation13]  }
  0xf2   :  { %s323_s21 = sshll.u32 %s7445_s15, 4  ;;  %s343_s18 = sshll.u32 %s7446_s16, 4  ;;  %s324_s21 = int_to_ptr.vmem [resolvable:$true] %s323_s21  ;;  %s344_s18 = int_to_ptr.vmem [resolvable:$true] %s343_s18 }
  0xf3   :  { %s6264_s0 = scalar_lea.hbm %s7645_s30, 16 }
  0xf4   :  { %p6265_p2 = scmp.ne.s32.totalorder %s7645_s30, %s6264_s0  ;;  %p6268_p3 = scmp.lt.u32.totalorder %s6264_s0, %s7645_s30 }
  0xf6   :  { %p6270_p4 = pnand %p6268_p3, %p6265_p2 }
  0xf8   :  { %6273 = shalt.err (!%p6270_p4)
}
  0xf9   :  { %s6274_s22 = scalar_lea.vmem %s324_s21, 16  ;;  %s6278_s23 = scalar_lea.vmem %s324_s21, 32 }
  0xfa   :  { %p6275_p5 = scmp.ne.s32.totalorder %s324_s21, %s6274_s22  ;;  %p6279_p6 = scmp.lt.s32.totalorder %s324_s21, %s324_s21 }
  0xfb   :  { %p6280_p7 = scmp.lt.s32.totalorder %s6278_s23, %s6274_s22 }
  0xfd   :  { %p6281_p8 = por %p6280_p7, %p6279_p6 }
  0xff   :  { %p6282_p9 = pnand %p6281_p8, %p6275_p5 }
 0x101   :  { %6285 = shalt.err (!%p6282_p9)
}
 0x102   :  { %326 = dma.hbm_to_vmem [thread:$0]  %s7645_s30, 16, %s324_s21, [#allocation11]  }
 0x103   :  { %s6286_s20 = scalar_lea.hbm %s7655_s14, 16 }
 0x104   :  { %p6287_p10 = scmp.ne.s32.totalorder %s7655_s14, %s6286_s20  ;;  %p6290_p11 = scmp.lt.u32.totalorder %s6286_s20, %s7655_s14 }
 0x106   :  { %p6292_p12 = pnand %p6290_p11, %p6287_p10 }
 0x108   :  { %6295 = shalt.err (!%p6292_p12)
}
 0x109   :  { %s6296_s26 = scalar_lea.vmem %s344_s18, 16  ;;  %s6300_s28 = scalar_lea.vmem %s344_s18, 32 }
 0x10a   :  { %p6297_p13 = scmp.ne.s32.totalorder %s344_s18, %s6296_s26  ;;  %p6301_p0 = scmp.lt.s32.totalorder %s344_s18, %s344_s18 }
 0x10b   :  { %p6302_p1 = scmp.lt.s32.totalorder %s6300_s28, %s6296_s26 }
 0x10d   :  { %p6303_p2 = por %p6302_p1, %p6301_p0 }
 0x10f   :  { %p6304_p3 = pnand %p6303_p2, %p6297_p13 }
 0x111   :  { %6307 = shalt.err (!%p6304_p3)
}
 0x112   :  { %346 = dma.hbm_to_vmem [thread:$0]  %s7655_s14, 16, %s344_s18, [#allocation14]  }
 0x113   :  { %s7447_s1 = smov [#allocation16]   ;;  %s7448_s2 = smov [#allocation19]  }
 0x114   :  { %s365_s30 = sshll.u32 %s7447_s1, 4  ;;  %s389_s7 = sshll.u32 %s7448_s2, 4  ;;  %s366_s30 = int_to_ptr.vmem [resolvable:$true] %s365_s30  ;;  %s390_s7 = int_to_ptr.vmem [resolvable:$true] %s389_s7 }
 0x115   :  { %s6308_s10 = scalar_lea.hbm %s7670_s12, 16 }
 0x116   :  { %p6309_p4 = scmp.ne.s32.totalorder %s7670_s12, %s6308_s10  ;;  %p6312_p5 = scmp.lt.u32.totalorder %s6308_s10, %s7670_s12 }
 0x118   :  { %p6314_p6 = pnand %p6312_p5, %p6309_p4 }
 0x11a   :  { %6317 = shalt.err (!%p6314_p6)
}
 0x11b   :  { %s6318_s11 = scalar_lea.vmem %s366_s30, 16  ;;  %s6322_s15 = scalar_lea.vmem %s366_s30, 32 }
 0x11c   :  { %p6319_p7 = scmp.ne.s32.totalorder %s366_s30, %s6318_s11  ;;  %p6323_p8 = scmp.lt.s32.totalorder %s366_s30, %s366_s30 }
 0x11d   :  { %p6324_p9 = scmp.lt.s32.totalorder %s6322_s15, %s6318_s11 }
 0x11f   :  { %p6325_p10 = por %p6324_p9, %p6323_p8 }
 0x121   :  { %p6326_p11 = pnand %p6325_p10, %p6319_p7 }
 0x123   :  { %6329 = shalt.err (!%p6326_p11)
}
 0x124   :  { %368 = dma.hbm_to_vmem [thread:$0]  %s7670_s12, 16, %s366_s30, [#allocation17]  }
 0x125   :  { %s6330_s14 = scalar_lea.hbm %s7690_s3, 16 }
 0x126   :  { %p6331_p12 = scmp.ne.s32.totalorder %s7690_s3, %s6330_s14  ;;  %p6334_p13 = scmp.lt.u32.totalorder %s6330_s14, %s7690_s3 }
 0x128   :  { %p6336_p0 = pnand %p6334_p13, %p6331_p12 }
 0x12a   :  { %6339 = shalt.err (!%p6336_p0)
}
 0x12b   :  { %s6340_s21 = scalar_lea.vmem %s390_s7, 16  ;;  %s6344_s16 = scalar_lea.vmem %s390_s7, 32 }
 0x12c   :  { %p6341_p1 = scmp.ne.s32.totalorder %s390_s7, %s6340_s21  ;;  %p6345_p2 = scmp.lt.s32.totalorder %s390_s7, %s390_s7 }
 0x12d   :  { %p6346_p3 = scmp.lt.s32.totalorder %s6344_s16, %s6340_s21 }
 0x12f   :  { %p6347_p4 = por %p6346_p3, %p6345_p2 }
 0x131   :  { %p6348_p5 = pnand %p6347_p4, %p6341_p1 }
 0x133   :  { %6351 = shalt.err (!%p6348_p5)
}
 0x134   :  { %392 = dma.hbm_to_vmem [thread:$0]  %s7690_s3, 16, %s390_s7, [#allocation20]  }
 0x135   :  { %s7449_s18 = smov [#allocation22]   ;;  %s7450_s0 = smov [#allocation25]  }
 0x136   :  { %s411_s12 = sshll.u32 %s7449_s18, 4  ;;  %s431_s22 = sshll.u32 %s7450_s0, 4  ;;  %s412_s12 = int_to_ptr.vmem [resolvable:$true] %s411_s12  ;;  %s432_s22 = int_to_ptr.vmem [resolvable:$true] %s431_s22 }
 0x137   :  { %s6352_s23 = scalar_lea.hbm %s7705_s6, 16 }
 0x138   :  { %p6353_p6 = scmp.ne.s32.totalorder %s7705_s6, %s6352_s23  ;;  %p6356_p7 = scmp.lt.u32.totalorder %s6352_s23, %s7705_s6 }
 0x13a   :  { %p6358_p8 = pnand %p6356_p7, %p6353_p6 }
 0x13c   :  { %6361 = shalt.err (!%p6358_p8)
}
 0x13d   :  { %s6362_s20 = scalar_lea.vmem %s412_s12, 16  ;;  %s6366_s26 = scalar_lea.vmem %s412_s12, 32 }
 0x13e   :  { %p6363_p9 = scmp.ne.s32.totalorder %s412_s12, %s6362_s20  ;;  %p6367_p10 = scmp.lt.s32.totalorder %s412_s12, %s412_s12 }
 0x13f   :  { %p6368_p11 = scmp.lt.s32.totalorder %s6366_s26, %s6362_s20 }
 0x141   :  { %p6369_p12 = por %p6368_p11, %p6367_p10 }
 0x143   :  { %p6370_p13 = pnand %p6369_p12, %p6363_p9 }
 0x145   :  { %6373 = shalt.err (!%p6370_p13)
}
 0x146   :  { %414 = dma.hbm_to_vmem [thread:$0]  %s7705_s6, 16, %s412_s12, [#allocation23]  }
 0x147   :  { %s6374_s3 = scalar_lea.hbm %s7715_s19, 16 }
 0x148   :  { %p6375_p0 = scmp.ne.s32.totalorder %s7715_s19, %s6374_s3  ;;  %p6378_p1 = scmp.lt.u32.totalorder %s6374_s3, %s7715_s19 }
 0x14a   :  { %p6380_p2 = pnand %p6378_p1, %p6375_p0 }
 0x14c   :  { %6383 = shalt.err (!%p6380_p2)
}
 0x14d   :  { %s6384_s28 = scalar_lea.vmem %s432_s22, 16  ;;  %s6388_s1 = scalar_lea.vmem %s432_s22, 32 }
 0x14e   :  { %p6385_p3 = scmp.ne.s32.totalorder %s432_s22, %s6384_s28  ;;  %p6389_p4 = scmp.lt.s32.totalorder %s432_s22, %s432_s22 }
 0x14f   :  { %p6390_p5 = scmp.lt.s32.totalorder %s6388_s1, %s6384_s28 }
 0x151   :  { %p6391_p6 = por %p6390_p5, %p6389_p4 }
 0x153   :  { %p6392_p7 = pnand %p6391_p6, %p6385_p3 }
 0x155   :  { %6395 = shalt.err (!%p6392_p7)
}
 0x156   :  { %434 = dma.hbm_to_vmem [thread:$0]  %s7715_s19, 16, %s432_s22, [#allocation26]  }
 0x157   :  { %s7451_s30 = smov [#allocation28]   ;;  %s7452_s2 = smov [#allocation31]  }
 0x158   :  { %s455_s6 = sshll.u32 %s7451_s30, 4  ;;  %s477_s7 = sshll.u32 %s7452_s2, 4  ;;  %s456_s6 = int_to_ptr.vmem [resolvable:$true] %s455_s6  ;;  %s478_s7 = int_to_ptr.vmem [resolvable:$true] %s477_s7 }
 0x159   :  { %s6396_s10 = scalar_lea.hbm %s7735_s9, 16 }
 0x15a   :  { %p6397_p8 = scmp.ne.s32.totalorder %s7735_s9, %s6396_s10  ;;  %p6400_p9 = scmp.lt.u32.totalorder %s6396_s10, %s7735_s9 }
 0x15c   :  { %p6402_p10 = pnand %p6400_p9, %p6397_p8 }
 0x15e   :  { %6405 = shalt.err (!%p6402_p10)
}
 0x15f   :  { %s6406_s11 = scalar_lea.vmem %s456_s6, 16  ;;  %s6410_s15 = scalar_lea.vmem %s456_s6, 32 }
 0x160   :  { %p6407_p11 = scmp.ne.s32.totalorder %s456_s6, %s6406_s11  ;;  %p6411_p12 = scmp.lt.s32.totalorder %s456_s6, %s456_s6 }
 0x161   :  { %p6412_p13 = scmp.lt.s32.totalorder %s6410_s15, %s6406_s11 }
 0x163   :  { %p6413_p0 = por %p6412_p13, %p6411_p12 }
 0x165   :  { %p6414_p1 = pnand %p6413_p0, %p6407_p11 }
 0x167   :  { %6417 = shalt.err (!%p6414_p1)
}
 0x168   :  { %458 = dma.hbm_to_vmem [thread:$0]  %s7735_s9, 16, %s456_s6, [#allocation29]  }
 0x169   :  { %s6418_s19 = scalar_lea.hbm %s7750_s5, 16 }
 0x16a   :  { %p6419_p2 = scmp.ne.s32.totalorder %s7750_s5, %s6418_s19  ;;  %p6422_p3 = scmp.lt.u32.totalorder %s6418_s19, %s7750_s5 }
 0x16c   :  { %p6424_p4 = pnand %p6422_p3, %p6419_p2 }
 0x16e   :  { %6427 = shalt.err (!%p6424_p4)
}
 0x16f   :  { %s6428_s14 = scalar_lea.vmem %s478_s7, 16  ;;  %s6432_s21 = scalar_lea.vmem %s478_s7, 32 }
 0x170   :  { %p6429_p5 = scmp.ne.s32.totalorder %s478_s7, %s6428_s14  ;;  %p6433_p6 = scmp.lt.s32.totalorder %s478_s7, %s478_s7 }
 0x171   :  { %p6434_p7 = scmp.lt.s32.totalorder %s6432_s21, %s6428_s14 }
 0x173   :  { %p6435_p8 = por %p6434_p7, %p6433_p6 }
 0x175   :  { %p6436_p9 = pnand %p6435_p8, %p6429_p5 }
 0x177   :  { %6439 = shalt.err (!%p6436_p9)
}
 0x178   :  { %480 = dma.hbm_to_vmem [thread:$0]  %s7750_s5, 16, %s478_s7, [#allocation32]  }
 0x179   :  { %s7453_s16 = smov [#allocation34]   ;;  %s7454_s18 = smov [#allocation37]  }
 0x17a   :  { %s497_s9 = sshll.u32 %s7453_s16, 4  ;;  %s519_s12 = sshll.u32 %s7454_s18, 4  ;;  %s498_s9 = int_to_ptr.vmem [resolvable:$true] %s497_s9  ;;  %s520_s12 = int_to_ptr.vmem [resolvable:$true] %s519_s12 }
 0x17b   :  { %s6440_s0 = scalar_lea.hbm %s7760_s13, 16 }
 0x17c   :  { %p6441_p10 = scmp.ne.s32.totalorder %s7760_s13, %s6440_s0  ;;  %p6444_p11 = scmp.lt.u32.totalorder %s6440_s0, %s7760_s13 }
 0x17e   :  { %p6446_p12 = pnand %p6444_p11, %p6441_p10 }
 0x180   :  { %6449 = shalt.err (!%p6446_p12)
}
 0x181   :  { %s6450_s22 = scalar_lea.vmem %s498_s9, 16  ;;  %s6454_s23 = scalar_lea.vmem %s498_s9, 32 }
 0x182   :  { %p6451_p13 = scmp.ne.s32.totalorder %s498_s9, %s6450_s22  ;;  %p6455_p0 = scmp.lt.s32.totalorder %s498_s9, %s498_s9 }
 0x183   :  { %p6456_p1 = scmp.lt.s32.totalorder %s6454_s23, %s6450_s22 }
 0x185   :  { %p6457_p2 = por %p6456_p1, %p6455_p0 }
 0x187   :  { %p6458_p3 = pnand %p6457_p2, %p6451_p13 }
 0x189   :  { %6461 = shalt.err (!%p6458_p3)
}
 0x18a   :  { %500 = dma.hbm_to_vmem [thread:$0]  %s7760_s13, 16, %s498_s9, [#allocation35]  }
 0x18b   :  { %s6462_s5 = scalar_lea.hbm %s7775_s4, 16 }
 0x18c   :  { %p6463_p4 = scmp.ne.s32.totalorder %s7775_s4, %s6462_s5  ;;  %p6466_p5 = scmp.lt.u32.totalorder %s6462_s5, %s7775_s4 }
 0x18e   :  { %p6468_p6 = pnand %p6466_p5, %p6463_p4 }
 0x190   :  { %6471 = shalt.err (!%p6468_p6)
}
 0x191   :  { %s6472_s20 = scalar_lea.vmem %s520_s12, 16  ;;  %s6476_s26 = scalar_lea.vmem %s520_s12, 32 }
 0x192   :  { %p6473_p7 = scmp.ne.s32.totalorder %s520_s12, %s6472_s20  ;;  %p6477_p8 = scmp.lt.s32.totalorder %s520_s12, %s520_s12 }
 0x193   :  { %p6478_p9 = scmp.lt.s32.totalorder %s6476_s26, %s6472_s20 }
 0x195   :  { %p6479_p10 = por %p6478_p9, %p6477_p8 }
 0x197   :  { %p6480_p11 = pnand %p6479_p10, %p6473_p7 }
 0x199   :  { %6483 = shalt.err (!%p6480_p11)
}
 0x19a   :  { %522 = dma.hbm_to_vmem [thread:$0]  %s7775_s4, 16, %s520_s12, [#allocation38]  }
 0x19b   :  { %s7455_s3 = smov [#allocation40]   ;;  %s7456_s28 = smov [#allocation43]  }
 0x19c   :  { %s541_s13 = sshll.u32 %s7455_s3, 4  ;;  %s565_s1 = sshll.u32 %s7456_s28, 4  ;;  %s542_s13 = int_to_ptr.vmem [resolvable:$true] %s541_s13  ;;  %s566_s1 = int_to_ptr.vmem [resolvable:$true] %s565_s1 }
 0x19d   :  { %s6484_s30 = scalar_lea.hbm %s7790_s24, 16 }
 0x19e   :  { %p6485_p12 = scmp.ne.s32.totalorder %s7790_s24, %s6484_s30  ;;  %p6488_p13 = scmp.lt.u32.totalorder %s6484_s30, %s7790_s24 }
 0x1a0   :  { %p6490_p0 = pnand %p6488_p13, %p6485_p12 }
 0x1a2   :  { %6493 = shalt.err (!%p6490_p0)
}
 0x1a3   :  { %s6494_s6 = scalar_lea.vmem %s542_s13, 16  ;;  %s6498_s2 = scalar_lea.vmem %s542_s13, 32 }
 0x1a4   :  { %p6495_p1 = scmp.ne.s32.totalorder %s542_s13, %s6494_s6  ;;  %p6499_p2 = scmp.lt.s32.totalorder %s542_s13, %s542_s13 }
 0x1a5   :  { %p6500_p3 = scmp.lt.s32.totalorder %s6498_s2, %s6494_s6 }
 0x1a7   :  { %p6501_p4 = por %p6500_p3, %p6499_p2 }
 0x1a9   :  { %p6502_p5 = pnand %p6501_p4, %p6495_p1 }
 0x1ab   :  { %6505 = shalt.err (!%p6502_p5)
}
 0x1ac   :  { %544 = dma.hbm_to_vmem [thread:$0]  %s7790_s24, 16, %s542_s13, [#allocation41]  }
 0x1ad   :  { %s6506_s4 = scalar_lea.hbm %s7810_s25, 16 }
 0x1ae   :  { %p6507_p6 = scmp.ne.s32.totalorder %s7810_s25, %s6506_s4  ;;  %p6510_p7 = scmp.lt.u32.totalorder %s6506_s4, %s7810_s25 }
 0x1b0   :  { %p6512_p8 = pnand %p6510_p7, %p6507_p6 }
 0x1b2   :  { %6515 = shalt.err (!%p6512_p8)
}
 0x1b3   :  { %s6516_s7 = scalar_lea.vmem %s566_s1, 16  ;;  %s6520_s10 = scalar_lea.vmem %s566_s1, 32 }
 0x1b4   :  { %p6517_p9 = scmp.ne.s32.totalorder %s566_s1, %s6516_s7  ;;  %p6521_p10 = scmp.lt.s32.totalorder %s566_s1, %s566_s1 }
 0x1b5   :  { %p6522_p11 = scmp.lt.s32.totalorder %s6520_s10, %s6516_s7 }
 0x1b7   :  { %p6523_p12 = por %p6522_p11, %p6521_p10 }
 0x1b9   :  { %p6524_p13 = pnand %p6523_p12, %p6517_p9 }
 0x1bb   :  { %6527 = shalt.err (!%p6524_p13)
}
 0x1bc   :  { %s8949_s11 = sld [smem:[#allocation150_spill]]  ;;  %s7457_s15 = smov [#allocation46]  }
 0x1bd   :  { %568 = dma.hbm_to_vmem [thread:$0]  %s7810_s25, 16, %s566_s1, [#allocation44]  }
 0x1be   :  { %s585_s24 = sshll.u32 %s7457_s15, 4  ;;  %s7458_s19 = smov [#allocation49]   ;;  %s586_s24 = int_to_ptr.vmem [resolvable:$true] %s585_s24 }
 0x1bf   :  { %s609_s14 = sshll.u32 %s7458_s19, 4  ;;  %s610_s14 = int_to_ptr.vmem [resolvable:$true] %s609_s14 }
 0x1c2   :  { %s6528_s21 = scalar_lea.hbm %s8949_s11, 16 }
 0x1c3   :  { %p6529_p0 = scmp.ne.s32.totalorder %s8949_s11, %s6528_s21  ;;  %p6532_p1 = scmp.lt.u32.totalorder %s6528_s21, %s8949_s11 }
 0x1c5   :  { %p6534_p2 = pnand %p6532_p1, %p6529_p0 }
 0x1c7   :  { %6537 = shalt.err (!%p6534_p2)
}
 0x1c8   :  { %s6538_s16 = scalar_lea.vmem %s586_s24, 16  ;;  %s6542_s9 = scalar_lea.vmem %s586_s24, 32 }
 0x1c9   :  { %p6539_p3 = scmp.ne.s32.totalorder %s586_s24, %s6538_s16  ;;  %p6543_p4 = scmp.lt.s32.totalorder %s586_s24, %s586_s24 }
 0x1ca   :  { %p6544_p5 = scmp.lt.s32.totalorder %s6542_s9, %s6538_s16 }
 0x1cc   :  { %p6545_p6 = por %p6544_p5, %p6543_p4 }
 0x1ce   :  { %p6546_p7 = pnand %p6545_p6, %p6539_p3 }
 0x1d0   :  { %6549 = shalt.err (!%p6546_p7)
}
 0x1d1   :  { %s8950_s25 = sld [smem:[#allocation154_spill]] }
 0x1d2   :  { %588 = dma.hbm_to_vmem [thread:$0]  %s8949_s11, 16, %s586_s24, [#allocation47]  }
 0x1d7   :  { %s6550_s18 = scalar_lea.hbm %s8950_s25, 16 }
 0x1d8   :  { %p6551_p8 = scmp.ne.s32.totalorder %s8950_s25, %s6550_s18  ;;  %p6554_p9 = scmp.lt.u32.totalorder %s6550_s18, %s8950_s25 }
 0x1da   :  { %p6556_p10 = pnand %p6554_p9, %p6551_p8 }
 0x1dc   :  { %6559 = shalt.err (!%p6556_p10)
}
 0x1dd   :  { %s6560_s12 = scalar_lea.vmem %s610_s14, 16  ;;  %s6564_s0 = scalar_lea.vmem %s610_s14, 32 }
 0x1de   :  { %p6561_p11 = scmp.ne.s32.totalorder %s610_s14, %s6560_s12  ;;  %p6565_p12 = scmp.lt.s32.totalorder %s610_s14, %s610_s14 }
 0x1df   :  { %p6566_p13 = scmp.lt.s32.totalorder %s6564_s0, %s6560_s12 }
 0x1e1   :  { %p6567_p0 = por %p6566_p13, %p6565_p12 }
 0x1e3   :  { %p6568_p1 = pnand %p6567_p0, %p6561_p11 }
 0x1e5   :  { %6571 = shalt.err (!%p6568_p1)
}
 0x1e6   :  { %s8951_s22 = sld [smem:[#allocation158_spill]]  ;;  %s7459_s23 = smov [#allocation52]  }
 0x1e7   :  { %612 = dma.hbm_to_vmem [thread:$0]  %s8950_s25, 16, %s610_s14, [#allocation50]  }
 0x1e8   :  { %s633_s5 = sshll.u32 %s7459_s23, 4  ;;  %s7460_s20 = smov [#allocation55]   ;;  %s634_s5 = int_to_ptr.vmem [resolvable:$true] %s633_s5 }
 0x1e9   :  { %s655_s26 = sshll.u32 %s7460_s20, 4  ;;  %s656_s26 = int_to_ptr.vmem [resolvable:$true] %s655_s26 }
 0x1ec   :  { %s6572_s3 = scalar_lea.hbm %s8951_s22, 16 }
 0x1ed   :  { %p6573_p2 = scmp.ne.s32.totalorder %s8951_s22, %s6572_s3  ;;  %p6576_p3 = scmp.lt.u32.totalorder %s6572_s3, %s8951_s22 }
 0x1ef   :  { %p6578_p4 = pnand %p6576_p3, %p6573_p2 }
 0x1f1   :  { %6581 = shalt.err (!%p6578_p4)
}
 0x1f2   :  { %s6582_s13 = scalar_lea.vmem %s634_s5, 16  ;;  %s6586_s28 = scalar_lea.vmem %s634_s5, 32 }
 0x1f3   :  { %p6583_p5 = scmp.ne.s32.totalorder %s634_s5, %s6582_s13  ;;  %p6587_p6 = scmp.lt.s32.totalorder %s634_s5, %s634_s5 }
 0x1f4   :  { %p6588_p7 = scmp.lt.s32.totalorder %s6586_s28, %s6582_s13 }
 0x1f6   :  { %p6589_p8 = por %p6588_p7, %p6587_p6 }
 0x1f8   :  { %p6590_p9 = pnand %p6589_p8, %p6583_p5 }
 0x1fa   :  { %6593 = shalt.err (!%p6590_p9)
}
 0x1fb   :  { %s8952_s1 = sld [smem:[#allocation161_spill]] }
 0x1fc   :  { %636 = dma.hbm_to_vmem [thread:$0]  %s8951_s22, 16, %s634_s5, [#allocation53]  }
 0x201   :  { %s6594_s30 = scalar_lea.hbm %s8952_s1, 16 }
 0x202   :  { %p6595_p10 = scmp.ne.s32.totalorder %s8952_s1, %s6594_s30  ;;  %p6598_p11 = scmp.lt.u32.totalorder %s6594_s30, %s8952_s1 }
 0x204   :  { %p6600_p12 = pnand %p6598_p11, %p6595_p10 }
 0x206   :  { %6603 = shalt.err (!%p6600_p12)
}
 0x207   :  { %s6604_s6 = scalar_lea.vmem %s656_s26, 16  ;;  %s6608_s2 = scalar_lea.vmem %s656_s26, 32 }
 0x208   :  { %p6605_p13 = scmp.ne.s32.totalorder %s656_s26, %s6604_s6  ;;  %p6609_p0 = scmp.lt.s32.totalorder %s656_s26, %s656_s26 }
 0x209   :  { %p6610_p1 = scmp.lt.s32.totalorder %s6608_s2, %s6604_s6 }
 0x20b   :  { %p6611_p2 = por %p6610_p1, %p6609_p0 }
 0x20d   :  { %p6612_p3 = pnand %p6611_p2, %p6605_p13 }
 0x20f   :  { %6615 = shalt.err (!%p6612_p3)
}
 0x210   :  { %s8953_s4 = sld [smem:[#allocation163_spill]]  ;;  %s7461_s7 = smov [#allocation58]  }
 0x211   :  { %658 = dma.hbm_to_vmem [thread:$0]  %s8952_s1, 16, %s656_s26, [#allocation56]  }
 0x212   :  { %s675_s10 = sshll.u32 %s7461_s7, 4  ;;  %s7462_s11 = smov [#allocation61]   ;;  %s676_s10 = int_to_ptr.vmem [resolvable:$true] %s675_s10 }
 0x213   :  { %s697_s15 = sshll.u32 %s7462_s11, 4  ;;  %s698_s15 = int_to_ptr.vmem [resolvable:$true] %s697_s15 }
 0x216   :  { %s6616_s24 = scalar_lea.hbm %s8953_s4, 16 }
 0x217   :  { %p6617_p4 = scmp.ne.s32.totalorder %s8953_s4, %s6616_s24  ;;  %p6620_p5 = scmp.lt.u32.totalorder %s6616_s24, %s8953_s4 }
 0x219   :  { %p6622_p6 = pnand %p6620_p5, %p6617_p4 }
 0x21b   :  { %6625 = shalt.err (!%p6622_p6)
}
 0x21c   :  { %s6626_s19 = scalar_lea.vmem %s676_s10, 16  ;;  %s6630_s14 = scalar_lea.vmem %s676_s10, 32 }
 0x21d   :  { %p6627_p7 = scmp.ne.s32.totalorder %s676_s10, %s6626_s19  ;;  %p6631_p8 = scmp.lt.s32.totalorder %s676_s10, %s676_s10 }
 0x21e   :  { %p6632_p9 = scmp.lt.s32.totalorder %s6630_s14, %s6626_s19 }
 0x220   :  { %p6633_p10 = por %p6632_p9, %p6631_p8 }
 0x222   :  { %p6634_p11 = pnand %p6633_p10, %p6627_p7 }
 0x224   :  { %6637 = shalt.err (!%p6634_p11)
}
 0x225   :  { %s8954_s21 = sld [smem:[#allocation166_spill]] }
 0x226   :  { %678 = dma.hbm_to_vmem [thread:$0]  %s8953_s4, 16, %s676_s10, [#allocation59]  }
 0x22b   :  { %s6638_s16 = scalar_lea.hbm %s8954_s21, 16 }
 0x22c   :  { %p6639_p12 = scmp.ne.s32.totalorder %s8954_s21, %s6638_s16  ;;  %p6642_p13 = scmp.lt.u32.totalorder %s6638_s16, %s8954_s21 }
 0x22e   :  { %p6644_p0 = pnand %p6642_p13, %p6639_p12 }
 0x230   :  { %6647 = shalt.err (!%p6644_p0)
}
 0x231   :  { %s6648_s9 = scalar_lea.vmem %s698_s15, 16  ;;  %s6652_s25 = scalar_lea.vmem %s698_s15, 32 }
 0x232   :  { %p6649_p1 = scmp.ne.s32.totalorder %s698_s15, %s6648_s9  ;;  %p6653_p2 = scmp.lt.s32.totalorder %s698_s15, %s698_s15 }
 0x233   :  { %p6654_p3 = scmp.lt.s32.totalorder %s6652_s25, %s6648_s9 }
 0x235   :  { %p6655_p4 = por %p6654_p3, %p6653_p2 }
 0x237   :  { %p6656_p5 = pnand %p6655_p4, %p6649_p1 }
 0x239   :  { %6659 = shalt.err (!%p6656_p5)
}
 0x23a   :  { %s8955_s18 = sld [smem:[#allocation169_spill]]  ;;  %s7463_s12 = smov [#allocation64]  }
 0x23b   :  { %700 = dma.hbm_to_vmem [thread:$0]  %s8954_s21, 16, %s698_s15, [#allocation62]  }
 0x23c   :  { %s719_s0 = sshll.u32 %s7463_s12, 4  ;;  %s7464_s22 = smov [#allocation67]   ;;  %s720_s0 = int_to_ptr.vmem [resolvable:$true] %s719_s0 }
 0x23d   :  { %s743_s23 = sshll.u32 %s7464_s22, 4  ;;  %s744_s23 = int_to_ptr.vmem [resolvable:$true] %s743_s23 }
 0x240   :  { %s6660_s5 = scalar_lea.hbm %s8955_s18, 16 }
 0x241   :  { %p6661_p6 = scmp.ne.s32.totalorder %s8955_s18, %s6660_s5  ;;  %p6664_p7 = scmp.lt.u32.totalorder %s6660_s5, %s8955_s18 }
 0x243   :  { %p6666_p8 = pnand %p6664_p7, %p6661_p6 }
 0x245   :  { %6669 = shalt.err (!%p6666_p8)
}
 0x246   :  { %s6670_s20 = scalar_lea.vmem %s720_s0, 16  ;;  %s6674_s26 = scalar_lea.vmem %s720_s0, 32 }
 0x247   :  { %p6671_p9 = scmp.ne.s32.totalorder %s720_s0, %s6670_s20  ;;  %p6675_p10 = scmp.lt.s32.totalorder %s720_s0, %s720_s0 }
 0x248   :  { %p6676_p11 = scmp.lt.s32.totalorder %s6674_s26, %s6670_s20 }
 0x24a   :  { %p6677_p12 = por %p6676_p11, %p6675_p10 }
 0x24c   :  { %p6678_p13 = pnand %p6677_p12, %p6671_p9 }
 0x24e   :  { %6681 = shalt.err (!%p6678_p13)
}
 0x24f   :  { %s8956_s3 = sld [smem:[#allocation173_spill]] }
 0x250   :  { %722 = dma.hbm_to_vmem [thread:$0]  %s8955_s18, 16, %s720_s0, [#allocation65]  }
 0x255   :  { %s6682_s13 = scalar_lea.hbm %s8956_s3, 16 }
 0x256   :  { %p6683_p0 = scmp.ne.s32.totalorder %s8956_s3, %s6682_s13  ;;  %p6686_p1 = scmp.lt.u32.totalorder %s6682_s13, %s8956_s3 }
 0x258   :  { %p6688_p2 = pnand %p6686_p1, %p6683_p0 }
 0x25a   :  { %6691 = shalt.err (!%p6688_p2)
}
 0x25b   :  { %s6692_s28 = scalar_lea.vmem %s744_s23, 16  ;;  %s6696_s1 = scalar_lea.vmem %s744_s23, 32 }
 0x25c   :  { %p6693_p3 = scmp.ne.s32.totalorder %s744_s23, %s6692_s28  ;;  %p6697_p4 = scmp.lt.s32.totalorder %s744_s23, %s744_s23 }
 0x25d   :  { %p6698_p5 = scmp.lt.s32.totalorder %s6696_s1, %s6692_s28 }
 0x25f   :  { %p6699_p6 = por %p6698_p5, %p6697_p4 }
 0x261   :  { %p6700_p7 = pnand %p6699_p6, %p6693_p3 }
 0x263   :  { %6703 = shalt.err (!%p6700_p7)
}
 0x264   :  { %s8957_s30 = sld [smem:[#allocation177_spill]]  ;;  %s7465_s6 = smov [#allocation70]  }
 0x265   :  { %746 = dma.hbm_to_vmem [thread:$0]  %s8956_s3, 16, %s744_s23, [#allocation68]  }
 0x266   :  { %s767_s2 = sshll.u32 %s7465_s6, 4  ;;  %s7466_s4 = smov [#allocation73]   ;;  %s768_s2 = int_to_ptr.vmem [resolvable:$true] %s767_s2 }
 0x267   :  { %s787_s7 = sshll.u32 %s7466_s4, 4  ;;  %s788_s7 = int_to_ptr.vmem [resolvable:$true] %s787_s7 }
 0x26a   :  { %s6704_s10 = scalar_lea.hbm %s8957_s30, 16 }
 0x26b   :  { %p6705_p8 = scmp.ne.s32.totalorder %s8957_s30, %s6704_s10  ;;  %p6708_p9 = scmp.lt.u32.totalorder %s6704_s10, %s8957_s30 }
 0x26d   :  { %p6710_p10 = pnand %p6708_p9, %p6705_p8 }
 0x26f   :  { %6713 = shalt.err (!%p6710_p10)
}
 0x270   :  { %s6714_s11 = scalar_lea.vmem %s768_s2, 16  ;;  %s6718_s15 = scalar_lea.vmem %s768_s2, 32 }
 0x271   :  { %p6715_p11 = scmp.ne.s32.totalorder %s768_s2, %s6714_s11  ;;  %p6719_p12 = scmp.lt.s32.totalorder %s768_s2, %s768_s2 }
 0x272   :  { %p6720_p13 = scmp.lt.s32.totalorder %s6718_s15, %s6714_s11 }
 0x274   :  { %p6721_p0 = por %p6720_p13, %p6719_p12 }
 0x276   :  { %p6722_p1 = pnand %p6721_p0, %p6715_p11 }
 0x278   :  { %6725 = shalt.err (!%p6722_p1)
}
 0x279   :  { %770 = dma.hbm_to_vmem [thread:$0]  %s8957_s30, 16, %s768_s2, [#allocation71]  }
 0x27a   :  { %s6726_s24 = scalar_lea.hbm %s7965_s8, 16 }
 0x27b   :  { %p6727_p2 = scmp.ne.s32.totalorder %s7965_s8, %s6726_s24  ;;  %p6730_p3 = scmp.lt.u32.totalorder %s6726_s24, %s7965_s8 }
 0x27d   :  { %p6732_p4 = pnand %p6730_p3, %p6727_p2 }
 0x27f   :  { %6735 = shalt.err (!%p6732_p4)
}
 0x280   :  { %s6736_s19 = scalar_lea.vmem %s788_s7, 16  ;;  %s6740_s14 = scalar_lea.vmem %s788_s7, 32 }
 0x281   :  { %p6737_p5 = scmp.ne.s32.totalorder %s788_s7, %s6736_s19  ;;  %p6741_p6 = scmp.lt.s32.totalorder %s788_s7, %s788_s7 }
 0x282   :  { %p6742_p7 = scmp.lt.s32.totalorder %s6740_s14, %s6736_s19 }
 0x284   :  { %p6743_p8 = por %p6742_p7, %p6741_p6 }
 0x286   :  { %p6744_p9 = pnand %p6743_p8, %p6737_p5 }
 0x288   :  { %6747 = shalt.err (!%p6744_p9)
}
 0x289   :  { %s8958_s21 = sld [smem:[#allocation120_spill]]  ;;  %s7467_s16 = smov [#allocation2]  }
 0x28a   :  { %790 = dma.hbm_to_vmem [thread:$0]  %s7965_s8, 16, %s788_s7, [#allocation74]  }
 0x28b   :  { %s265_s9 = sshll.u32 %s7467_s16, 4  ;;  %s7468_s25 = smov [#allocation6]   ;;  %s266_s9 = int_to_ptr.vmem [resolvable:$true] %s265_s9 }
 0x28c   :  { %s287_s18 = sshll.u32 %s7468_s25, 4  ;;  %s288_s18 = int_to_ptr.vmem [resolvable:$true] %s287_s18 }
 0x28f   :  { %s6748_s12 = scalar_lea.hbm %s8958_s21, 16 }
 0x290   :  { %p6749_p10 = scmp.ne.s32.totalorder %s8958_s21, %s6748_s12  ;;  %p6752_p11 = scmp.lt.u32.totalorder %s6748_s12, %s8958_s21 }
 0x292   :  { %p6754_p12 = pnand %p6752_p11, %p6749_p10 }
 0x294   :  { %6757 = shalt.err (!%p6754_p12)
}
 0x295   :  { %s6758_s0 = scalar_lea.vmem %s266_s9, 16  ;;  %s6762_s22 = scalar_lea.vmem %s266_s9, 32 }
 0x296   :  { %p6759_p13 = scmp.ne.s32.totalorder %s266_s9, %s6758_s0  ;;  %p6763_p0 = scmp.lt.s32.totalorder %s266_s9, %s266_s9 }
 0x297   :  { %p6764_p1 = scmp.lt.s32.totalorder %s6762_s22, %s6758_s0 }
 0x299   :  { %p6765_p2 = por %p6764_p1, %p6763_p0 }
 0x29b   :  { %p6766_p3 = pnand %p6765_p2, %p6759_p13 }
 0x29d   :  { %6769 = shalt.err (!%p6766_p3)
}
 0x29e   :  { %s8959_s8 = sld [smem:[#allocation122_spill]] }
 0x29f   :  { %268 = dma.hbm_to_vmem [thread:$0]  %s8958_s21, 16, %s266_s9, [#allocation3]  }
 0x2a4   :  { %s6770_s23 = scalar_lea.hbm %s8959_s8, 16 }
 0x2a5   :  { %p6771_p4 = scmp.ne.s32.totalorder %s8959_s8, %s6770_s23  ;;  %p6774_p5 = scmp.lt.u32.totalorder %s6770_s23, %s8959_s8 }
 0x2a7   :  { %p6776_p6 = pnand %p6774_p5, %p6771_p4 }
 0x2a9   :  { %6779 = shalt.err (!%p6776_p6)
}
 0x2aa   :  { %s6780_s5 = scalar_lea.vmem %s288_s18, 16  ;;  %s6784_s20 = scalar_lea.vmem %s288_s18, 32 }
 0x2ab   :  { %p6781_p7 = scmp.ne.s32.totalorder %s288_s18, %s6780_s5  ;;  %p6785_p8 = scmp.lt.s32.totalorder %s288_s18, %s288_s18 }
 0x2ac   :  { %p6786_p9 = scmp.lt.s32.totalorder %s6784_s20, %s6780_s5 }
 0x2ae   :  { %p6787_p10 = por %p6786_p9, %p6785_p8 }
 0x2b0   :  { %p6788_p11 = pnand %p6787_p10, %p6781_p7 }
 0x2b2   :  { %6791 = shalt.err (!%p6788_p11)
}
 0x2b3   :  { %s8960_s26 = sld [smem:[#allocation125_spill]]  ;;  %s7469_s3 = smov [#allocation9]  }
 0x2b4   :  { %290 = dma.hbm_to_vmem [thread:$0]  %s8959_s8, 16, %s288_s18, [#allocation5]  }
 0x2b5   :  { %s311_s13 = sshll.u32 %s7469_s3, 4  ;;  %s7470_s28 = smov [#allocation12]   ;;  %s312_s13 = int_to_ptr.vmem [resolvable:$true] %s311_s13 }
 0x2b6   :  { %s333_s1 = sshll.u32 %s7470_s28, 4  ;;  %s334_s1 = int_to_ptr.vmem [resolvable:$true] %s333_s1 }
 0x2b9   :  { %s6792_s30 = scalar_lea.hbm %s8960_s26, 16 }
 0x2ba   :  { %p6793_p12 = scmp.ne.s32.totalorder %s8960_s26, %s6792_s30  ;;  %p6796_p13 = scmp.lt.u32.totalorder %s6792_s30, %s8960_s26 }
 0x2bc   :  { %p6798_p0 = pnand %p6796_p13, %p6793_p12 }
 0x2be   :  { %6801 = shalt.err (!%p6798_p0)
}
 0x2bf   :  { %s6802_s6 = scalar_lea.vmem %s312_s13, 16  ;;  %s6806_s2 = scalar_lea.vmem %s312_s13, 32 }
 0x2c0   :  { %p6803_p1 = scmp.ne.s32.totalorder %s312_s13, %s6802_s6  ;;  %p6807_p2 = scmp.lt.s32.totalorder %s312_s13, %s312_s13 }
 0x2c1   :  { %p6808_p3 = scmp.lt.s32.totalorder %s6806_s2, %s6802_s6 }
 0x2c3   :  { %p6809_p4 = por %p6808_p3, %p6807_p2 }
 0x2c5   :  { %p6810_p5 = pnand %p6809_p4, %p6803_p1 }
 0x2c7   :  { %6813 = shalt.err (!%p6810_p5)
}
 0x2c8   :  { %s8961_s4 = sld [smem:[#allocation127_spill]] }
 0x2c9   :  { %314 = dma.hbm_to_vmem [thread:$0]  %s8960_s26, 16, %s312_s13, [#allocation8]  }
 0x2ce   :  { %s6814_s7 = scalar_lea.hbm %s8961_s4, 16 }
 0x2cf   :  { %p6815_p6 = scmp.ne.s32.totalorder %s8961_s4, %s6814_s7  ;;  %p6818_p7 = scmp.lt.u32.totalorder %s6814_s7, %s8961_s4 }
 0x2d1   :  { %p6820_p8 = pnand %p6818_p7, %p6815_p6 }
 0x2d3   :  { %6823 = shalt.err (!%p6820_p8)
}
 0x2d4   :  { %s6824_s10 = scalar_lea.vmem %s334_s1, 16  ;;  %s6828_s11 = scalar_lea.vmem %s334_s1, 32 }
 0x2d5   :  { %p6825_p9 = scmp.ne.s32.totalorder %s334_s1, %s6824_s10  ;;  %p6829_p10 = scmp.lt.s32.totalorder %s334_s1, %s334_s1 }
 0x2d6   :  { %p6830_p11 = scmp.lt.s32.totalorder %s6828_s11, %s6824_s10 }
 0x2d8   :  { %p6831_p12 = por %p6830_p11, %p6829_p10 }
 0x2da   :  { %p6832_p13 = pnand %p6831_p12, %p6825_p9 }
 0x2dc   :  { %6835 = shalt.err (!%p6832_p13)
}
 0x2dd   :  { %s8962_s15 = sld [smem:[#allocation128_spill]]  ;;  %s7471_s24 = smov [#allocation15]  }
 0x2de   :  { %336 = dma.hbm_to_vmem [thread:$0]  %s8961_s4, 16, %s334_s1, [#allocation11]  }
 0x2df   :  { %s353_s19 = sshll.u32 %s7471_s24, 4  ;;  %s7472_s14 = smov [#allocation18]   ;;  %s354_s19 = int_to_ptr.vmem [resolvable:$true] %s353_s19 }
 0x2e0   :  { %s377_s21 = sshll.u32 %s7472_s14, 4  ;;  %s378_s21 = int_to_ptr.vmem [resolvable:$true] %s377_s21 }
 0x2e3   :  { %s6836_s16 = scalar_lea.hbm %s8962_s15, 16 }
 0x2e4   :  { %p6837_p0 = scmp.ne.s32.totalorder %s8962_s15, %s6836_s16  ;;  %p6840_p1 = scmp.lt.u32.totalorder %s6836_s16, %s8962_s15 }
 0x2e6   :  { %p6842_p2 = pnand %p6840_p1, %p6837_p0 }
 0x2e8   :  { %6845 = shalt.err (!%p6842_p2)
}
 0x2e9   :  { %s6846_s9 = scalar_lea.vmem %s354_s19, 16  ;;  %s6850_s25 = scalar_lea.vmem %s354_s19, 32 }
 0x2ea   :  { %p6847_p3 = scmp.ne.s32.totalorder %s354_s19, %s6846_s9  ;;  %p6851_p4 = scmp.lt.s32.totalorder %s354_s19, %s354_s19 }
 0x2eb   :  { %p6852_p5 = scmp.lt.s32.totalorder %s6850_s25, %s6846_s9 }
 0x2ed   :  { %p6853_p6 = por %p6852_p5, %p6851_p4 }
 0x2ef   :  { %p6854_p7 = pnand %p6853_p6, %p6847_p3 }
 0x2f1   :  { %6857 = shalt.err (!%p6854_p7)
}
 0x2f2   :  { %s8963_s18 = sld [smem:[#allocation131_spill]] }
 0x2f3   :  { %356 = dma.hbm_to_vmem [thread:$0]  %s8962_s15, 16, %s354_s19, [#allocation14]  }
 0x2f8   :  { %s6858_s12 = scalar_lea.hbm %s8963_s18, 16 }
 0x2f9   :  { %p6859_p8 = scmp.ne.s32.totalorder %s8963_s18, %s6858_s12  ;;  %p6862_p9 = scmp.lt.u32.totalorder %s6858_s12, %s8963_s18 }
 0x2fb   :  { %p6864_p10 = pnand %p6862_p9, %p6859_p8 }
 0x2fd   :  { %6867 = shalt.err (!%p6864_p10)
}
 0x2fe   :  { %s6868_s0 = scalar_lea.vmem %s378_s21, 16  ;;  %s6872_s22 = scalar_lea.vmem %s378_s21, 32 }
 0x2ff   :  { %p6869_p11 = scmp.ne.s32.totalorder %s378_s21, %s6868_s0  ;;  %p6873_p12 = scmp.lt.s32.totalorder %s378_s21, %s378_s21 }
 0x300   :  { %p6874_p13 = scmp.lt.s32.totalorder %s6872_s22, %s6868_s0 }
 0x302   :  { %p6875_p0 = por %p6874_p13, %p6873_p12 }
 0x304   :  { %p6876_p1 = pnand %p6875_p0, %p6869_p11 }
 0x306   :  { %6879 = shalt.err (!%p6876_p1)
}
 0x307   :  { %s8964_s8 = sld [smem:[#allocation134_spill]]  ;;  %s7473_s23 = smov [#allocation21]  }
 0x308   :  { %380 = dma.hbm_to_vmem [thread:$0]  %s8963_s18, 16, %s378_s21, [#allocation17]  }
 0x309   :  { %s401_s5 = sshll.u32 %s7473_s23, 4  ;;  %s7474_s20 = smov [#allocation24]   ;;  %s402_s5 = int_to_ptr.vmem [resolvable:$true] %s401_s5 }
 0x30a   :  { %s421_s26 = sshll.u32 %s7474_s20, 4  ;;  %s422_s26 = int_to_ptr.vmem [resolvable:$true] %s421_s26 }
 0x30d   :  { %s6880_s3 = scalar_lea.hbm %s8964_s8, 16 }
 0x30e   :  { %p6881_p2 = scmp.ne.s32.totalorder %s8964_s8, %s6880_s3  ;;  %p6884_p3 = scmp.lt.u32.totalorder %s6880_s3, %s8964_s8 }
 0x310   :  { %p6886_p4 = pnand %p6884_p3, %p6881_p2 }
 0x312   :  { %6889 = shalt.err (!%p6886_p4)
}
 0x313   :  { %s6890_s13 = scalar_lea.vmem %s402_s5, 16  ;;  %s6894_s28 = scalar_lea.vmem %s402_s5, 32 }
 0x314   :  { %p6891_p5 = scmp.ne.s32.totalorder %s402_s5, %s6890_s13  ;;  %p6895_p6 = scmp.lt.s32.totalorder %s402_s5, %s402_s5 }
 0x315   :  { %p6896_p7 = scmp.lt.s32.totalorder %s6894_s28, %s6890_s13 }
 0x317   :  { %p6897_p8 = por %p6896_p7, %p6895_p6 }
 0x319   :  { %p6898_p9 = pnand %p6897_p8, %p6891_p5 }
 0x31b   :  { %6901 = shalt.err (!%p6898_p9)
}
 0x31c   :  { %s8965_s1 = sld [smem:[#allocation135_spill]] }
 0x31d   :  { %404 = dma.hbm_to_vmem [thread:$0]  %s8964_s8, 16, %s402_s5, [#allocation20]  }
 0x322   :  { %s6902_s30 = scalar_lea.hbm %s8965_s1, 16 }
 0x323   :  { %p6903_p10 = scmp.ne.s32.totalorder %s8965_s1, %s6902_s30  ;;  %p6906_p11 = scmp.lt.u32.totalorder %s6902_s30, %s8965_s1 }
 0x325   :  { %p6908_p12 = pnand %p6906_p11, %p6903_p10 }
 0x327   :  { %6911 = shalt.err (!%p6908_p12)
}
 0x328   :  { %s6912_s6 = scalar_lea.vmem %s422_s26, 16  ;;  %s6916_s2 = scalar_lea.vmem %s422_s26, 32 }
 0x329   :  { %p6913_p13 = scmp.ne.s32.totalorder %s422_s26, %s6912_s6  ;;  %p6917_p0 = scmp.lt.s32.totalorder %s422_s26, %s422_s26 }
 0x32a   :  { %p6918_p1 = scmp.lt.s32.totalorder %s6916_s2, %s6912_s6 }
 0x32c   :  { %p6919_p2 = por %p6918_p1, %p6917_p0 }
 0x32e   :  { %p6920_p3 = pnand %p6919_p2, %p6913_p13 }
 0x330   :  { %6923 = shalt.err (!%p6920_p3)
}
 0x331   :  { %s8966_s4 = sld [smem:[#allocation137_spill]]  ;;  %s7475_s7 = smov [#allocation27]  }
 0x332   :  { %424 = dma.hbm_to_vmem [thread:$0]  %s8965_s1, 16, %s422_s26, [#allocation23]  }
 0x333   :  { %s443_s10 = sshll.u32 %s7475_s7, 4  ;;  %s7476_s11 = smov [#allocation30]   ;;  %s444_s10 = int_to_ptr.vmem [resolvable:$true] %s443_s10 }
 0x334   :  { %s467_s15 = sshll.u32 %s7476_s11, 4  ;;  %s468_s15 = int_to_ptr.vmem [resolvable:$true] %s467_s15 }
 0x337   :  { %s6924_s24 = scalar_lea.hbm %s8966_s4, 16 }
 0x338   :  { %p6925_p4 = scmp.ne.s32.totalorder %s8966_s4, %s6924_s24  ;;  %p6928_p5 = scmp.lt.u32.totalorder %s6924_s24, %s8966_s4 }
 0x33a   :  { %p6930_p6 = pnand %p6928_p5, %p6925_p4 }
 0x33c   :  { %6933 = shalt.err (!%p6930_p6)
}
 0x33d   :  { %s6934_s19 = scalar_lea.vmem %s444_s10, 16  ;;  %s6938_s14 = scalar_lea.vmem %s444_s10, 32 }
 0x33e   :  { %p6935_p7 = scmp.ne.s32.totalorder %s444_s10, %s6934_s19  ;;  %p6939_p8 = scmp.lt.s32.totalorder %s444_s10, %s444_s10 }
 0x33f   :  { %p6940_p9 = scmp.lt.s32.totalorder %s6938_s14, %s6934_s19 }
 0x341   :  { %p6941_p10 = por %p6940_p9, %p6939_p8 }
 0x343   :  { %p6942_p11 = pnand %p6941_p10, %p6935_p7 }
 0x345   :  { %6945 = shalt.err (!%p6942_p11)
}
 0x346   :  { %s8967_s21 = sld [smem:[#allocation140_spill]] }
 0x347   :  { %446 = dma.hbm_to_vmem [thread:$0]  %s8966_s4, 16, %s444_s10, [#allocation26]  }
 0x34c   :  { %s6946_s16 = scalar_lea.hbm %s8967_s21, 16 }
 0x34d   :  { %p6947_p12 = scmp.ne.s32.totalorder %s8967_s21, %s6946_s16  ;;  %p6950_p13 = scmp.lt.u32.totalorder %s6946_s16, %s8967_s21 }
 0x34f   :  { %p6952_p0 = pnand %p6950_p13, %p6947_p12 }
 0x351   :  { %6955 = shalt.err (!%p6952_p0)
}
 0x352   :  { %s6956_s9 = scalar_lea.vmem %s468_s15, 16  ;;  %s6960_s25 = scalar_lea.vmem %s468_s15, 32 }
 0x353   :  { %p6957_p1 = scmp.ne.s32.totalorder %s468_s15, %s6956_s9  ;;  %p6961_p2 = scmp.lt.s32.totalorder %s468_s15, %s468_s15 }
 0x354   :  { %p6962_p3 = scmp.lt.s32.totalorder %s6960_s25, %s6956_s9 }
 0x356   :  { %p6963_p4 = por %p6962_p3, %p6961_p2 }
 0x358   :  { %p6964_p5 = pnand %p6963_p4, %p6957_p1 }
 0x35a   :  { %6967 = shalt.err (!%p6964_p5)
}
 0x35b   :  { %s8968_s18 = sld [smem:[#allocation141_spill]]  ;;  %s7477_s12 = smov [#allocation33]  }
 0x35c   :  { %470 = dma.hbm_to_vmem [thread:$0]  %s8967_s21, 16, %s468_s15, [#allocation29]  }
 0x35d   :  { %s487_s0 = sshll.u32 %s7477_s12, 4  ;;  %s7478_s22 = smov [#allocation36]   ;;  %s488_s0 = int_to_ptr.vmem [resolvable:$true] %s487_s0 }
 0x35e   :  { %s509_s8 = sshll.u32 %s7478_s22, 4  ;;  %s510_s8 = int_to_ptr.vmem [resolvable:$true] %s509_s8 }
 0x361   :  { %s6968_s23 = scalar_lea.hbm %s8968_s18, 16 }
 0x362   :  { %p6969_p6 = scmp.ne.s32.totalorder %s8968_s18, %s6968_s23  ;;  %p6972_p7 = scmp.lt.u32.totalorder %s6968_s23, %s8968_s18 }
 0x364   :  { %p6974_p8 = pnand %p6972_p7, %p6969_p6 }
 0x366   :  { %6977 = shalt.err (!%p6974_p8)
}
 0x367   :  { %s6978_s5 = scalar_lea.vmem %s488_s0, 16  ;;  %s6982_s20 = scalar_lea.vmem %s488_s0, 32 }
 0x368   :  { %p6979_p9 = scmp.ne.s32.totalorder %s488_s0, %s6978_s5  ;;  %p6983_p10 = scmp.lt.s32.totalorder %s488_s0, %s488_s0 }
 0x369   :  { %p6984_p11 = scmp.lt.s32.totalorder %s6982_s20, %s6978_s5 }
 0x36b   :  { %p6985_p12 = por %p6984_p11, %p6983_p10 }
 0x36d   :  { %p6986_p13 = pnand %p6985_p12, %p6979_p9 }
 0x36f   :  { %6989 = shalt.err (!%p6986_p13)
}
 0x370   :  { %s8969_s26 = sld [smem:[#allocation143_spill]] }
 0x371   :  { %490 = dma.hbm_to_vmem [thread:$0]  %s8968_s18, 16, %s488_s0, [#allocation32]  }
 0x376   :  { %s6990_s3 = scalar_lea.hbm %s8969_s26, 16 }
 0x377   :  { %p6991_p0 = scmp.ne.s32.totalorder %s8969_s26, %s6990_s3  ;;  %p6994_p1 = scmp.lt.u32.totalorder %s6990_s3, %s8969_s26 }
 0x379   :  { %p6996_p2 = pnand %p6994_p1, %p6991_p0 }
 0x37b   :  { %6999 = shalt.err (!%p6996_p2)
}
 0x37c   :  { %s7000_s13 = scalar_lea.vmem %s510_s8, 16  ;;  %s7004_s28 = scalar_lea.vmem %s510_s8, 32 }
 0x37d   :  { %p7001_p3 = scmp.ne.s32.totalorder %s510_s8, %s7000_s13  ;;  %p7005_p4 = scmp.lt.s32.totalorder %s510_s8, %s510_s8 }
 0x37e   :  { %p7006_p5 = scmp.lt.s32.totalorder %s7004_s28, %s7000_s13 }
 0x380   :  { %p7007_p6 = por %p7006_p5, %p7005_p4 }
 0x382   :  { %p7008_p7 = pnand %p7007_p6, %p7001_p3 }
 0x384   :  { %7011 = shalt.err (!%p7008_p7)
}
 0x385   :  { %s8970_s1 = sld [smem:[#allocation144_spill]]  ;;  %s7479_s30 = smov [#allocation39]  }
 0x386   :  { %512 = dma.hbm_to_vmem [thread:$0]  %s8969_s26, 16, %s510_s8, [#allocation35]  }
 0x387   :  { %s529_s6 = sshll.u32 %s7479_s30, 4  ;;  %s7480_s2 = smov [#allocation42]   ;;  %s530_s6 = int_to_ptr.vmem [resolvable:$true] %s529_s6 }
 0x388   :  { %s553_s4 = sshll.u32 %s7480_s2, 4  ;;  %s554_s4 = int_to_ptr.vmem [resolvable:$true] %s553_s4 }
 0x38b   :  { %s7012_s7 = scalar_lea.hbm %s8970_s1, 16 }
 0x38c   :  { %p7013_p8 = scmp.ne.s32.totalorder %s8970_s1, %s7012_s7  ;;  %p7016_p9 = scmp.lt.u32.totalorder %s7012_s7, %s8970_s1 }
 0x38e   :  { %p7018_p10 = pnand %p7016_p9, %p7013_p8 }
 0x390   :  { %7021 = shalt.err (!%p7018_p10)
}
 0x391   :  { %s7022_s10 = scalar_lea.vmem %s530_s6, 16  ;;  %s7026_s11 = scalar_lea.vmem %s530_s6, 32 }
 0x392   :  { %p7023_p11 = scmp.ne.s32.totalorder %s530_s6, %s7022_s10  ;;  %p7027_p12 = scmp.lt.s32.totalorder %s530_s6, %s530_s6 }
 0x393   :  { %p7028_p13 = scmp.lt.s32.totalorder %s7026_s11, %s7022_s10 }
 0x395   :  { %p7029_p0 = por %p7028_p13, %p7027_p12 }
 0x397   :  { %p7030_p1 = pnand %p7029_p0, %p7023_p11 }
 0x399   :  { %7033 = shalt.err (!%p7030_p1)
}
 0x39a   :  { %s8971_s15 = sld [smem:[#allocation147_spill]] }
 0x39b   :  { %532 = dma.hbm_to_vmem [thread:$0]  %s8970_s1, 16, %s530_s6, [#allocation38]  }
 0x3a0   :  { %s7034_s24 = scalar_lea.hbm %s8971_s15, 16 }
 0x3a1   :  { %p7035_p2 = scmp.ne.s32.totalorder %s8971_s15, %s7034_s24  ;;  %p7038_p3 = scmp.lt.u32.totalorder %s7034_s24, %s8971_s15 }
 0x3a3   :  { %p7040_p4 = pnand %p7038_p3, %p7035_p2 }
 0x3a5   :  { %7043 = shalt.err (!%p7040_p4)
}
 0x3a6   :  { %s7044_s19 = scalar_lea.vmem %s554_s4, 16  ;;  %s7048_s14 = scalar_lea.vmem %s554_s4, 32 }
 0x3a7   :  { %p7045_p5 = scmp.ne.s32.totalorder %s554_s4, %s7044_s19  ;;  %p7049_p6 = scmp.lt.s32.totalorder %s554_s4, %s554_s4 }
 0x3a8   :  { %p7050_p7 = scmp.lt.s32.totalorder %s7048_s14, %s7044_s19 }
 0x3aa   :  { %p7051_p8 = por %p7050_p7, %p7049_p6 }
 0x3ac   :  { %p7052_p9 = pnand %p7051_p8, %p7045_p5 }
 0x3ae   :  { %7055 = shalt.err (!%p7052_p9)
}
 0x3af   :  { %s8972_s21 = sld [smem:[#allocation149_spill]]  ;;  %s7481_s16 = smov [#allocation45]  }
 0x3b0   :  { %556 = dma.hbm_to_vmem [thread:$0]  %s8971_s15, 16, %s554_s4, [#allocation41]  }
 0x3b1   :  { %s575_s9 = sshll.u32 %s7481_s16, 4  ;;  %s7482_s25 = smov [#allocation48]   ;;  %s576_s9 = int_to_ptr.vmem [resolvable:$true] %s575_s9 }
 0x3b2   :  { %s597_s18 = sshll.u32 %s7482_s25, 4  ;;  %s598_s18 = int_to_ptr.vmem [resolvable:$true] %s597_s18 }
 0x3b5   :  { %s7056_s12 = scalar_lea.hbm %s8972_s21, 16 }
 0x3b6   :  { %p7057_p10 = scmp.ne.s32.totalorder %s8972_s21, %s7056_s12  ;;  %p7060_p11 = scmp.lt.u32.totalorder %s7056_s12, %s8972_s21 }
 0x3b8   :  { %p7062_p12 = pnand %p7060_p11, %p7057_p10 }
 0x3ba   :  { %7065 = shalt.err (!%p7062_p12)
}
 0x3bb   :  { %s7066_s0 = scalar_lea.vmem %s576_s9, 16  ;;  %s7070_s22 = scalar_lea.vmem %s576_s9, 32 }
 0x3bc   :  { %p7067_p13 = scmp.ne.s32.totalorder %s576_s9, %s7066_s0  ;;  %p7071_p0 = scmp.lt.s32.totalorder %s576_s9, %s576_s9 }
 0x3bd   :  { %p7072_p1 = scmp.lt.s32.totalorder %s7070_s22, %s7066_s0 }
 0x3bf   :  { %p7073_p2 = por %p7072_p1, %p7071_p0 }
 0x3c1   :  { %p7074_p3 = pnand %p7073_p2, %p7067_p13 }
 0x3c3   :  { %7077 = shalt.err (!%p7074_p3)
}
 0x3c4   :  { %s8973_s8 = sld [smem:[#allocation152_spill]] }
 0x3c5   :  { %578 = dma.hbm_to_vmem [thread:$0]  %s8972_s21, 16, %s576_s9, [#allocation44]  }
 0x3ca   :  { %s7078_s23 = scalar_lea.hbm %s8973_s8, 16 }
 0x3cb   :  { %p7079_p4 = scmp.ne.s32.totalorder %s8973_s8, %s7078_s23  ;;  %p7082_p5 = scmp.lt.u32.totalorder %s7078_s23, %s8973_s8 }
 0x3cd   :  { %p7084_p6 = pnand %p7082_p5, %p7079_p4 }
 0x3cf   :  { %7087 = shalt.err (!%p7084_p6)
}
 0x3d0   :  { %s7088_s5 = scalar_lea.vmem %s598_s18, 16  ;;  %s7092_s20 = scalar_lea.vmem %s598_s18, 32 }
 0x3d1   :  { %p7089_p7 = scmp.ne.s32.totalorder %s598_s18, %s7088_s5  ;;  %p7093_p8 = scmp.lt.s32.totalorder %s598_s18, %s598_s18 }
 0x3d2   :  { %p7094_p9 = scmp.lt.s32.totalorder %s7092_s20, %s7088_s5 }
 0x3d4   :  { %p7095_p10 = por %p7094_p9, %p7093_p8 }
 0x3d6   :  { %p7096_p11 = pnand %p7095_p10, %p7089_p7 }
 0x3d8   :  { %7099 = shalt.err (!%p7096_p11)
}
 0x3d9   :  { %s8974_s26 = sld [smem:[#allocation156_spill]]  ;;  %s7483_s3 = smov [#allocation51]  }
 0x3da   :  { %600 = dma.hbm_to_vmem [thread:$0]  %s8973_s8, 16, %s598_s18, [#allocation47]  }
 0x3db   :  { %s621_s13 = sshll.u32 %s7483_s3, 4  ;;  %s7484_s28 = smov [#allocation54]   ;;  %s622_s13 = int_to_ptr.vmem [resolvable:$true] %s621_s13 }
 0x3dc   :  { %s645_s1 = sshll.u32 %s7484_s28, 4  ;;  %s646_s1 = int_to_ptr.vmem [resolvable:$true] %s645_s1 }
 0x3df   :  { %s7100_s30 = scalar_lea.hbm %s8974_s26, 16 }
 0x3e0   :  { %p7101_p12 = scmp.ne.s32.totalorder %s8974_s26, %s7100_s30  ;;  %p7104_p13 = scmp.lt.u32.totalorder %s7100_s30, %s8974_s26 }
 0x3e2   :  { %p7106_p0 = pnand %p7104_p13, %p7101_p12 }
 0x3e4   :  { %7109 = shalt.err (!%p7106_p0)
}
 0x3e5   :  { %s7110_s6 = scalar_lea.vmem %s622_s13, 16  ;;  %s7114_s2 = scalar_lea.vmem %s622_s13, 32 }
 0x3e6   :  { %p7111_p1 = scmp.ne.s32.totalorder %s622_s13, %s7110_s6  ;;  %p7115_p2 = scmp.lt.s32.totalorder %s622_s13, %s622_s13 }
 0x3e7   :  { %p7116_p3 = scmp.lt.s32.totalorder %s7114_s2, %s7110_s6 }
 0x3e9   :  { %p7117_p4 = por %p7116_p3, %p7115_p2 }
 0x3eb   :  { %p7118_p5 = pnand %p7117_p4, %p7111_p1 }
 0x3ed   :  { %7121 = shalt.err (!%p7118_p5)
}
 0x3ee   :  { %s8975_s4 = sld [smem:[#allocation160_spill]] }
 0x3ef   :  { %624 = dma.hbm_to_vmem [thread:$0]  %s8974_s26, 16, %s622_s13, [#allocation50]  }
 0x3f4   :  { %s7122_s7 = scalar_lea.hbm %s8975_s4, 16 }
 0x3f5   :  { %p7123_p6 = scmp.ne.s32.totalorder %s8975_s4, %s7122_s7  ;;  %p7126_p7 = scmp.lt.u32.totalorder %s7122_s7, %s8975_s4 }
 0x3f7   :  { %p7128_p8 = pnand %p7126_p7, %p7123_p6 }
 0x3f9   :  { %7131 = shalt.err (!%p7128_p8)
}
 0x3fa   :  { %s7132_s10 = scalar_lea.vmem %s646_s1, 16  ;;  %s7136_s11 = scalar_lea.vmem %s646_s1, 32 }
 0x3fb   :  { %p7133_p9 = scmp.ne.s32.totalorder %s646_s1, %s7132_s10  ;;  %p7137_p10 = scmp.lt.s32.totalorder %s646_s1, %s646_s1 }
 0x3fc   :  { %p7138_p11 = scmp.lt.s32.totalorder %s7136_s11, %s7132_s10 }
 0x3fe   :  { %p7139_p12 = por %p7138_p11, %p7137_p10 }
 0x400   :  { %p7140_p13 = pnand %p7139_p12, %p7133_p9 }
 0x402   :  { %7143 = shalt.err (!%p7140_p13)
}
 0x403   :  { %s8976_s15 = sld [smem:[#allocation162_spill]]  ;;  %s7485_s24 = smov [#allocation57]  }
 0x404   :  { %648 = dma.hbm_to_vmem [thread:$0]  %s8975_s4, 16, %s646_s1, [#allocation53]  }
 0x405   :  { %s665_s19 = sshll.u32 %s7485_s24, 4  ;;  %s7486_s14 = smov [#allocation60]   ;;  %s666_s19 = int_to_ptr.vmem [resolvable:$true] %s665_s19 }
 0x406   :  { %s687_s21 = sshll.u32 %s7486_s14, 4  ;;  %s688_s21 = int_to_ptr.vmem [resolvable:$true] %s687_s21 }
 0x409   :  { %s7144_s16 = scalar_lea.hbm %s8976_s15, 16 }
 0x40a   :  { %p7145_p0 = scmp.ne.s32.totalorder %s8976_s15, %s7144_s16  ;;  %p7148_p1 = scmp.lt.u32.totalorder %s7144_s16, %s8976_s15 }
 0x40c   :  { %p7150_p2 = pnand %p7148_p1, %p7145_p0 }
 0x40e   :  { %7153 = shalt.err (!%p7150_p2)
}
 0x40f   :  { %s7154_s9 = scalar_lea.vmem %s666_s19, 16  ;;  %s7158_s25 = scalar_lea.vmem %s666_s19, 32 }
 0x410   :  { %p7155_p3 = scmp.ne.s32.totalorder %s666_s19, %s7154_s9  ;;  %p7159_p4 = scmp.lt.s32.totalorder %s666_s19, %s666_s19 }
 0x411   :  { %p7160_p5 = scmp.lt.s32.totalorder %s7158_s25, %s7154_s9 }
 0x413   :  { %p7161_p6 = por %p7160_p5, %p7159_p4 }
 0x415   :  { %p7162_p7 = pnand %p7161_p6, %p7155_p3 }
 0x417   :  { %7165 = shalt.err (!%p7162_p7)
}
 0x418   :  { %s8977_s18 = sld [smem:[#allocation165_spill]] }
 0x419   :  { %668 = dma.hbm_to_vmem [thread:$0]  %s8976_s15, 16, %s666_s19, [#allocation56]  }
 0x41e   :  { %s7166_s12 = scalar_lea.hbm %s8977_s18, 16 }
 0x41f   :  { %p7167_p8 = scmp.ne.s32.totalorder %s8977_s18, %s7166_s12  ;;  %p7170_p9 = scmp.lt.u32.totalorder %s7166_s12, %s8977_s18 }
 0x421   :  { %p7172_p10 = pnand %p7170_p9, %p7167_p8 }
 0x423   :  { %7175 = shalt.err (!%p7172_p10)
}
 0x424   :  { %s7176_s0 = scalar_lea.vmem %s688_s21, 16  ;;  %s7180_s22 = scalar_lea.vmem %s688_s21, 32 }
 0x425   :  { %p7177_p11 = scmp.ne.s32.totalorder %s688_s21, %s7176_s0  ;;  %p7181_p12 = scmp.lt.s32.totalorder %s688_s21, %s688_s21 }
 0x426   :  { %p7182_p13 = scmp.lt.s32.totalorder %s7180_s22, %s7176_s0 }
 0x428   :  { %p7183_p0 = por %p7182_p13, %p7181_p12 }
 0x42a   :  { %p7184_p1 = pnand %p7183_p0, %p7177_p11 }
 0x42c   :  { %7187 = shalt.err (!%p7184_p1)
}
 0x42d   :  { %s8978_s8 = sld [smem:[#allocation167_spill]]  ;;  %s7487_s23 = smov [#allocation63]  }
 0x42e   :  { %690 = dma.hbm_to_vmem [thread:$0]  %s8977_s18, 16, %s688_s21, [#allocation59]  }
 0x42f   :  { %s707_s5 = sshll.u32 %s7487_s23, 4  ;;  %s7488_s20 = smov [#allocation66]   ;;  %s708_s5 = int_to_ptr.vmem [resolvable:$true] %s707_s5 }
 0x430   :  { %s731_s26 = sshll.u32 %s7488_s20, 4  ;;  %s732_s26 = int_to_ptr.vmem [resolvable:$true] %s731_s26 }
 0x433   :  { %s7188_s3 = scalar_lea.hbm %s8978_s8, 16 }
 0x434   :  { %p7189_p2 = scmp.ne.s32.totalorder %s8978_s8, %s7188_s3  ;;  %p7192_p3 = scmp.lt.u32.totalorder %s7188_s3, %s8978_s8 }
 0x436   :  { %p7194_p4 = pnand %p7192_p3, %p7189_p2 }
 0x438   :  { %7197 = shalt.err (!%p7194_p4)
}
 0x439   :  { %s7198_s13 = scalar_lea.vmem %s708_s5, 16  ;;  %s7202_s28 = scalar_lea.vmem %s708_s5, 32 }
 0x43a   :  { %p7199_p5 = scmp.ne.s32.totalorder %s708_s5, %s7198_s13  ;;  %p7203_p6 = scmp.lt.s32.totalorder %s708_s5, %s708_s5 }
 0x43b   :  { %p7204_p7 = scmp.lt.s32.totalorder %s7202_s28, %s7198_s13 }
 0x43d   :  { %p7205_p8 = por %p7204_p7, %p7203_p6 }
 0x43f   :  { %p7206_p9 = pnand %p7205_p8, %p7199_p5 }
 0x441   :  { %7209 = shalt.err (!%p7206_p9)
}
 0x442   :  { %s8979_s1 = sld [smem:[#allocation171_spill]] }
 0x443   :  { %710 = dma.hbm_to_vmem [thread:$0]  %s8978_s8, 16, %s708_s5, [#allocation62]  }
 0x448   :  { %s7210_s30 = scalar_lea.hbm %s8979_s1, 16 }
 0x449   :  { %p7211_p10 = scmp.ne.s32.totalorder %s8979_s1, %s7210_s30  ;;  %p7214_p11 = scmp.lt.u32.totalorder %s7210_s30, %s8979_s1 }
 0x44b   :  { %p7216_p12 = pnand %p7214_p11, %p7211_p10 }
 0x44d   :  { %7219 = shalt.err (!%p7216_p12)
}
 0x44e   :  { %s7220_s6 = scalar_lea.vmem %s732_s26, 16  ;;  %s7224_s2 = scalar_lea.vmem %s732_s26, 32 }
 0x44f   :  { %p7221_p13 = scmp.ne.s32.totalorder %s732_s26, %s7220_s6  ;;  %p7225_p0 = scmp.lt.s32.totalorder %s732_s26, %s732_s26 }
 0x450   :  { %p7226_p1 = scmp.lt.s32.totalorder %s7224_s2, %s7220_s6 }
 0x452   :  { %p7227_p2 = por %p7226_p1, %p7225_p0 }
 0x454   :  { %p7228_p3 = pnand %p7227_p2, %p7221_p13 }
 0x456   :  { %7231 = shalt.err (!%p7228_p3)
}
 0x457   :  { %s8980_s4 = sld [smem:[#allocation175_spill]]  ;;  %s7489_s7 = smov [#allocation69]  }
 0x458   :  { %734 = dma.hbm_to_vmem [thread:$0]  %s8979_s1, 16, %s732_s26, [#allocation65]  }
 0x459   :  { %s755_s10 = sshll.u32 %s7489_s7, 4  ;;  %s7490_s11 = smov [#allocation72]   ;;  %s756_s10 = int_to_ptr.vmem [resolvable:$true] %s755_s10 }
 0x45a   :  { %s777_s15 = sshll.u32 %s7490_s11, 4  ;;  %s778_s15 = int_to_ptr.vmem [resolvable:$true] %s777_s15 }
 0x45d   :  { %s7232_s24 = scalar_lea.hbm %s8980_s4, 16 }
 0x45e   :  { %p7233_p4 = scmp.ne.s32.totalorder %s8980_s4, %s7232_s24  ;;  %p7236_p5 = scmp.lt.u32.totalorder %s7232_s24, %s8980_s4 }
 0x460   :  { %p7238_p6 = pnand %p7236_p5, %p7233_p4 }
 0x462   :  { %7241 = shalt.err (!%p7238_p6)
}
 0x463   :  { %s7242_s19 = scalar_lea.vmem %s756_s10, 16  ;;  %s7246_s14 = scalar_lea.vmem %s756_s10, 32 }
 0x464   :  { %p7243_p7 = scmp.ne.s32.totalorder %s756_s10, %s7242_s19  ;;  %p7247_p8 = scmp.lt.s32.totalorder %s756_s10, %s756_s10 }
 0x465   :  { %p7248_p9 = scmp.lt.s32.totalorder %s7246_s14, %s7242_s19 }
 0x467   :  { %p7249_p10 = por %p7248_p9, %p7247_p8 }
 0x469   :  { %p7250_p11 = pnand %p7249_p10, %p7243_p7 }
 0x46b   :  { %7253 = shalt.err (!%p7250_p11)
}
 0x46c   :  { %s8981_s21 = sld [smem:[#allocation178_spill]] }
 0x46d   :  { %758 = dma.hbm_to_vmem [thread:$0]  %s8980_s4, 16, %s756_s10, [#allocation68]  }
 0x472   :  { %s7254_s16 = scalar_lea.hbm %s8981_s21, 16 }
 0x473   :  { %p7255_p12 = scmp.ne.s32.totalorder %s8981_s21, %s7254_s16  ;;  %p7258_p13 = scmp.lt.u32.totalorder %s7254_s16, %s8981_s21 }
 0x475   :  { %p7260_p0 = pnand %p7258_p13, %p7255_p12 }
 0x477   :  { %7263 = shalt.err (!%p7260_p0)
}
 0x478   :  { %s7264_s9 = scalar_lea.vmem %s778_s15, 16  ;;  %s7268_s25 = scalar_lea.vmem %s778_s15, 32 }
 0x479   :  { %p7265_p1 = scmp.ne.s32.totalorder %s778_s15, %s7264_s9  ;;  %p7269_p2 = scmp.lt.s32.totalorder %s778_s15, %s778_s15 }
 0x47a   :  { %p7270_p3 = scmp.lt.s32.totalorder %s7268_s25, %s7264_s9 }
 0x47c   :  { %p7271_p4 = por %p7270_p3, %p7269_p2 }
 0x47e   :  { %p7272_p5 = pnand %p7271_p4, %p7265_p1 }
 0x480   :  { %7275 = shalt.err (!%p7272_p5)
}
 0x481   :  { %780 = dma.hbm_to_vmem [thread:$0]  %s8981_s21, 16, %s778_s15, [#allocation71]  }
 0x482   :  { %s7491_s18 = smov [#allocation75]   ;;  %s7276_s0 = scalar_lea.hbm %s7970_s17, 16 }
 0x483   :  { %s797_s12 = sshll.u32 %s7491_s18, 4  ;;  %p7277_p6 = scmp.ne.s32.totalorder %s7970_s17, %s7276_s0  ;;  %s798_s12 = int_to_ptr.vmem [resolvable:$true] %s797_s12 }
 0x484   :  { %p7280_p7 = scmp.lt.u32.totalorder %s7276_s0, %s7970_s17 }
 0x486   :  { %p7282_p8 = pnand %p7280_p7, %p7277_p6 }
 0x488   :  { %7285 = shalt.err (!%p7282_p8)
}
 0x489   :  { %s7286_s22 = scalar_lea.vmem %s798_s12, 16  ;;  %s7290_s8 = scalar_lea.vmem %s798_s12, 32 }
 0x48a   :  { %p7287_p9 = scmp.ne.s32.totalorder %s798_s12, %s7286_s22  ;;  %p7291_p10 = scmp.lt.s32.totalorder %s798_s12, %s798_s12 }
 0x48b   :  { %p7292_p11 = scmp.lt.s32.totalorder %s7290_s8, %s7286_s22 }
 0x48d   :  { %p7293_p12 = por %p7292_p11, %p7291_p10 }
 0x48f   :  { %p7294_p13 = pnand %p7293_p12, %p7287_p9 }
 0x491   :  { %7297 = shalt.err (!%p7294_p13)
}
 0x492   :  { %800 = dma.hbm_to_vmem [thread:$0]  %s7970_s17, 16, %s798_s12, [#allocation74]  }
 0x493   :  { %7298 = dma.done.wait [#allocation3], 16  }
 0x494   :  { %7299 = vsyncadd [#allocation3], 4294967280 }
 0x495   :  { %7300 = dma.done.wait [#allocation5], 32  }
 0x496   :  { %7301 = vsyncadd [#allocation5], 4294967264 }
 0x497   :  { %7302 = dma.done.wait [#allocation8], 32  }
 0x498   :  { %7303 = vsyncadd [#allocation8], 4294967264 }
 0x499   :  { %7304 = dma.done.wait [#allocation11], 32  }
 0x49a   :  { %7305 = vsyncadd [#allocation11], 4294967264 }
 0x49b   :  { %7306 = dma.done.wait [#allocation14], 32  }
 0x49c   :  { %7307 = vsyncadd [#allocation14], 4294967264 }
 0x49d   :  { %7308 = dma.done.wait [#allocation17], 32  }
 0x49e   :  { %7309 = vsyncadd [#allocation17], 4294967264 }
 0x49f   :  { %7310 = dma.done.wait [#allocation20], 32  }
 0x4a0   :  { %7311 = vsyncadd [#allocation20], 4294967264 }
 0x4a1   :  { %7312 = dma.done.wait [#allocation23], 32  }
 0x4a2   :  { %7313 = vsyncadd [#allocation23], 4294967264 }
 0x4a3   :  { %7314 = dma.done.wait [#allocation26], 32  }
 0x4a4   :  { %7315 = vsyncadd [#allocation26], 4294967264 }
 0x4a5   :  { %7316 = dma.done.wait [#allocation29], 32  }
 0x4a6   :  { %7317 = vsyncadd [#allocation29], 4294967264 }
 0x4a7   :  { %7318 = dma.done.wait [#allocation32], 32  }
 0x4a8   :  { %7319 = vsyncadd [#allocation32], 4294967264 }
 0x4a9   :  { %7320 = dma.done.wait [#allocation35], 32  }
 0x4aa   :  { %7321 = vsyncadd [#allocation35], 4294967264 }
 0x4ab   :  { %7322 = dma.done.wait [#allocation38], 32  }
 0x4ac   :  { %7323 = vsyncadd [#allocation38], 4294967264 }
 0x4ad   :  { %7324 = dma.done.wait [#allocation41], 32  }
 0x4ae   :  { %7325 = vsyncadd [#allocation41], 4294967264 }
 0x4af   :  { %7326 = dma.done.wait [#allocation44], 32  }
 0x4b0   :  { %7327 = vsyncadd [#allocation44], 4294967264 }
 0x4b1   :  { %7328 = dma.done.wait [#allocation47], 32  }
 0x4b2   :  { %7329 = vsyncadd [#allocation47], 4294967264 }
 0x4b3   :  { %7330 = dma.done.wait [#allocation50], 32  }
 0x4b4   :  { %7331 = vsyncadd [#allocation50], 4294967264 }
 0x4b5   :  { %7332 = dma.done.wait [#allocation53], 32  }
 0x4b6   :  { %7333 = vsyncadd [#allocation53], 4294967264 }
 0x4b7   :  { %7334 = dma.done.wait [#allocation56], 32  }
 0x4b8   :  { %7335 = vsyncadd [#allocation56], 4294967264 }
 0x4b9   :  { %7336 = dma.done.wait [#allocation59], 32  }
 0x4ba   :  { %7337 = vsyncadd [#allocation59], 4294967264 }
 0x4bb   :  { %7338 = dma.done.wait [#allocation62], 32  }
 0x4bc   :  { %7339 = vsyncadd [#allocation62], 4294967264 }
 0x4bd   :  { %7340 = dma.done.wait [#allocation65], 32  }
 0x4be   :  { %7341 = vsyncadd [#allocation65], 4294967264 }
 0x4bf   :  { %7342 = dma.done.wait [#allocation68], 32  }
 0x4c0   :  { %7343 = vsyncadd [#allocation68], 4294967264 }
 0x4c1   :  { %7344 = dma.done.wait [#allocation71], 32  }
 0x4c2   :  { %7345 = vsyncadd [#allocation71], 4294967264 }
 0x4c3   :  { %7346 = dma.done.wait [#allocation74], 32  }
 0x4c4   :  { %7347 = vsyncadd [#allocation74], 4294967264  ;;  %s8982_s17 = sld [smem:[#allocation146_spill]]  ;;  %v7492_v0 = vmov 0.0|0.0   ;;  %vm7493_vm0 = vmmov 0   ;;  %v7494_v1 = vmov 0.0  }
 0x4c5   :  { %5547 = vmatprep.subr.bf16.mxu0 %v7492_v0  ;;  %4915 = vmatprep.mubr.msk.f32.mxu0 %vm7493_vm0, %v7494_v1  ;;  %s8983_s23 = sld [smem:[#allocation109_spill]]  ;;  %s8984_s5 = sld [smem:[#allocation103_spill]]  ;;  %vm1470_vm1 = vcmask 261120   ;;  %v4471_v60 = vld [vmem:[#allocation40] ss:$0 sm:$0xff]  ;;  %vm1544_vm2 = vcmask 523264  }
 0x4c6   :  { %5571 = vmatprep.subr.bf16.mxu1 %v7492_v0  ;;  %4950 = vmatprep.mubr.msk.f32.mxu1 %vm7493_vm0, %v7494_v1  ;;  %s8985_s20 = sld [smem:[#allocation101_spill]]  ;;  %s8986_s26 = sld [smem:[#allocation102_spill]] }
 0x4c7   :  { %s8987_s3 = sld [smem:[#allocation148_spill]]  ;;  %s8989_s28 = sld [smem:[#allocation118_spill]] }
 0x4c8   :  { %s8988_s13 = sld [smem:[#allocation108_spill]]  ;;  %s8990_s1 = sld [smem:[#allocation111_spill]] }
 0x4c9   :  { %s8991_s30 = sld [smem:[#allocation115_spill]]  ;;  %s8992_s6 = sld [smem:[#allocation114_spill]] }
 0x4ca   :  { %v1131_v2 = vld [vmem:[%s8982_s17] sm:$0xff]  ;;  %v1132_v3 = vld [vmem:[%s8982_s17 + $0x8] sm:$0xff]  ;;  %v1133_v4 = vld [vmem:[%s8982_s17 + $0x10] sm:$0xff]  ;;  %s8993_s2 = sld [smem:[#allocation110_spill]]  ;;  %s8994_s4 = sld [smem:[#allocation113_spill]] }
 0x4cb   :  { %v5548_v5 = vpack.c.bf16 %v1132_v3, %v1131_v2  ;;  %v1134_v6 = vld [vmem:[%s8982_s17 + $0x18] sm:$0xff]  ;;  %v1135_v8 = vld [vmem:[%s8982_s17 + $0x20] sm:$0xff]  ;;  %v1136_v9 = vld [vmem:[%s8982_s17 + $0x28] sm:$0xff]  ;;  %s8995_s7 = sld [smem:[#allocation117_spill]]  ;;  %s8996_s10 = sld [smem:[#allocation116_spill]] }
 0x4cc   :  { %v5551_v7 = vpack.c.bf16 %v1134_v6, %v1133_v4  ;;  %v5554_v10 = vpack.c.bf16 %v1136_v9, %v1135_v8  ;;  %v1137_v11 = vld [vmem:[%s8982_s17 + $0x30] sm:$0xff]  ;;  %v1138_v12 = vld [vmem:[%s8982_s17 + $0x38] sm:$0xff]  ;;  %v1139_v14 = vld [vmem:[%s8982_s17 + $0x40] sm:$0xff]  ;;  %s8997_s11 = sld [smem:[#allocation112_spill]]  ;;  %s8998_s15 = sld [smem:[#allocation107_spill]] }
 0x4cd   :  { %5549 = vmatpush3.bf16.msra.mxu0 %v5548_v5  ;;  %v5557_v13 = vpack.c.bf16 %v1138_v12, %v1137_v11  ;;  %v1140_v15 = vld [vmem:[%s8982_s17 + $0x48] sm:$0xff]  ;;  %v1141_v17 = vld [vmem:[%s8982_s17 + $0x50] sm:$0xff]  ;;  %v1142_v18 = vld [vmem:[%s8982_s17 + $0x58] sm:$0xff]  ;;  %s8999_s24 = sld [smem:[#allocation123_spill]]  ;;  %s9000_s19 = sld [smem:[#allocation105_spill]] }
 0x4ce   :  { %5550 = vmatprep.subr.bf16.mxu0 %v7492_v0  ;;  %v5560_v16 = vpack.c.bf16 %v1140_v15, %v1139_v14  ;;  %v5563_v19 = vpack.c.bf16 %v1142_v18, %v1141_v17  ;;  %v1143_v20 = vld [vmem:[%s8982_s17 + $0x60] sm:$0xff]  ;;  %v1144_v21 = vld [vmem:[%s8982_s17 + $0x68] sm:$0xff]  ;;  %v1145_v23 = vld [vmem:[%s8982_s17 + $0x70] sm:$0xff]  ;;  %s9001_s14 = sld [smem:[#allocation129_spill]]  ;;  %s9002_s21 = sld [smem:[#allocation104_spill]] }
 0x4cf   :  { %v5566_v22 = vpack.c.bf16 %v1144_v21, %v1143_v20  ;;  %v1146_v24 = vld [vmem:[%s8982_s17 + $0x78] sm:$0xff]  ;;  %v966_v26 = vld [vmem:[%s8983_s23] sm:$0xff]  ;;  %v967_v27 = vld [vmem:[%s8983_s23 + $0x8] sm:$0xff]  ;;  %s9003_s16 = sld [smem:[#allocation106_spill]]  ;;  %s9004_s9 = sld [smem:[#allocation124_spill]] }
 0x4d0   :  { %v5569_v25 = vpack.c.bf16 %v1146_v24, %v1145_v23  ;;  %v953_v28 = vld [vmem:[%s8984_s5] sm:$0xff]  ;;  %v5596_v29 = vpack.c.bf16 %v967_v27, %v966_v26  ;;  %v968_v30 = vld [vmem:[%s8983_s23 + $0x10] sm:$0xff]  ;;  %v969_v31 = vld [vmem:[%s8983_s23 + $0x18] sm:$0xff]  ;;  %s9005_s25 = sld [smem:[#allocation126_spill]]  ;;  %s9006_s18 = sld [smem:[#allocation121_spill]] }
 0x4d1   :  { %5552 = vmatpush3.bf16.msra.mxu0 %v5551_v7  ;;  %v5599_v32 = vpack.c.bf16 %v969_v31, %v968_v30  ;;  %v950_v33 = vld [vmem:[%s8985_s20] sm:$0xff]  ;;  %v1149_v37 = vld [vmem:[%s8987_s3 + $0x8] sm:$0xff]  ;;  %v1150_v39 = vld [vmem:[%s8987_s3 + $0x10] sm:$0xff]  ;;  %s9007_s12 = sld [smem:[#allocation136_spill]]  ;;  %s9008_s0 = sld [smem:[#allocation119_spill]] }
 0x4d2   :  { %5553 = vmatprep.subr.bf16.mxu0 %v7492_v0  ;;  %v951_v34 = vld [vmem:[%s8986_s26] sm:$0xff]  ;;  %v1151_v40 = vld [vmem:[%s8987_s3 + $0x18] sm:$0xff]  ;;  %v1153_v43 = vld [vmem:[%s8987_s3 + $0x28] sm:$0xff]  ;;  %s9009_s22 = sld [smem:[#allocation132_spill]]  ;;  %s9010_s8 = sld [smem:[#allocation133_spill]] }
 0x4d3   :  { %v952_v35 = vadd.f32 %v951_v34, %v950_v33  ;;  %v1148_v36 = vld [vmem:[%s8987_s3] sm:$0xff]  ;;  %v5575_v41 = vpack.c.bf16 %v1151_v40, %v1150_v39  ;;  %v1154_v45 = vld [vmem:[%s8987_s3 + $0x30] sm:$0xff]  ;;  %v1155_v46 = vld [vmem:[%s8987_s3 + $0x38] sm:$0xff]  ;;  %s9011_s17 = sld [smem:[#allocation145_spill]]  ;;  %s9012_s23 = sld [smem:[#allocation142_spill]] }
 0x4d4   :  { %v5572_v38 = vpack.c.bf16 %v1149_v37, %v1148_v36  ;;  %v1152_v42 = vld [vmem:[%s8987_s3 + $0x20] sm:$0xff]  ;;  %v5581_v47 = vpack.c.bf16 %v1155_v46, %v1154_v45  ;;  %v1157_v49 = vld [vmem:[%s8987_s3 + $0x48] sm:$0xff]  ;;  %v1158_v51 = vld [vmem:[%s8987_s3 + $0x50] sm:$0xff]  ;;  %s9013_s5 = sld [smem:[#allocation138_spill]]  ;;  %s9014_s20 = sld [smem:[#allocation139_spill]] }
 0x4d5   :  { %5555 = vmatpush3.bf16.msra.mxu0 %v5554_v10  ;;  %v5578_v44 = vpack.c.bf16 %v1153_v43, %v1152_v42  ;;  %v1156_v48 = vld [vmem:[%s8987_s3 + $0x40] sm:$0xff]  ;;  %v1159_v52 = vld [vmem:[%s8987_s3 + $0x58] sm:$0xff]  ;;  %v1161_v55 = vld [vmem:[%s8987_s3 + $0x68] sm:$0xff]  ;;  %s7495_s26 = smov 32  }
 0x4d6   :  { %5556 = vmatprep.subr.bf16.mxu0 %v7492_v0  ;;  %5573 = vmatpush3.bf16.msra.mxu1 %v5572_v38  ;;  %v5584_v50 = vpack.c.bf16 %v1157_v49, %v1156_v48  ;;  %v5587_v53 = vpack.c.bf16 %v1159_v52, %v1158_v51  ;;  %v1160_v54 = vld [vmem:[%s8987_s3 + $0x60] sm:$0xff]  ;;  %v1162_v57 = vld [vmem:[%s8987_s3 + $0x70] sm:$0xff]  ;;  %v1163_v58 = vld [vmem:[%s8987_s3 + $0x78] sm:$0xff]  ;;  %s7496_s3 = smov 64  }
 0x4d7   :  { %5574 = vmatprep.subr.bf16.mxu1 %v7492_v0  ;;  %v5590_v56 = vpack.c.bf16 %v1161_v55, %v1160_v54  ;;  %v5593_v59 = vpack.c.bf16 %v1163_v58, %v1162_v57  ;;  %v4475_v3 = vld [vmem:[%s8988_s13] ss:$0 sm:$0xff]  ;;  %v994_v15 = vld [vmem:[%s8989_s28 + $0x10] sm:$0xff]  ;;  %v1005_v31 = vld [vmem:[%s8989_s28 + $0x68] sm:$0xff]  ;;  %s9015_s13 = sld [smem:[#allocation153_spill]] }
 0x4d8   :  { %v992_v12 = vld [vmem:[%s8989_s28] sm:$0xff]  ;;  %v998_v21 = vld [vmem:[%s8989_s28 + $0x30] sm:$0xff]  ;;  %v1007_v34 = vld [vmem:[%s8989_s28 + $0x78] sm:$0xff] }
 0x4d9   :  { %5558 = vmatpush3.bf16.msra.mxu0 %v5557_v13  ;;  %v993_v13 = vld [vmem:[%s8989_s28 + $0x8] sm:$0xff]  ;;  %v996_v18 = vld [vmem:[%s8989_s28 + $0x20] sm:$0xff]  ;;  %v1002_v27 = vld [vmem:[%s8989_s28 + $0x50] sm:$0xff] }
 0x4da   :  { %5559 = vmatprep.subr.bf16.mxu0 %v7492_v0  ;;  %5576 = vmatpush3.bf16.msra.mxu1 %v5575_v41  ;;  %v5602_v14 = vpack.c.bf16 %v993_v13, %v992_v12  ;;  %v1000_v24 = vld [vmem:[%s8989_s28 + $0x40] sm:$0xff]  ;;  %v1006_v33 = vld [vmem:[%s8989_s28 + $0x70] sm:$0xff]  ;;  %v972_v42 = vld [vmem:[%s8990_s1 + $0x8] sm:$0xff] }
 0x4db   :  { %5577 = vmatprep.subr.bf16.mxu1 %v7492_v0  ;;  %v1004_v30 = vld [vmem:[%s8989_s28 + $0x60] sm:$0xff]  ;;  %v973_v43 = vld [vmem:[%s8990_s1 + $0x10] sm:$0xff]  ;;  %v974_v45 = vld [vmem:[%s8990_s1 + $0x18] sm:$0xff] }
 0x4dc   :  { %v971_v41 = vld [vmem:[%s8990_s1] sm:$0xff]  ;;  %v5629_v46 = vpack.c.bf16 %v974_v45, %v973_v43  ;;  %v976_v48 = vld [vmem:[%s8990_s1 + $0x28] sm:$0xff]  ;;  %v978_v51 = vld [vmem:[%s8990_s1 + $0x38] sm:$0xff] }
 0x4dd   :  { %5561 = vmatpush3.bf16.msra.mxu0 %v5560_v16  ;;  %v995_v16 = vld [vmem:[%s8989_s28 + $0x18] sm:$0xff] }
 0x4de   :  { %5562 = vmatprep.subr.bf16.mxu0 %v7492_v0  ;;  %5579 = vmatpush3.bf16.msra.mxu1 %v5578_v44  ;;  %v5605_v17 = vpack.c.bf16 %v995_v16, %v994_v15  ;;  %v5626_v44 = vpack.c.bf16 %v972_v42, %v971_v41 }
 0x4df   :  { %5580 = vmatprep.subr.bf16.mxu1 %v7492_v0 }
 0x4e1   :  { %5564 = vmatpush3.bf16.msra.mxu0 %v5563_v19  ;;  %v997_v19 = vld [vmem:[%s8989_s28 + $0x28] sm:$0xff] }
 0x4e2   :  { %5565 = vmatprep.subr.bf16.mxu0 %v7492_v0  ;;  %5582 = vmatpush3.bf16.msra.mxu1 %v5581_v47  ;;  %v5608_v20 = vpack.c.bf16 %v997_v19, %v996_v18  ;;  %v975_v47 = vld [vmem:[%s8990_s1 + $0x20] sm:$0xff] }
 0x4e3   :  { %5583 = vmatprep.subr.bf16.mxu1 %v7492_v0  ;;  %v5632_v49 = vpack.c.bf16 %v976_v48, %v975_v47  ;;  %v4481_v18 = vld [vmem:[%s8993_s2] ss:$0 sm:$0xff]  ;;  %s9020_s2 = sld [smem:[#allocation151_spill]] }
 0x4e5   :  { %5567 = vmatpush3.bf16.msra.mxu0 %v5566_v22  ;;  %v999_v22 = vld [vmem:[%s8989_s28 + $0x38] sm:$0xff] }
 0x4e6   :  { %5568 = vmatprep.subr.bf16.mxu0 %v7492_v0  ;;  %5585 = vmatpush3.bf16.msra.mxu1 %v5584_v50  ;;  %v5611_v23 = vpack.c.bf16 %v999_v22, %v998_v21  ;;  %v977_v50 = vld [vmem:[%s8990_s1 + $0x30] sm:$0xff]  ;;  %s9017_s1 = sld [smem:[#allocation157_spill]] }
 0x4e7   :  { %5586 = vmatprep.subr.bf16.mxu1 %v7492_v0  ;;  %v5635_v52 = vpack.c.bf16 %v978_v51, %v977_v50 }
 0x4e9   :  { %5570 = vmatpush3.bf16.msra.mxu0 %v5569_v25  ;;  %v1001_v25 = vld [vmem:[%s8989_s28 + $0x48] sm:$0xff] }
 0x4ea   :  { %5595 = vmatprep.subr.bf16.mxu0 %v7492_v0  ;;  %5588 = vmatpush3.bf16.msra.mxu1 %v5587_v53  ;;  %v5614_v26 = vpack.c.bf16 %v1001_v25, %v1000_v24  ;;  %v4473_v53 = vld [vmem:[#allocation42] ss:$0 sm:$0xff] }
 0x4eb   :  { %5589 = vmatprep.subr.bf16.mxu1 %v7492_v0 }
 0x4ec   :  { %4916 = vmatmul.mubr.f32.vlgmr.msra.gmra.mrb[0].mxu0 %v953_v28  ;;  %v1003_v28 = vld [vmem:[%s8989_s28 + $0x58] sm:$0xff]  ;;  %s9016_s28 = sld [smem:[#allocation164_spill]] }
 0x4ed   :  { %5597 = vmatpush3.bf16.msra.mxu0 %v5596_v29  ;;  %4961 = vmatprep.mubr.msk.f32.mxu0 %vm7493_vm0, %v7494_v1  ;;  %v5617_v29 = vpack.c.bf16 %v1003_v28, %v1002_v27  ;;  %v980_v28 = vld [vmem:[%s8994_s4] sm:$0xff] }
 0x4ee   :  { %5598 = vmatprep.subr.bf16.mxu0 %v7492_v0  ;;  %5591 = vmatpush3.bf16.msra.mxu1 %v5590_v56 }
 0x4ef   :  { %5592 = vmatprep.subr.bf16.mxu1 %v7492_v0 }
 0x4f1   :  { %5600 = vmatpush3.bf16.msra.mxu0 %v5599_v32  ;;  %v5620_v32 = vpack.c.bf16 %v1005_v31, %v1004_v30  ;;  %v982_v30 = vld [vmem:[%s8994_s4 + $0x10] sm:$0xff] }
 0x4f2   :  { %5625 = vmatprep.subr.bf16.mxu0 %v7492_v0  ;;  %5594 = vmatpush3.bf16.msra.mxu1 %v5593_v59 }
 0x4f3   :  { %5601 = vmatprep.subr.bf16.mxu1 %v7492_v0 }
 0x4f4   :  { %4962 = vmatmul.mubr.msk.f32.vlgmr.msra.gmra.mrb[2].mxu0 %vm1470_vm1, %v952_v35  ;;  %v5623_v35 = vpack.c.bf16 %v1007_v34, %v1006_v33  ;;  %v984_v34 = vld [vmem:[%s8994_s4 + $0x20] sm:$0xff] }
 0x4f5   :  { %5015 = vmatprep.mubr.msk.f32.mxu0 %vm7493_vm0, %v7494_v1  ;;  %5627 = vmatpush3.bf16.msra.mxu0 %v5626_v44  ;;  %v4482_v44 = vld [vmem:[%s8995_s7] ss:$0 sm:$0xff]  ;;  %s9023_s7 = sld [smem:[#allocation176_spill]] }
 0x4f6   :  { %5628 = vmatprep.subr.bf16.mxu0 %v7492_v0 }
 0x4f9   :  { %5630 = vmatpush3.bf16.msra.mxu0 %v5629_v46  ;;  %v4483_v46 = vld [vmem:[%s8996_s10] ss:$0 sm:$0xff]  ;;  %s9024_s10 = sld [smem:[#allocation172_spill]] }
 0x4fa   :  { %5631 = vmatprep.subr.bf16.mxu0 %v7492_v0 }
 0x4fd   :  { %5633 = vmatpush3.bf16.msra.mxu0 %v5632_v49 }
 0x4fe   :  { %5634 = vmatprep.subr.bf16.mxu0 %v7492_v0 }
 0x501   :  { %5636 = vmatpush3.bf16.msra.mxu0 %v5635_v52 }
 0x502   :  { %5637 = vmatprep.subr.bf16.mxu0 %v7492_v0 }
 0x5bf   :  { %v1370_v61 = vpop.f32.mrb[0].mxu0 }
 0x5c0   :  { %v1371_v62 = vadd.f32 %v4471_v60, %v1370_v61  ;;  %v4917_v63 = vpop.f32.mrb[1].mxu0 }
 0x5c2   :  { %v4472_v2 = vmul.f32 -1.442695, %v1371_v62 }
 0x5c4   :  { %6130 = vpow2.f32 %v4472_v2 }
 0x5c7   :  { %v1540_v4 = vpop.f32.mrb[2].mxu0 }
 0x5c8   :  { %v8247_v5 = vadd.f32 %v4475_v3, %v1540_v4  ;;  %v4963_v6 = vpop.f32.mrb[3].mxu0  ;;  %v4477_v4 = vld [vmem:[%s8991_s30] ss:$0 sm:$0xff]  ;;  %s9018_s30 = sld [smem:[#allocation159_spill]] }
 0x5ca   :  { %v1545_v7 = vsel %vm1544_vm2, %v8247_v5, 0.0 }
 0x5cb   :  { %1546 = vadd.xlane.f32.xlu0 %v1545_v7  ;;  %v4478_v7 = vld [vmem:[%s8992_s6] ss:$0 sm:$0xff]  ;;  %s9019_s6 = sld [smem:[#allocation155_spill]] }
 0x5ce   :  { %v6131_v8 = vpop.eup %6130 }
 0x5cf   :  { %v1377_v9 = vadd.f32 1.0, %v6131_v8 }
 0x5d1   :  { %6132 = vrcp.f32 %v1377_v9 }
 0x5db   :  { %v6133_v10 = vpop.eup %6132 }
 0x5dc   :  { %v1380_v11 = vmul.f32 %v6133_v10, %v1371_v62 }
 0x5de   :  { %4951 = vmatmul.mubr.f32.vlgmr.msra.gmra.mrb[0].mxu1 %v1380_v11 }
 0x5df   :  { %4996 = vmatprep.mubr.msk.f32.mxu1 %vm7493_vm0, %v7494_v1  ;;  %5603 = vmatpush3.bf16.msra.mxu1 %v5602_v14 }
 0x5e0   :  { %5604 = vmatprep.subr.bf16.mxu1 %v7492_v0 }
 0x5e3   :  { %5606 = vmatpush3.bf16.msra.mxu1 %v5605_v17 }
 0x5e4   :  { %5607 = vmatprep.subr.bf16.mxu1 %v7492_v0 }
 0x5e7   :  { %5609 = vmatpush3.bf16.msra.mxu1 %v5608_v20 }
 0x5e8   :  { %5610 = vmatprep.subr.bf16.mxu1 %v7492_v0 }
 0x5eb   :  { %5612 = vmatpush3.bf16.msra.mxu1 %v5611_v23 }
 0x5ec   :  { %5613 = vmatprep.subr.bf16.mxu1 %v7492_v0 }
 0x5ef   :  { %5615 = vmatpush3.bf16.msra.mxu1 %v5614_v26 }
 0x5f0   :  { %5616 = vmatprep.subr.bf16.mxu1 %v7492_v0 }
 0x5f3   :  { %5618 = vmatpush3.bf16.msra.mxu1 %v5617_v29  ;;  %v981_v29 = vld [vmem:[%s8994_s4 + $0x8] sm:$0xff] }
 0x5f4   :  { %5619 = vmatprep.subr.bf16.mxu1 %v7492_v0  ;;  %v5638_v31 = vpack.c.bf16 %v981_v29, %v980_v28  ;;  %v4487_v29 = vld [vmem:[%s9000_s19] ss:$0 sm:$0xff] }
 0x5f7   :  { %5621 = vmatpush3.bf16.msra.mxu1 %v5620_v32  ;;  %v983_v32 = vld [vmem:[%s8994_s4 + $0x18] sm:$0xff] }
 0x5f8   :  { %5622 = vmatprep.subr.bf16.mxu1 %v7492_v0  ;;  %v5641_v33 = vpack.c.bf16 %v983_v32, %v982_v30  ;;  %v1039_v32 = vld [vmem:[%s9001_s14 + $0x8] sm:$0xff] }
 0x5fb   :  { %5624 = vmatpush3.bf16.msra.mxu1 %v5623_v35  ;;  %v985_v35 = vld [vmem:[%s8994_s4 + $0x28] sm:$0xff] }
 0x5fc   :  { %5649 = vmatprep.subr.bf16.mxu1 %v7492_v0 }
 0x658   :  { %v1547_v36 = vpop.xlane.xlu0 %1546 }
 0x659   :  { %v1549_v37 = vmul.f32 0.015625, %v1547_v36  ;;  %v5644_v36 = vpack.c.bf16 %v985_v35, %v984_v34 }
 0x65b   :  { %v1550_v38 = vsub.f32 %v8247_v5, %v1549_v37  ;;  %v986_v37 = vld [vmem:[%s8994_s4 + $0x30] sm:$0xff] }
 0x65d   :  { %v1551_v39 = vmul.f32 %v1550_v38, %v1550_v38 }
 0x65f   :  { %v1552_v40 = vsel %vm1544_vm2, %v1551_v39, 0.0 }
 0x660   :  { %1553 = vadd.xlane.f32.xlu0 %v1552_v40 }
 0x6b1   :  { %v1453_v54 = vpop.f32.mrb[0].mxu1 }
 0x6b2   :  { %v1454_v55 = vadd.f32 %v4473_v53, %v1453_v54  ;;  %v4952_v56 = vpop.f32.mrb[1].mxu1  ;;  %v4485_v54 = vld [vmem:[%s8997_s11] ss:$0 sm:$0xff]  ;;  %s9025_s11 = sld [smem:[#allocation168_spill]] }
 0x6b4   :  { %v4474_v57 = vmul.f32 -1.442695, %v1454_v55 }
 0x6b6   :  { %6134 = vpow2.f32 %v4474_v57 }
 0x6c0   :  { %v6135_v58 = vpop.eup %6134 }
 0x6c1   :  { %v1460_v59 = vadd.f32 1.0, %v6135_v58 }
 0x6c3   :  { %6136 = vrcp.f32 %v1460_v59 }
 0x6cd   :  { %v6137_v60 = vpop.eup %6136 }
 0x6ce   :  { %v8291_v61 = vmul.f32 %v6137_v60, %v1454_v55 }
 0x6d0   :  { %4997 = vmatmul.mubr.f32.vlgmr.msra.gmra.mrb[2].mxu1 %v8291_v61 }
 0x6d1   :  { %5053 = vmatprep.mubr.msk.f32.mxu1 %vm7493_vm0, %v7494_v1 }
 0x6ed   :  { %v1554_v62 = vpop.xlane.xlu0 %1553 }
 0x6ee   :  { %v1555_v63 = vmul.f32 0.015625, %v1554_v62 }
 0x6f0   :  { %v1556_v2 = vadd.f32 1e-05, %v1555_v63 }
 0x6f2   :  { %6138 = vrsqrt.f32 %v1556_v2 }
 0x6fc   :  { %v6139_v3 = vpop.eup %6138 }
 0x6fd   :  { %v1558_v6 = vmul.f32 %v6139_v3, %v1550_v38  ;;  %v987_v38 = vld [vmem:[%s8994_s4 + $0x38] sm:$0xff]  ;;  %s9022_s4 = sld [smem:[#allocation174_spill]] }
 0x6fe   :  { %v5647_v39 = vpack.c.bf16 %v987_v38, %v986_v37  ;;  %v1040_v37 = vld [vmem:[%s9001_s14 + $0x10] sm:$0xff]  ;;  %v1041_v38 = vld [vmem:[%s9001_s14 + $0x18] sm:$0xff] }
 0x6ff   :  { %v1565_v8 = vmul.f32 %v4477_v4, %v1558_v6  ;;  %v957_v4 = vld [vmem:[%s8998_s15] sm:$0xff]  ;;  %v958_v6 = vld [vmem:[%s8998_s15 + $0x8] sm:$0xff] }
 0x701   :  { %v1572_v9 = vadd.f32 %v4478_v7, %v1565_v8  ;;  %v959_v7 = vld [vmem:[%s8998_s15 + $0x10] sm:$0xff]  ;;  %v960_v8 = vld [vmem:[%s8998_s15 + $0x18] sm:$0xff] }
 0x703   :  { %v4479_v10 = vmul.f32 -1.442695, %v1572_v9 }
 0x705   :  { %6140 = vpow2.f32 %v4479_v10  ;;  %v961_v10 = vld [vmem:[%s8998_s15 + $0x20] sm:$0xff] }
 0x70f   :  { %v6141_v11 = vpop.eup %6140 }
 0x710   :  { %v1576_v12 = vadd.f32 1.0, %v6141_v11  ;;  %v962_v11 = vld [vmem:[%s8998_s15 + $0x28] sm:$0xff] }
 0x712   :  { %6142 = vrcp.f32 %v1576_v12  ;;  %v5656_v12 = vpack.c.bf16 %v962_v11, %v961_v10 }
 0x71c   :  { %v6143_v13 = vpop.eup %6142 }
 0x71d   :  { %v1579_v14 = vmul.f32 %v6143_v13, %v1572_v9  ;;  %v5653_v9 = vpack.c.bf16 %v960_v8, %v959_v7  ;;  %v963_v13 = vld [vmem:[%s8998_s15 + $0x30] sm:$0xff]  ;;  %v4491_v8 = vld [vmem:[#allocation6] ss:$0 sm:$0xff] }
 0x71f   :  { %5016 = vmatmul.mubr.msk.f32.vlgmr.msra.gmra.mrb[4].mxu0 %vm1544_vm2, %v1579_v14  ;;  %v964_v14 = vld [vmem:[%s8998_s15 + $0x38] sm:$0xff]  ;;  %s9026_s15 = sld [smem:[#allocation130_spill]] }
 0x720   :  { %5034 = vmatprep.mubr.msk.f32.mxu0 %vm7493_vm0, %v7494_v1  ;;  %5639 = vmatpush3.bf16.msra.mxu0 %v5638_v31  ;;  %v1038_v31 = vld [vmem:[%s9001_s14] sm:$0xff] }
 0x721   :  { %5640 = vmatprep.subr.bf16.mxu0 %v7492_v0  ;;  %v5674_v35 = vpack.c.bf16 %v1039_v32, %v1038_v31 }
 0x724   :  { %5642 = vmatpush3.bf16.msra.mxu0 %v5641_v33  ;;  %v4488_v33 = vld [vmem:[%s9002_s21] ss:$0 sm:$0xff] }
 0x725   :  { %5643 = vmatprep.subr.bf16.mxu0 %v7492_v0 }
 0x728   :  { %5645 = vmatpush3.bf16.msra.mxu0 %v5644_v36 }
 0x729   :  { %5646 = vmatprep.subr.bf16.mxu0 %v7492_v0 }
 0x72c   :  { %5648 = vmatpush3.bf16.msra.mxu0 %v5647_v39  ;;  %v5677_v39 = vpack.c.bf16 %v1041_v38, %v1040_v37  ;;  %v4497_v38 = vld [vmem:[#allocation7] ss:$0 sm:$0xff] }
 0x72d   :  { %5661 = vmatprep.subr.bf16.mxu0 %v7492_v0 }
 0x7a3   :  { %v1646_v15 = vpop.f32.mrb[2].mxu1 }
 0x7a4   :  { %v4998_v16 = vpop.f32.mrb[3].mxu1 }
 0x7a5   :  { %v1016_v16 = vld [vmem:[%s8999_s24] sm:$0xff] }
 0x7f2   :  { %v1719_v17 = vpop.f32.mrb[4].mxu0 }
 0x7f3   :  { %v1720_v19 = vadd.f32 %v1719_v17, %v1646_v15  ;;  %v5017_v20 = vpop.f32.mrb[5].mxu0  ;;  %v5659_v15 = vpack.c.bf16 %v964_v14, %v963_v13  ;;  %v1017_v17 = vld [vmem:[%s8999_s24 + $0x8] sm:$0xff] }
 0x7f4   :  { %v1019_v20 = vld [vmem:[%s8999_s24 + $0x18] sm:$0xff] }
 0x7f5   :  { %v1729_v21 = vadd.f32 %v4481_v18, %v1720_v19  ;;  %v1018_v18 = vld [vmem:[%s8999_s24 + $0x10] sm:$0xff]  ;;  %v5662_v19 = vpack.c.bf16 %v1017_v17, %v1016_v16  ;;  %v1025_v17 = vld [vmem:[%s9004_s9] sm:$0xff] }
 0x7f7   :  { %v1730_v22 = vsel %vm1544_vm2, %v1729_v21, 0.0 }
 0x7f8   :  { %1731 = vadd.xlane.f32.xlu1 %v1730_v22  ;;  %v1020_v22 = vld [vmem:[%s8999_s24 + $0x20] sm:$0xff] }
 0x885   :  { %v1732_v23 = vpop.xlane.xlu1 %1731 }
 0x886   :  { %v1733_v24 = vmul.f32 0.015625, %v1732_v23  ;;  %v1021_v23 = vld [vmem:[%s8999_s24 + $0x28] sm:$0xff] }
 0x888   :  { %v1734_v25 = vsub.f32 %v1729_v21, %v1733_v24  ;;  %v5665_v21 = vpack.c.bf16 %v1019_v20, %v1018_v18  ;;  %v5668_v24 = vpack.c.bf16 %v1021_v23, %v1020_v22  ;;  %v1026_v18 = vld [vmem:[%s9004_s9 + $0x8] sm:$0xff] }
 0x889   :  { %v5698_v20 = vpack.c.bf16 %v1026_v18, %v1025_v17 }
 0x88a   :  { %v1735_v26 = vmul.f32 %v1734_v25, %v1734_v25 }
 0x88c   :  { %v1736_v27 = vsel %vm1544_vm2, %v1735_v26, 0.0 }
 0x88d   :  { %1737 = vadd.xlane.f32.xlu1 %v1736_v27 }
 0x91a   :  { %v1738_v40 = vpop.xlane.xlu1 %1737 }
 0x91b   :  { %v1739_v41 = vmul.f32 0.015625, %v1738_v40  ;;  %v1042_v40 = vld [vmem:[%s9001_s14 + $0x20] sm:$0xff] }
 0x91d   :  { %v1740_v42 = vadd.f32 1e-05, %v1739_v41  ;;  %v1043_v41 = vld [vmem:[%s9001_s14 + $0x28] sm:$0xff] }
 0x91f   :  { %6144 = vrsqrt.f32 %v1740_v42  ;;  %v5680_v42 = vpack.c.bf16 %v1043_v41, %v1042_v40 }
 0x929   :  { %v6145_v43 = vpop.eup %6144 }
 0x92a   :  { %v1742_v45 = vmul.f32 %v6145_v43, %v1734_v25  ;;  %v1044_v43 = vld [vmem:[%s9001_s14 + $0x30] sm:$0xff] }
 0x92c   :  { %v1749_v47 = vmul.f32 %v4482_v44, %v1742_v45  ;;  %v1045_v44 = vld [vmem:[%s9001_s14 + $0x38] sm:$0xff] }
 0x92d   :  { %v5683_v45 = vpack.c.bf16 %v1045_v44, %v1044_v43 }
 0x92e   :  { %v1756_v48 = vadd.f32 %v4483_v46, %v1749_v47  ;;  %v1046_v46 = vld [vmem:[%s9001_s14 + $0x40] sm:$0xff]  ;;  %v1047_v47 = vld [vmem:[%s9001_s14 + $0x48] sm:$0xff] }
 0x930   :  { %v4484_v49 = vmul.f32 -1.442695, %v1756_v48 }
 0x932   :  { %6146 = vpow2.f32 %v4484_v49  ;;  %v1048_v49 = vld [vmem:[%s9001_s14 + $0x50] sm:$0xff] }
 0x93c   :  { %v6147_v50 = vpop.eup %6146 }
 0x93d   :  { %v1760_v51 = vadd.f32 1.0, %v6147_v50  ;;  %v1049_v50 = vld [vmem:[%s9001_s14 + $0x58] sm:$0xff] }
 0x93f   :  { %6148 = vrcp.f32 %v1760_v51  ;;  %v5689_v51 = vpack.c.bf16 %v1049_v50, %v1048_v49  ;;  %v1031_v49 = vld [vmem:[%s9005_s25 + $0x8] sm:$0xff]  ;;  %v1032_v50 = vld [vmem:[%s9005_s25 + $0x10] sm:$0xff] }
 0x949   :  { %v6149_v52 = vpop.eup %6148 }
 0x94a   :  { %v1763_v53 = vmul.f32 %v6149_v52, %v1756_v48  ;;  %v5686_v48 = vpack.c.bf16 %v1047_v47, %v1046_v46  ;;  %v1050_v52 = vld [vmem:[%s9001_s14 + $0x60] sm:$0xff] }
 0x94c   :  { %5035 = vmatmul.mubr.msk.f32.vlgmr.msra.gmra.mrb[6].mxu0 %vm1544_vm2, %v1763_v53  ;;  %v1051_v53 = vld [vmem:[%s9001_s14 + $0x68] sm:$0xff] }
 0x94d   :  { %5072 = vmatprep.mubr.msk.f32.mxu0 %vm7493_vm0, %v7494_v1  ;;  %5663 = vmatpush3.bf16.msra.mxu0 %v5662_v19  ;;  %v1027_v19 = vld [vmem:[%s9004_s9 + $0x10] sm:$0xff] }
 0x94e   :  { %5664 = vmatprep.subr.bf16.mxu0 %v7492_v0 }
 0x951   :  { %5666 = vmatpush3.bf16.msra.mxu0 %v5665_v21  ;;  %v1028_v21 = vld [vmem:[%s9004_s9 + $0x18] sm:$0xff] }
 0x952   :  { %5667 = vmatprep.subr.bf16.mxu0 %v7492_v0  ;;  %v5701_v22 = vpack.c.bf16 %v1028_v21, %v1027_v19  ;;  %v1012_v21 = vld [vmem:[%s9006_s18 + $0x8] sm:$0xff] }
 0x955   :  { %5669 = vmatpush3.bf16.msra.mxu0 %v5668_v24 }
 0x956   :  { %5670 = vmatprep.subr.bf16.mxu0 %v7492_v0 }
 0xa1f   :  { %v1839_v55 = vpop.f32.mrb[6].mxu0 }
 0xa20   :  { %v1840_v56 = vadd.f32 %v4485_v54, %v1839_v55  ;;  %v5036_v57 = vpop.f32.mrb[7].mxu0  ;;  %v5692_v54 = vpack.c.bf16 %v1051_v53, %v1050_v52  ;;  %v1052_v55 = vld [vmem:[%s9001_s14 + $0x70] sm:$0xff]  ;;  %v1033_v52 = vld [vmem:[%s9005_s25 + $0x18] sm:$0xff] }
 0xa21   :  { %v5707_v53 = vpack.c.bf16 %v1033_v52, %v1032_v50  ;;  %v1088_v50 = vld [vmem:[%s9007_s12 + $0x58] sm:$0xff]  ;;  %v1089_v52 = vld [vmem:[%s9007_s12 + $0x60] sm:$0xff] }
 0xa22   :  { %v8323_v58 = vadd.f32 %v1840_v56, %v8247_v5  ;;  %v5650_v5 = vpack.c.bf16 %v958_v6, %v957_v4  ;;  %v1053_v56 = vld [vmem:[%s9001_s14 + $0x78] sm:$0xff] }
 0xa23   :  { %v5695_v57 = vpack.c.bf16 %v1053_v56, %v1052_v55 }
 0xa24   :  { %v1844_v59 = vsel %vm1544_vm2, %v8323_v58, 0.0  ;;  %5651 = vmatpush3.bf16.msra.mxu1 %v5650_v5 }
 0xa25   :  { %1845 = vadd.xlane.f32.xlu0 %v1844_v59  ;;  %5652 = vmatprep.subr.bf16.mxu1 %v7492_v0  ;;  %v1022_v59 = vld [vmem:[%s8999_s24 + $0x30] sm:$0xff] }
 0xa28   :  { %5654 = vmatpush3.bf16.msra.mxu1 %v5653_v9 }
 0xa29   :  { %5655 = vmatprep.subr.bf16.mxu1 %v7492_v0 }
 0xa2c   :  { %5657 = vmatpush3.bf16.msra.mxu1 %v5656_v12 }
 0xa2d   :  { %5658 = vmatprep.subr.bf16.mxu1 %v7492_v0 }
 0xa30   :  { %5660 = vmatpush3.bf16.msra.mxu1 %v5659_v15 }
 0xa31   :  { %5673 = vmatprep.subr.bf16.mxu1 %v7492_v0 }
 0xab2   :  { %v1846_v60 = vpop.xlane.xlu0 %1845 }
 0xab3   :  { %v1847_v62 = vmul.f32 0.015625, %v1846_v60  ;;  %v1023_v60 = vld [vmem:[%s8999_s24 + $0x38] sm:$0xff] }
 0xab5   :  { %v1848_v63 = vsub.f32 %v8323_v58, %v1847_v62  ;;  %v5671_v62 = vpack.c.bf16 %v1023_v60, %v1022_v59  ;;  %v4498_v59 = vld [vmem:[#allocation15] ss:$0 sm:$0xff] }
 0xab7   :  { %v1849_v2 = vmul.f32 %v1848_v63, %v1848_v63  ;;  %5672 = vmatpush3.bf16.msra.mxu0 %v5671_v62  ;;  %v4499_v62 = vld [vmem:[#allocation13] ss:$0 sm:$0xff] }
 0xab8   :  { %5697 = vmatprep.subr.bf16.mxu0 %v7492_v0 }
 0xab9   :  { %v1850_v3 = vsel %vm1544_vm2, %v1849_v2, 0.0 }
 0xaba   :  { %1851 = vadd.xlane.f32.xlu1 %v1850_v3 }
 0xb47   :  { %v1852_v25 = vpop.xlane.xlu1 %1851 }
 0xb48   :  { %v1853_v26 = vmul.f32 0.015625, %v1852_v25 }
 0xb4a   :  { %v1854_v27 = vadd.f32 1e-05, %v1853_v26 }
 0xb4c   :  { %6150 = vrsqrt.f32 %v1854_v27  ;;  %v4493_v27 = vld [vmem:[#allocation12] ss:$0 sm:$0xff] }
 0xb56   :  { %v6151_v28 = vpop.eup %6150 }
 0xb57   :  { %v1856_v30 = vmul.f32 %v6151_v28, %v1848_v63  ;;  %v4489_v63 = vld [vmem:[%s9003_s16] ss:$0 sm:$0xff] }
 0xb59   :  { %v1863_v34 = vmul.f32 %v4487_v29, %v1856_v30  ;;  %v4494_v29 = vld [vmem:[#allocation10] ss:$0 sm:$0xff] }
 0xb5b   :  { %v1870_v36 = vadd.f32 %v4488_v33, %v1863_v34 }
 0xb5d   :  { %5054 = vmatmul.mubr.msk.f32.vlgmr.msra.gmra.mrb[4].mxu1 %vm1544_vm2, %v1870_v36 }
 0xb5e   :  { %5675 = vmatpush3.bf16.msra.mxu1 %v5674_v35  ;;  %5107 = vmatprep.mubr.msk.f32.mxu1 %vm7493_vm0, %v7494_v1 }
 0xb5f   :  { %5676 = vmatprep.subr.bf16.mxu1 %v7492_v0 }
 0xb62   :  { %5678 = vmatpush3.bf16.msra.mxu1 %v5677_v39 }
 0xb63   :  { %5679 = vmatprep.subr.bf16.mxu1 %v7492_v0 }
 0xb66   :  { %5681 = vmatpush3.bf16.msra.mxu1 %v5680_v42 }
 0xb67   :  { %5682 = vmatprep.subr.bf16.mxu1 %v7492_v0 }
 0xb6a   :  { %5684 = vmatpush3.bf16.msra.mxu1 %v5683_v45 }
 0xb6b   :  { %5685 = vmatprep.subr.bf16.mxu1 %v7492_v0 }
 0xb6e   :  { %5687 = vmatpush3.bf16.msra.mxu1 %v5686_v48  ;;  %v1030_v48 = vld [vmem:[%s9005_s25] sm:$0xff] }
 0xb6f   :  { %5688 = vmatprep.subr.bf16.mxu1 %v7492_v0 }
 0xb72   :  { %5690 = vmatpush3.bf16.msra.mxu1 %v5689_v51  ;;  %v5704_v51 = vpack.c.bf16 %v1031_v49, %v1030_v48  ;;  %v1087_v49 = vld [vmem:[%s9007_s12 + $0x50] sm:$0xff] }
 0xb73   :  { %5691 = vmatprep.subr.bf16.mxu1 %v7492_v0 }
 0xb76   :  { %5693 = vmatpush3.bf16.msra.mxu1 %v5692_v54 }
 0xb77   :  { %5694 = vmatprep.subr.bf16.mxu1 %v7492_v0 }
 0xb7a   :  { %5696 = vmatpush3.bf16.msra.mxu1 %v5695_v57 }
 0xb7b   :  { %5739 = vmatprep.subr.bf16.mxu1 %v7492_v0 }
 0xb7d   :  { %5108 = vmatmul.mubr.f32.vlgmr.msra.gmra.mrb[6].mxu1 %v8291_v61 }
 0xb7e   :  { %5186 = vmatprep.mubr.msk.f32.mxu1 %vm7493_vm0, %v7494_v1 }
 0xc30   :  { %v1946_v2 = vpop.f32.mrb[4].mxu1 }
 0xc31   :  { %v1947_v3 = vadd.f32 %v4489_v63, %v1946_v2  ;;  %v5055_v4 = vpop.f32.mrb[5].mxu1 }
 0xc33   :  { %v8387_v6 = vadd.f32 %v1947_v3, %v8323_v58 }
 0xc35   :  { %5073 = vmatmul.mubr.msk.f32.vlgmr.msra.gmra.mrb[8].mxu0 %vm1544_vm2, %v8387_v6 }
 0xc36   :  { %5118 = vmatprep.mubr.msk.f32.mxu0 %vm7493_vm0, %v7494_v1  ;;  %5699 = vmatpush3.bf16.msra.mxu0 %v5698_v20  ;;  %v1011_v20 = vld [vmem:[%s9006_s18] sm:$0xff] }
 0xc37   :  { %5700 = vmatprep.subr.bf16.mxu0 %v7492_v0 }
 0xc3a   :  { %5702 = vmatpush3.bf16.msra.mxu0 %v5701_v22  ;;  %v5710_v22 = vpack.c.bf16 %v1012_v21, %v1011_v20 }
 0xc3b   :  { %5703 = vmatprep.subr.bf16.mxu0 %v7492_v0 }
 0xc50   :  { %v2131_v5 = vpop.f32.mrb[6].mxu1 }
 0xc51   :  { %v5109_v7 = vpop.f32.mrb[7].mxu1 }
 0xd08   :  { %v2026_v9 = vpop.f32.mrb[8].mxu0 }
 0xd09   :  { %v8393_v10 = vadd.f32 %v4491_v8, %v2026_v9  ;;  %v5074_v11 = vpop.f32.mrb[9].mxu0  ;;  %v4501_v9 = vld [vmem:[#allocation9] ss:$0 sm:$0xff] }
 0xd0b   :  { %v2030_v58 = vsel %vm1470_vm1, %v8393_v10, 0.0 }
 0xd0c   :  { %2031 = vadd.xlane.f32.xlu0 %v2030_v58 }
 0xd99   :  { %v2032_v12 = vpop.xlane.xlu0 %2031 }
 0xd9a   :  { %v2034_v13 = vmul.f32 0.03125, %v2032_v12 }
 0xd9c   :  { %v2035_v14 = vsub.f32 %v8393_v10, %v2034_v13 }
 0xd9e   :  { %v2036_v15 = vmul.f32 %v2035_v14, %v2035_v14 }
 0xda0   :  { %v2037_v16 = vsel %vm1470_vm1, %v2036_v15, 0.0 }
 0xda1   :  { %2038 = vadd.xlane.f32.xlu1 %v2037_v16 }
 0xe2e   :  { %v2039_v23 = vpop.xlane.xlu1 %2038 }
 0xe2f   :  { %v2040_v24 = vmul.f32 0.03125, %v2039_v23  ;;  %v1014_v23 = vld [vmem:[%s9006_s18 + $0x18] sm:$0xff] }
 0xe31   :  { %v2041_v25 = vadd.f32 1e-05, %v2040_v24 }
 0xe33   :  { %6152 = vrsqrt.f32 %v2041_v25 }
 0xe3d   :  { %v6153_v26 = vpop.eup %6152 }
 0xe3e   :  { %v2043_v28 = vmul.f32 %v6153_v26, %v2035_v14 }
 0xe40   :  { %v2050_v30 = vmul.f32 %v4493_v27, %v2043_v28 }
 0xe42   :  { %v2057_v31 = vadd.f32 %v4494_v29, %v2050_v30  ;;  %v4503_v29 = vld [vmem:[#allocation2] ss:$0 sm:$0xff] }
 0xe44   :  { %v4495_v32 = vmul.f32 -1.442695, %v2057_v31 }
 0xe46   :  { %6154 = vpow2.f32 %v4495_v32  ;;  %v1078_v32 = vld [vmem:[%s9007_s12 + $0x8] sm:$0xff] }
 0xe50   :  { %v6155_v33 = vpop.eup %6154 }
 0xe51   :  { %v2061_v34 = vadd.f32 1.0, %v6155_v33  ;;  %v4504_v33 = vld [vmem:[%s9008_s0] ss:$0 sm:$0xff] }
 0xe53   :  { %6156 = vrcp.f32 %v2061_v34 }
 0xe5d   :  { %v6157_v35 = vpop.eup %6156 }
 0xe5e   :  { %v2064_v36 = vmul.f32 %v6157_v35, %v2057_v31  ;;  %v1077_v31 = vld [vmem:[%s9007_s12] sm:$0xff] }
 0xe5f   :  { %v5716_v35 = vpack.c.bf16 %v1078_v32, %v1077_v31  ;;  %v4511_v32 = vld [vmem:[#allocation18] ss:$0 sm:$0xff] }
 0xe60   :  { %5119 = vmatmul.mubr.msk.f32.vlgmr.msra.gmra.mrb[10].mxu0 %vm1470_vm1, %v2064_v36 }
 0xe61   :  { %5129 = vmatprep.mubr.msk.f32.mxu0 %vm7493_vm0, %v7494_v1  ;;  %5705 = vmatpush3.bf16.msra.mxu0 %v5704_v51  ;;  %v5731_v51 = vpack.c.bf16 %v1088_v50, %v1087_v49 }
 0xe62   :  { %5706 = vmatprep.subr.bf16.mxu0 %v7492_v0 }
 0xe65   :  { %5708 = vmatpush3.bf16.msra.mxu0 %v5707_v53  ;;  %v1090_v53 = vld [vmem:[%s9007_s12 + $0x68] sm:$0xff] }
 0xe66   :  { %5709 = vmatprep.subr.bf16.mxu0 %v7492_v0 }
 0xf33   :  { %v2204_v37 = vpop.f32.mrb[10].mxu0 }
 0xf34   :  { %v2205_v39 = vadd.f32 %v2204_v37, %v2131_v5  ;;  %v5120_v40 = vpop.f32.mrb[11].mxu0  ;;  %v1079_v37 = vld [vmem:[%s9007_s12 + $0x10] sm:$0xff] }
 0xf35   :  { %v1081_v40 = vld [vmem:[%s9007_s12 + $0x20] sm:$0xff] }
 0xf36   :  { %v2214_v41 = vadd.f32 %v4497_v38, %v2205_v39  ;;  %v1080_v38 = vld [vmem:[%s9007_s12 + $0x18] sm:$0xff] }
 0xf37   :  { %v5719_v39 = vpack.c.bf16 %v1080_v38, %v1079_v37 }
 0xf38   :  { %v2215_v42 = vsel %vm1470_vm1, %v2214_v41, 0.0 }
 0xf39   :  { %2216 = vadd.xlane.f32.xlu0 %v2215_v42 }
 0xfc6   :  { %v2217_v43 = vpop.xlane.xlu0 %2216 }
 0xfc7   :  { %v2218_v44 = vmul.f32 0.03125, %v2217_v43  ;;  %v1083_v43 = vld [vmem:[%s9007_s12 + $0x30] sm:$0xff] }
 0xfc9   :  { %v2219_v45 = vsub.f32 %v2214_v41, %v2218_v44  ;;  %v1082_v41 = vld [vmem:[%s9007_s12 + $0x28] sm:$0xff]  ;;  %v1084_v44 = vld [vmem:[%s9007_s12 + $0x38] sm:$0xff] }
 0xfca   :  { %v5722_v42 = vpack.c.bf16 %v1082_v41, %v1081_v40 }
 0xfcb   :  { %v2220_v46 = vmul.f32 %v2219_v45, %v2219_v45 }
 0xfcd   :  { %v2221_v47 = vsel %vm1470_vm1, %v2220_v46, 0.0  ;;  %v1085_v46 = vld [vmem:[%s9007_s12 + $0x40] sm:$0xff] }
 0xfce   :  { %2222 = vadd.xlane.f32.xlu1 %v2221_v47  ;;  %v1086_v47 = vld [vmem:[%s9007_s12 + $0x48] sm:$0xff] }
 0xfcf   :  { %v5728_v48 = vpack.c.bf16 %v1086_v47, %v1085_v46  ;;  %v1072_v46 = vld [vmem:[%s9010_s8 + $0x18] sm:$0xff] }
0x105b   :  { %v2223_v54 = vpop.xlane.xlu1 %2222 }
0x105c   :  { %v2224_v55 = vmul.f32 0.03125, %v2223_v54  ;;  %v5734_v54 = vpack.c.bf16 %v1090_v53, %v1089_v52  ;;  %v4512_v52 = vld [vmem:[#allocation25] ss:$0 sm:$0xff] }
0x105e   :  { %v2225_v56 = vadd.f32 1e-05, %v2224_v55  ;;  %v1091_v55 = vld [vmem:[%s9007_s12 + $0x70] sm:$0xff] }
0x1060   :  { %6158 = vrsqrt.f32 %v2225_v56  ;;  %v1092_v56 = vld [vmem:[%s9007_s12 + $0x78] sm:$0xff] }
0x106a   :  { %v6159_v57 = vpop.eup %6158 }
0x106b   :  { %v2227_v60 = vmul.f32 %v6159_v57, %v2219_v45  ;;  %v5725_v45 = vpack.c.bf16 %v1084_v44, %v1083_v43  ;;  %v5737_v57 = vpack.c.bf16 %v1092_v56, %v1091_v55  ;;  %v1070_v43 = vld [vmem:[%s9010_s8 + $0x8] sm:$0xff]  ;;  %v1071_v44 = vld [vmem:[%s9010_s8 + $0x10] sm:$0xff] }
0x106c   :  { %v5749_v47 = vpack.c.bf16 %v1072_v46, %v1071_v44  ;;  %v1117_v44 = vld [vmem:[%s9012_s23 + $0x50] sm:$0xff] }
0x106d   :  { %v2234_v63 = vmul.f32 %v4498_v59, %v2227_v60  ;;  %v4505_v59 = vld [vmem:[#allocation4] ss:$0 sm:$0xff] }
0x106f   :  { %v2241_v2 = vadd.f32 %v4499_v62, %v2234_v63 }
0x1071   :  { %v4500_v3 = vmul.f32 -1.442695, %v2241_v2 }
0x1073   :  { %6160 = vpow2.f32 %v4500_v3 }
0x107d   :  { %v6161_v4 = vpop.eup %6160 }
0x107e   :  { %v2245_v5 = vadd.f32 1.0, %v6161_v4 }
0x1080   :  { %6162 = vrcp.f32 %v2245_v5 }
0x108a   :  { %v6163_v7 = vpop.eup %6162 }
0x108b   :  { %v2248_v8 = vmul.f32 %v6163_v7, %v2241_v2 }
0x108d   :  { %5130 = vmatmul.mubr.msk.f32.vlgmr.msra.gmra.mrb[12].mxu0 %vm1470_vm1, %v2248_v8 }
0x108e   :  { %5140 = vmatprep.mubr.msk.f32.mxu0 %vm7493_vm0, %v7494_v1  ;;  %5711 = vmatpush3.bf16.msra.mxu0 %v5710_v22  ;;  %v4507_v22 = vld [vmem:[#allocation22] ss:$0 sm:$0xff] }
0x108f   :  { %5712 = vmatprep.subr.bf16.mxu0 %v7492_v0 }
0x1160   :  { %v2324_v11 = vpop.f32.mrb[12].mxu0 }
0x1161   :  { %v2325_v58 = vadd.f32 %v4501_v9, %v2324_v11  ;;  %v5131_v12 = vpop.f32.mrb[13].mxu0 }
0x1162   :  { %v1064_v12 = vld [vmem:[%s9009_s22] sm:$0xff] }
0x1163   :  { %v8420_v13 = vadd.f32 %v2325_v58, %v8393_v10  ;;  %v1013_v10 = vld [vmem:[%s9006_s18 + $0x10] sm:$0xff] }
0x1164   :  { %v5713_v24 = vpack.c.bf16 %v1014_v23, %v1013_v10  ;;  %v4508_v23 = vld [vmem:[#allocation21] ss:$0 sm:$0xff] }
0x1165   :  { %v2329_v14 = vsel %vm1470_vm1, %v8420_v13, 0.0 }
0x1166   :  { %2330 = vadd.xlane.f32.xlu0 %v2329_v14  ;;  %5714 = vmatpush3.bf16.msra.mxu0 %v5713_v24  ;;  %v1065_v14 = vld [vmem:[%s9009_s22 + $0x8] sm:$0xff] }
0x1167   :  { %5715 = vmatprep.subr.bf16.mxu0 %v7492_v0 }
0x11f3   :  { %v2331_v15 = vpop.xlane.xlu0 %2330 }
0x11f4   :  { %v2332_v16 = vmul.f32 0.03125, %v2331_v15  ;;  %v1066_v15 = vld [vmem:[%s9009_s22 + $0x10] sm:$0xff] }
0x11f6   :  { %v2333_v17 = vsub.f32 %v8420_v13, %v2332_v16  ;;  %v5740_v16 = vpack.c.bf16 %v1065_v14, %v1064_v12 }
0x11f8   :  { %v2334_v18 = vmul.f32 %v2333_v17, %v2333_v17  ;;  %5741 = vmatpush3.bf16.msra.mxu1 %v5740_v16  ;;  %v1126_v16 = vld [vmem:[%s9011_s17] sm:$0xff] }
0x11f9   :  { %5742 = vmatprep.subr.bf16.mxu1 %v7492_v0 }
0x11fa   :  { %v2335_v19 = vsel %vm1470_vm1, %v2334_v18, 0.0 }
0x11fb   :  { %2336 = vadd.xlane.f32.xlu1 %v2335_v19 }
0x1288   :  { %v2337_v25 = vpop.xlane.xlu1 %2336 }
0x1289   :  { %v2338_v26 = vmul.f32 0.03125, %v2337_v25 }
0x128b   :  { %v2339_v27 = vadd.f32 1e-05, %v2338_v26 }
0x128d   :  { %6164 = vrsqrt.f32 %v2339_v27 }
0x1297   :  { %v6165_v28 = vpop.eup %6164 }
0x1298   :  { %v2341_v30 = vmul.f32 %v6165_v28, %v2333_v17 }
0x129a   :  { %v2348_v34 = vmul.f32 %v4503_v29, %v2341_v30 }
0x129c   :  { %v2355_v36 = vadd.f32 %v4504_v33, %v2348_v34 }
0x129e   :  { %5141 = vmatmul.mubr.msk.f32.vlgmr.msra.gmra.mrb[14].mxu0 %vm1470_vm1, %v2355_v36 }
0x129f   :  { %5717 = vmatpush3.bf16.msra.mxu0 %v5716_v35  ;;  %5175 = vmatprep.mubr.msk.f32.mxu0 %vm7493_vm0, %v7494_v1 }
0x12a0   :  { %5718 = vmatprep.subr.bf16.mxu0 %v7492_v0 }
0x12a3   :  { %5720 = vmatpush3.bf16.msra.mxu0 %v5719_v39 }
0x12a4   :  { %5721 = vmatprep.subr.bf16.mxu0 %v7492_v0 }
0x12a7   :  { %5723 = vmatpush3.bf16.msra.mxu0 %v5722_v42  ;;  %v1069_v42 = vld [vmem:[%s9010_s8] sm:$0xff] }
0x12a8   :  { %5724 = vmatprep.subr.bf16.mxu0 %v7492_v0 }
0x12ab   :  { %5726 = vmatpush3.bf16.msra.mxu0 %v5725_v45  ;;  %v5746_v45 = vpack.c.bf16 %v1070_v43, %v1069_v42  ;;  %v1116_v42 = vld [vmem:[%s9012_s23 + $0x48] sm:$0xff] }
0x12ac   :  { %5727 = vmatprep.subr.bf16.mxu0 %v7492_v0 }
0x12af   :  { %5729 = vmatpush3.bf16.msra.mxu0 %v5728_v48 }
0x12b0   :  { %5730 = vmatprep.subr.bf16.mxu0 %v7492_v0 }
0x12b3   :  { %5732 = vmatpush3.bf16.msra.mxu0 %v5731_v51 }
0x12b4   :  { %5733 = vmatprep.subr.bf16.mxu0 %v7492_v0 }
0x12b7   :  { %5735 = vmatpush3.bf16.msra.mxu0 %v5734_v54  ;;  %v4513_v54 = vld [vmem:[#allocation24] ss:$0 sm:$0xff] }
0x12b8   :  { %5736 = vmatprep.subr.bf16.mxu0 %v7492_v0 }
0x12bb   :  { %5738 = vmatpush3.bf16.msra.mxu0 %v5737_v57 }
0x12bc   :  { %5781 = vmatprep.subr.bf16.mxu0 %v7492_v0 }
0x12be   :  { %5176 = vmatmul.mubr.f32.vlgmr.msra.gmra.mrb[16].mxu0 %v8291_v61 }
0x12bf   :  { %5254 = vmatprep.mubr.msk.f32.mxu0 %vm7493_vm0, %v7494_v1 }
0x1371   :  { %v2431_v60 = vpop.f32.mrb[14].mxu0 }
0x1372   :  { %v2432_v62 = vadd.f32 %v4505_v59, %v2431_v60  ;;  %v5142_v63 = vpop.f32.mrb[15].mxu0 }
0x1374   :  { %v8464_v2 = vadd.f32 %v2432_v62, %v8420_v13  ;;  %v1067_v13 = vld [vmem:[%s9009_s22 + $0x18] sm:$0xff] }
0x1375   :  { %v5743_v17 = vpack.c.bf16 %v1067_v13, %v1066_v15  ;;  %v1127_v13 = vld [vmem:[%s9011_s17 + $0x8] sm:$0xff] }
0x1376   :  { %v2436_v3 = vsel %vm1470_vm1, %v8464_v2, 0.0 }
0x1377   :  { %2437 = vadd.xlane.f32.xlu0 %v2436_v3  ;;  %5744 = vmatpush3.bf16.msra.mxu1 %v5743_v17  ;;  %v4515_v3 = vld [vmem:[#allocation19] ss:$0 sm:$0xff]  ;;  %v5752_v17 = vpack.c.bf16 %v1127_v13, %v1126_v16 }
0x1378   :  { %5745 = vmatprep.subr.bf16.mxu1 %v7492_v0 }
0x1391   :  { %v2536_v4 = vpop.f32.mrb[16].mxu0 }
0x1392   :  { %v5177_v5 = vpop.f32.mrb[17].mxu0 }
0x1404   :  { %v2438_v7 = vpop.xlane.xlu0 %2437 }
0x1405   :  { %v2439_v8 = vmul.f32 0.03125, %v2438_v7 }
0x1407   :  { %v2440_v9 = vsub.f32 %v8464_v2, %v2439_v8 }
0x1409   :  { %v2441_v11 = vmul.f32 %v2440_v9, %v2440_v9 }
0x140b   :  { %v2442_v58 = vsel %vm1470_vm1, %v2441_v11, 0.0 }
0x140c   :  { %2443 = vadd.xlane.f32.xlu1 %v2442_v58 }
0x1499   :  { %v2444_v18 = vpop.xlane.xlu1 %2443 }
0x149a   :  { %v2445_v19 = vmul.f32 0.03125, %v2444_v18  ;;  %v1128_v18 = vld [vmem:[%s9011_s17 + $0x10] sm:$0xff] }
0x149c   :  { %v2446_v20 = vadd.f32 1e-05, %v2445_v19  ;;  %v1129_v19 = vld [vmem:[%s9011_s17 + $0x18] sm:$0xff] }
0x149e   :  { %6166 = vrsqrt.f32 %v2446_v20  ;;  %v5755_v20 = vpack.c.bf16 %v1129_v19, %v1128_v18  ;;  %v4521_v18 = vld [vmem:[#allocation31] ss:$0 sm:$0xff] }
0x14a8   :  { %v6167_v21 = vpop.eup %6166 }
0x14a9   :  { %v2448_v10 = vmul.f32 %v6167_v21, %v2440_v9 }
0x14ab   :  { %v2455_v24 = vmul.f32 %v4507_v22, %v2448_v10 }
0x14ad   :  { %v2462_v25 = vadd.f32 %v4508_v23, %v2455_v24  ;;  %v4517_v24 = vld [vmem:[#allocation37] ss:$0 sm:$0xff] }
0x14af   :  { %v4509_v26 = vmul.f32 -1.442695, %v2462_v25 }
0x14b1   :  { %6168 = vpow2.f32 %v4509_v26  ;;  %v1107_v26 = vld [vmem:[%s9012_s23] sm:$0xff] }
0x14bb   :  { %v6169_v27 = vpop.eup %6168 }
0x14bc   :  { %v2466_v28 = vadd.f32 1.0, %v6169_v27  ;;  %v1108_v27 = vld [vmem:[%s9012_s23 + $0x8] sm:$0xff] }
0x14be   :  { %6170 = vrcp.f32 %v2466_v28  ;;  %v4518_v28 = vld [vmem:[#allocation36] ss:$0 sm:$0xff] }
0x14c8   :  { %v6171_v29 = vpop.eup %6170 }
0x14c9   :  { %v2469_v30 = vmul.f32 %v6171_v29, %v2462_v25 }
0x14cb   :  { %5187 = vmatmul.mubr.msk.f32.vlgmr.msra.gmra.mrb[8].mxu1 %vm1470_vm1, %v2469_v30  ;;  %v5758_v30 = vpack.c.bf16 %v1108_v27, %v1107_v26 }
0x14cc   :  { %5197 = vmatprep.mubr.msk.f32.mxu1 %vm7493_vm0, %v7494_v1  ;;  %5747 = vmatpush3.bf16.msra.mxu1 %v5746_v45  ;;  %v1118_v45 = vld [vmem:[%s9012_s23 + $0x58] sm:$0xff] }
0x14cd   :  { %5748 = vmatprep.subr.bf16.mxu1 %v7492_v0  ;;  %v5773_v46 = vpack.c.bf16 %v1118_v45, %v1117_v44 }
0x14d0   :  { %5750 = vmatpush3.bf16.msra.mxu1 %v5749_v47  ;;  %v1119_v47 = vld [vmem:[%s9012_s23 + $0x60] sm:$0xff] }
0x14d1   :  { %5751 = vmatprep.subr.bf16.mxu1 %v7492_v0 }
0x159e   :  { %v2609_v31 = vpop.f32.mrb[8].mxu1 }
0x159f   :  { %v2610_v33 = vadd.f32 %v2609_v31, %v2536_v4  ;;  %v5188_v34 = vpop.f32.mrb[9].mxu1 }
0x15a1   :  { %v2619_v35 = vadd.f32 %v4511_v32, %v2610_v33  ;;  %v1109_v32 = vld [vmem:[%s9012_s23 + $0x10] sm:$0xff]  ;;  %v1110_v33 = vld [vmem:[%s9012_s23 + $0x18] sm:$0xff] }
0x15a2   :  { %v5761_v34 = vpack.c.bf16 %v1110_v33, %v1109_v32 }
0x15a3   :  { %v2620_v36 = vsel %vm1470_vm1, %v2619_v35, 0.0 }
0x15a4   :  { %2621 = vadd.xlane.f32.xlu0 %v2620_v36  ;;  %v1112_v36 = vld [vmem:[%s9012_s23 + $0x28] sm:$0xff] }
0x1631   :  { %v2622_v37 = vpop.xlane.xlu0 %2621 }
0x1632   :  { %v2623_v38 = vmul.f32 0.03125, %v2622_v37 }
0x1634   :  { %v2624_v39 = vsub.f32 %v2619_v35, %v2623_v38  ;;  %v1111_v35 = vld [vmem:[%s9012_s23 + $0x20] sm:$0xff]  ;;  %v1113_v38 = vld [vmem:[%s9012_s23 + $0x30] sm:$0xff] }
0x1635   :  { %v5764_v37 = vpack.c.bf16 %v1112_v36, %v1111_v35 }
0x1636   :  { %v2625_v40 = vmul.f32 %v2624_v39, %v2624_v39 }
0x1638   :  { %v2626_v41 = vsel %vm1470_vm1, %v2625_v40, 0.0 }
0x1639   :  { %2627 = vadd.xlane.f32.xlu1 %v2626_v41  ;;  %v1115_v41 = vld [vmem:[%s9012_s23 + $0x40] sm:$0xff] }
0x163a   :  { %v5770_v43 = vpack.c.bf16 %v1116_v42, %v1115_v41  ;;  %v1102_v42 = vld [vmem:[%s9014_s20 + $0x18] sm:$0xff] }
0x16c6   :  { %v2628_v48 = vpop.xlane.xlu1 %2627 }
0x16c7   :  { %v2629_v49 = vmul.f32 0.03125, %v2628_v48  ;;  %v1120_v48 = vld [vmem:[%s9012_s23 + $0x68] sm:$0xff] }
0x16c9   :  { %v2630_v50 = vadd.f32 1e-05, %v2629_v49  ;;  %v5776_v49 = vpack.c.bf16 %v1120_v48, %v1119_v47  ;;  %v4527_v48 = vld [vmem:[#allocation33] ss:$0 sm:$0xff] }
0x16cb   :  { %6172 = vrsqrt.f32 %v2630_v50  ;;  %v1121_v50 = vld [vmem:[%s9012_s23 + $0x70] sm:$0xff] }
0x16d5   :  { %v6173_v51 = vpop.eup %6172 }
0x16d6   :  { %v2632_v53 = vmul.f32 %v6173_v51, %v2624_v39  ;;  %v1114_v39 = vld [vmem:[%s9012_s23 + $0x38] sm:$0xff] }
0x16d7   :  { %v5767_v40 = vpack.c.bf16 %v1114_v39, %v1113_v38  ;;  %v1122_v51 = vld [vmem:[%s9012_s23 + $0x78] sm:$0xff]  ;;  %v1099_v38 = vld [vmem:[%s9014_s20] sm:$0xff]  ;;  %v1100_v39 = vld [vmem:[%s9014_s20 + $0x8] sm:$0xff] }
0x16d8   :  { %v2639_v55 = vmul.f32 %v4512_v52, %v2632_v53  ;;  %v5779_v52 = vpack.c.bf16 %v1122_v51, %v1121_v50  ;;  %v4519_v53 = vld [vmem:[#allocation39] ss:$0 sm:$0xff]  ;;  %v5788_v41 = vpack.c.bf16 %v1100_v39, %v1099_v38 }
0x16da   :  { %v2646_v56 = vadd.f32 %v4513_v54, %v2639_v55 }
0x16dc   :  { %v4514_v57 = vmul.f32 -1.442695, %v2646_v56 }
0x16de   :  { %6174 = vpow2.f32 %v4514_v57 }
0x16e8   :  { %v6175_v59 = vpop.eup %6174 }
0x16e9   :  { %v2650_v60 = vadd.f32 1.0, %v6175_v59 }
0x16eb   :  { %6176 = vrcp.f32 %v2650_v60 }
0x16f5   :  { %v6177_v62 = vpop.eup %6176 }
0x16f6   :  { %v2653_v63 = vmul.f32 %v6177_v62, %v2646_v56 }
0x16f8   :  { %5198 = vmatmul.mubr.msk.f32.vlgmr.msra.gmra.mrb[10].mxu1 %vm1470_vm1, %v2653_v63 }
0x16f9   :  { %5208 = vmatprep.mubr.msk.f32.mxu1 %vm7493_vm0, %v7494_v1  ;;  %5753 = vmatpush3.bf16.msra.mxu1 %v5752_v17 }
0x16fa   :  { %5754 = vmatprep.subr.bf16.mxu1 %v7492_v0 }
0x16fd   :  { %5756 = vmatpush3.bf16.msra.mxu1 %v5755_v20  ;;  %v4522_v20 = vld [vmem:[#allocation30] ss:$0 sm:$0xff] }
0x16fe   :  { %5757 = vmatprep.subr.bf16.mxu1 %v7492_v0 }
0x17cb   :  { %v2729_v4 = vpop.f32.mrb[10].mxu1 }
0x17cc   :  { %v2730_v5 = vadd.f32 %v4515_v3, %v2729_v4  ;;  %v5199_v7 = vpop.f32.mrb[11].mxu1 }
0x17ce   :  { %v8491_v8 = vadd.f32 %v2730_v5, %v8464_v2 }
0x17d0   :  { %v2734_v9 = vsel %vm1470_vm1, %v8491_v8, 0.0 }
0x17d1   :  { %2735 = vadd.xlane.f32.xlu0 %v2734_v9  ;;  %v1094_v9 = vld [vmem:[%s9013_s5] sm:$0xff] }
0x185e   :  { %v2736_v11 = vpop.xlane.xlu0 %2735 }
0x185f   :  { %v2737_v58 = vmul.f32 0.03125, %v2736_v11  ;;  %v1095_v11 = vld [vmem:[%s9013_s5 + $0x8] sm:$0xff] }
0x1861   :  { %v2738_v12 = vsub.f32 %v8491_v8, %v2737_v58  ;;  %v1096_v58 = vld [vmem:[%s9013_s5 + $0x10] sm:$0xff] }
0x1863   :  { %v2739_v14 = vmul.f32 %v2738_v12, %v2738_v12 }
0x1865   :  { %v2740_v15 = vsel %vm1470_vm1, %v2739_v14, 0.0 }
0x1866   :  { %2741 = vadd.xlane.f32.xlu1 %v2740_v15 }
0x18f3   :  { %v2742_v21 = vpop.xlane.xlu1 %2741 }
0x18f4   :  { %v2743_v22 = vmul.f32 0.03125, %v2742_v21 }
0x18f6   :  { %v2744_v10 = vadd.f32 1e-05, %v2743_v22 }
0x18f8   :  { %6178 = vrsqrt.f32 %v2744_v10 }
0x1902   :  { %v6179_v23 = vpop.eup %6178 }
0x1903   :  { %v2746_v25 = vmul.f32 %v6179_v23, %v2738_v12  ;;  %v5782_v12 = vpack.c.bf16 %v1095_v11, %v1094_v9 }
0x1905   :  { %v2753_v29 = vmul.f32 %v4517_v24, %v2746_v25  ;;  %5783 = vmatpush3.bf16.msra.mxu0 %v5782_v12 }
0x1906   :  { %5784 = vmatprep.subr.bf16.mxu0 %v7492_v0 }
0x1907   :  { %v2760_v31 = vadd.f32 %v4518_v28, %v2753_v29  ;;  %v4525_v28 = vld [vmem:[#allocation27] ss:$0 sm:$0xff] }
0x1909   :  { %5209 = vmatmul.mubr.msk.f32.vlgmr.msra.gmra.mrb[12].mxu1 %vm1470_vm1, %v2760_v31 }
0x190a   :  { %5759 = vmatpush3.bf16.msra.mxu1 %v5758_v30  ;;  %5243 = vmatprep.mubr.msk.f32.mxu1 %vm7493_vm0, %v7494_v1 }
0x190b   :  { %5760 = vmatprep.subr.bf16.mxu1 %v7492_v0 }
0x190e   :  { %5762 = vmatpush3.bf16.msra.mxu1 %v5761_v34 }
0x190f   :  { %5763 = vmatprep.subr.bf16.mxu1 %v7492_v0 }
0x1912   :  { %5765 = vmatpush3.bf16.msra.mxu1 %v5764_v37 }
0x1913   :  { %5766 = vmatprep.subr.bf16.mxu1 %v7492_v0 }
0x1916   :  { %5768 = vmatpush3.bf16.msra.mxu1 %v5767_v40  ;;  %v1101_v40 = vld [vmem:[%s9014_s20 + $0x10] sm:$0xff] }
0x1917   :  { %5769 = vmatprep.subr.bf16.mxu1 %v7492_v0 }
0x191a   :  { %5771 = vmatpush3.bf16.msra.mxu1 %v5770_v43  ;;  %v5791_v43 = vpack.c.bf16 %v1102_v42, %v1101_v40 }
0x191b   :  { %5772 = vmatprep.subr.bf16.mxu1 %v7492_v0 }
0x191e   :  { %5774 = vmatpush3.bf16.msra.mxu1 %v5773_v46  ;;  %v4526_v46 = vld [vmem:[#allocation34] ss:$0 sm:$0xff] }
0x191f   :  { %5775 = vmatprep.subr.bf16.mxu1 %v7492_v0 }
0x1922   :  { %5777 = vmatpush3.bf16.msra.mxu1 %v5776_v49 }
0x1923   :  { %5778 = vmatprep.subr.bf16.mxu1 %v7492_v0 }
0x1926   :  { %5780 = vmatpush3.bf16.msra.mxu1 %v5779_v52 }
0x1927   :  { %5823 = vmatprep.subr.bf16.mxu1 %v7492_v0 }
0x1929   :  { %5244 = vmatmul.mubr.f32.vlgmr.msra.gmra.mrb[14].mxu1 %v8291_v61 }
0x192a   :  { %5330 = vmatprep.mubr.msk.f32.mxu1 %vm7493_vm0, %v7494_v1 }
0x19dc   :  { %v2836_v54 = vpop.f32.mrb[12].mxu1 }
0x19dd   :  { %v2837_v55 = vadd.f32 %v4519_v53, %v2836_v54  ;;  %v5210_v56 = vpop.f32.mrb[13].mxu1  ;;  %v1172_v54 = vld [vmem:[%s9015_s13] sm:$0xff] }
0x19df   :  { %v8534_v57 = vadd.f32 %v2837_v55, %v8491_v8  ;;  %v1097_v8 = vld [vmem:[%s9013_s5 + $0x18] sm:$0xff]  ;;  %v1173_v55 = vld [vmem:[%s9015_s13 + $0x8] sm:$0xff] }
0x19e0   :  { %v5785_v14 = vpack.c.bf16 %v1097_v8, %v1096_v58 }
0x19e1   :  { %v2841_v59 = vsel %vm1470_vm1, %v8534_v57, 0.0 }
0x19e2   :  { %2842 = vadd.xlane.f32.xlu0 %v2841_v59  ;;  %5786 = vmatpush3.bf16.msra.mxu0 %v5785_v14  ;;  %v5794_v59 = vpack.c.bf16 %v1173_v55, %v1172_v54  ;;  %v1205_v14 = vld [vmem:[%s9016_s28 + $0x10] sm:$0xff]  ;;  %v1193_v54 = vld [vmem:[%s9017_s1 + $0x38] sm:$0xff] }
0x19e3   :  { %5787 = vmatprep.subr.bf16.mxu0 %v7492_v0 }
0x19fc   :  { %v2941_v60 = vpop.f32.mrb[14].mxu1 }
0x19fd   :  { %v5245_v62 = vpop.f32.mrb[15].mxu1 }
0x19fe   :  { %v1174_v62 = vld [vmem:[%s9015_s13 + $0x10] sm:$0xff] }
0x1a6f   :  { %v2843_v63 = vpop.xlane.xlu0 %2842 }
0x1a70   :  { %v2844_v3 = vmul.f32 0.03125, %v2843_v63  ;;  %v1175_v63 = vld [vmem:[%s9015_s13 + $0x18] sm:$0xff] }
0x1a72   :  { %v2845_v4 = vsub.f32 %v8534_v57, %v2844_v3  ;;  %v5797_v3 = vpack.c.bf16 %v1175_v63, %v1174_v62  ;;  %v4533_v63 = vld [vmem:[#allocation55] ss:$0 sm:$0xff] }
0x1a74   :  { %v2846_v5 = vmul.f32 %v2845_v4, %v2845_v4 }
0x1a76   :  { %v2847_v7 = vsel %vm1470_vm1, %v2846_v5, 0.0  ;;  %v1203_v5 = vld [vmem:[%s9016_s28] sm:$0xff] }
0x1a77   :  { %2848 = vadd.xlane.f32.xlu1 %v2847_v7  ;;  %v1204_v7 = vld [vmem:[%s9016_s28 + $0x8] sm:$0xff] }
0x1a78   :  { %v5800_v12 = vpack.c.bf16 %v1204_v7, %v1203_v5 }
0x1b04   :  { %v2849_v15 = vpop.xlane.xlu1 %2848 }
0x1b05   :  { %v2850_v16 = vmul.f32 0.03125, %v2849_v15  ;;  %v1206_v15 = vld [vmem:[%s9016_s28 + $0x18] sm:$0xff] }
0x1b07   :  { %v2851_v13 = vadd.f32 1e-05, %v2850_v16  ;;  %v5803_v16 = vpack.c.bf16 %v1206_v15, %v1205_v14  ;;  %v4537_v15 = vld [vmem:[#allocation51] ss:$0 sm:$0xff] }
0x1b09   :  { %6180 = vrsqrt.f32 %v2851_v13  ;;  %v1207_v13 = vld [vmem:[%s9016_s28 + $0x20] sm:$0xff] }
0x1b13   :  { %v6181_v17 = vpop.eup %6180 }
0x1b14   :  { %v2853_v19 = vmul.f32 %v6181_v17, %v2845_v4  ;;  %v4529_v4 = vld [vmem:[#allocation28] ss:$0 sm:$0xff]  ;;  %v1208_v17 = vld [vmem:[%s9016_s28 + $0x28] sm:$0xff] }
0x1b16   :  { %v2860_v21 = vmul.f32 %v4521_v18, %v2853_v19  ;;  %v5806_v18 = vpack.c.bf16 %v1208_v17, %v1207_v13  ;;  %v1210_v19 = vld [vmem:[%s9016_s28 + $0x38] sm:$0xff] }
0x1b18   :  { %v2867_v22 = vadd.f32 %v4522_v20, %v2860_v21  ;;  %v1211_v21 = vld [vmem:[%s9016_s28 + $0x40] sm:$0xff] }
0x1b1a   :  { %v4523_v10 = vmul.f32 -1.442695, %v2867_v22 }
0x1b1c   :  { %6182 = vpow2.f32 %v4523_v10 }
0x1b26   :  { %v6183_v23 = vpop.eup %6182 }
0x1b27   :  { %v2871_v24 = vadd.f32 1.0, %v6183_v23  ;;  %v1213_v23 = vld [vmem:[%s9016_s28 + $0x50] sm:$0xff] }
0x1b29   :  { %6184 = vrcp.f32 %v2871_v24  ;;  %v1214_v24 = vld [vmem:[%s9016_s28 + $0x58] sm:$0xff] }
0x1b33   :  { %v6185_v25 = vpop.eup %6184 }
0x1b34   :  { %v2874_v26 = vmul.f32 %v6185_v25, %v2867_v22  ;;  %v1212_v22 = vld [vmem:[%s9016_s28 + $0x48] sm:$0xff]  ;;  %v5815_v25 = vpack.c.bf16 %v1214_v24, %v1213_v23  ;;  %v1197_v24 = vld [vmem:[%s9018_s30 + $0x10] sm:$0xff] }
0x1b35   :  { %v5812_v10 = vpack.c.bf16 %v1212_v22, %v1211_v21  ;;  %v1196_v23 = vld [vmem:[%s9018_s30 + $0x8] sm:$0xff] }
0x1b36   :  { %5255 = vmatmul.mubr.msk.f32.vlgmr.msra.gmra.mrb[18].mxu0 %vm1470_vm1, %v2874_v26  ;;  %v1215_v26 = vld [vmem:[%s9016_s28 + $0x60] sm:$0xff] }
0x1b37   :  { %5265 = vmatprep.mubr.msk.f32.mxu0 %vm7493_vm0, %v7494_v1  ;;  %5789 = vmatpush3.bf16.msra.mxu0 %v5788_v41 }
0x1b38   :  { %5790 = vmatprep.subr.bf16.mxu0 %v7492_v0 }
0x1b3b   :  { %5792 = vmatpush3.bf16.msra.mxu0 %v5791_v43 }
0x1b3c   :  { %5793 = vmatprep.subr.bf16.mxu0 %v7492_v0 }
0x1c09   :  { %v3014_v27 = vpop.f32.mrb[18].mxu0 }
0x1c0a   :  { %v3015_v29 = vadd.f32 %v3014_v27, %v2941_v60  ;;  %v5256_v30 = vpop.f32.mrb[19].mxu0  ;;  %v1216_v27 = vld [vmem:[%s9016_s28 + $0x68] sm:$0xff] }
0x1c0b   :  { %v1218_v30 = vld [vmem:[%s9016_s28 + $0x78] sm:$0xff] }
0x1c0c   :  { %v3024_v31 = vadd.f32 %v4525_v28, %v3015_v29  ;;  %v5818_v28 = vpack.c.bf16 %v1216_v27, %v1215_v26  ;;  %v1217_v29 = vld [vmem:[%s9016_s28 + $0x70] sm:$0xff]  ;;  %v1198_v26 = vld [vmem:[%s9018_s30 + $0x18] sm:$0xff] }
0x1c0d   :  { %v5839_v27 = vpack.c.bf16 %v1198_v26, %v1197_v24 }
0x1c0e   :  { %v3025_v32 = vsel %vm1470_vm1, %v3024_v31, 0.0 }
0x1c0f   :  { %3026 = vadd.xlane.f32.xlu0 %v3025_v32  ;;  %v4531_v32 = vld [vmem:[#allocation48] ss:$0 sm:$0xff] }
0x1c25   :  { %3219 = vrot.lane.b32.xlu0 %v8464_v2, %s7495_s26 }
0x1c29   :  { %3786 = vrot.lane.b32.xlu0 %v8387_v6, %s7496_s3 }
0x1c9c   :  { %v3027_v33 = vpop.xlane.xlu0 %3026 }
0x1c9d   :  { %v3028_v34 = vmul.f32 0.03125, %v3027_v33 }
0x1c9f   :  { %v3029_v35 = vsub.f32 %v3024_v31, %v3028_v34  ;;  %v5821_v31 = vpack.c.bf16 %v1218_v30, %v1217_v29 }
0x1ca1   :  { %v3030_v36 = vmul.f32 %v3029_v35, %v3029_v35 }
0x1ca3   :  { %v3031_v37 = vsel %vm1470_vm1, %v3030_v36, 0.0  ;;  %v3220_v36 = vpop.permute.xlu0 %3219 }
0x1ca4   :  { %3032 = vadd.xlane.f32.xlu1 %v3031_v37 }
0x1d31   :  { %v3033_v6 = vpop.xlane.xlu1 %3032 }
0x1d32   :  { %v3034_v2 = vmul.f32 0.03125, %v3033_v6 }
0x1d34   :  { %v3035_v44 = vadd.f32 1e-05, %v3034_v2 }
0x1d36   :  { %6186 = vrsqrt.f32 %v3035_v44  ;;  %v1186_v44 = vld [vmem:[%s9017_s1] sm:$0xff] }
0x1d40   :  { %v6187_v45 = vpop.eup %6186 }
0x1d41   :  { %v3037_v47 = vmul.f32 %v6187_v45, %v3029_v35  ;;  %v1187_v45 = vld [vmem:[%s9017_s1 + $0x8] sm:$0xff] }
0x1d43   :  { %v3044_v49 = vmul.f32 %v4526_v46, %v3037_v47  ;;  %v1188_v46 = vld [vmem:[%s9017_s1 + $0x10] sm:$0xff]  ;;  %v5824_v47 = vpack.c.bf16 %v1187_v45, %v1186_v44  ;;  %v1180_v45 = vld [vmem:[%s9019_s6 + $0x18] sm:$0xff] }
0x1d44   :  { %v1179_v44 = vld [vmem:[%s9019_s6 + $0x10] sm:$0xff] }
0x1d45   :  { %v3051_v50 = vadd.f32 %v4527_v48, %v3044_v49  ;;  %v1189_v48 = vld [vmem:[%s9017_s1 + $0x18] sm:$0xff]  ;;  %5825 = vmatpush3.bf16.msra.mxu1 %v5824_v47  ;;  %v1181_v47 = vld [vmem:[%s9019_s6 + $0x20] sm:$0xff] }
0x1d46   :  { %v5827_v49 = vpack.c.bf16 %v1189_v48, %v1188_v46  ;;  %5826 = vmatprep.subr.bf16.mxu1 %v7492_v0  ;;  %v5845_v46 = vpack.c.bf16 %v1180_v45, %v1179_v44  ;;  %v1182_v48 = vld [vmem:[%s9019_s6 + $0x28] sm:$0xff] }
0x1d47   :  { %v4528_v51 = vmul.f32 -1.442695, %v3051_v50 }
0x1d49   :  { %6188 = vpow2.f32 %v4528_v51  ;;  %v1191_v51 = vld [vmem:[%s9017_s1 + $0x28] sm:$0xff]  ;;  %5828 = vmatpush3.bf16.msra.mxu1 %v5827_v49  ;;  %v5848_v49 = vpack.c.bf16 %v1182_v48, %v1181_v47 }
0x1d4a   :  { %5829 = vmatprep.subr.bf16.mxu1 %v7492_v0 }
0x1d53   :  { %v6189_v52 = vpop.eup %6188 }
0x1d54   :  { %v3055_v53 = vadd.f32 1.0, %v6189_v52 }
0x1d56   :  { %6190 = vrcp.f32 %v3055_v53  ;;  %v1192_v53 = vld [vmem:[%s9017_s1 + $0x30] sm:$0xff] }
0x1d57   :  { %v5833_v55 = vpack.c.bf16 %v1193_v54, %v1192_v53  ;;  %v1282_v53 = vld [vmem:[%s7975_s27] sm:$0xff]  ;;  %v1283_v54 = vld [vmem:[%s7975_s27 + $0x8] sm:$0xff] }
0x1d60   :  { %v6191_v56 = vpop.eup %6190 }
0x1d61   :  { %v3058_v60 = vmul.f32 %v6191_v56, %v3051_v50  ;;  %v1190_v50 = vld [vmem:[%s9017_s1 + $0x20] sm:$0xff] }
0x1d62   :  { %v5830_v52 = vpack.c.bf16 %v1191_v51, %v1190_v50  ;;  %v1183_v50 = vld [vmem:[%s9019_s6 + $0x30] sm:$0xff]  ;;  %v1184_v51 = vld [vmem:[%s9019_s6 + $0x38] sm:$0xff] }
0x1d63   :  { %5266 = vmatmul.mubr.msk.f32.vlgmr.msra.gmra.mrb[20].mxu0 %vm1470_vm1, %v3058_v60 }
0x1d64   :  { %5795 = vmatpush3.bf16.msra.mxu0 %v5794_v59  ;;  %5276 = vmatprep.mubr.msk.f32.mxu0 %vm7493_vm0, %v7494_v1 }
0x1d65   :  { %5796 = vmatprep.subr.bf16.mxu0 %v7492_v0  ;;  %5831 = vmatpush3.bf16.msra.mxu1 %v5830_v52  ;;  %v5851_v52 = vpack.c.bf16 %v1184_v51, %v1183_v50  ;;  %v4547_v50 = vld [vmem:[#allocation46] ss:$0 sm:$0xff] }
0x1d66   :  { %5832 = vmatprep.subr.bf16.mxu1 %v7492_v0 }
0x1d68   :  { %5798 = vmatpush3.bf16.msra.mxu0 %v5797_v3 }
0x1d69   :  { %5799 = vmatprep.subr.bf16.mxu0 %v7492_v0  ;;  %5834 = vmatpush3.bf16.msra.mxu1 %v5833_v55  ;;  %v5866_v55 = vpack.c.bf16 %v1283_v54, %v1282_v53 }
0x1d6a   :  { %5835 = vmatprep.subr.bf16.mxu1 %v7492_v0 }
0x1e36   :  { %v3134_v9 = vpop.f32.mrb[20].mxu0 }
0x1e37   :  { %v3135_v11 = vadd.f32 %v4529_v4, %v3134_v9  ;;  %v5267_v58 = vpop.f32.mrb[21].mxu0  ;;  %v4534_v4 = vld [vmem:[#allocation54] ss:$0 sm:$0xff] }
0x1e39   :  { %v3138_v8 = vadd.f32 %v3135_v11, %v8534_v57  ;;  %v1209_v57 = vld [vmem:[%s9016_s28 + $0x30] sm:$0xff] }
0x1e3a   :  { %v5809_v20 = vpack.c.bf16 %v1210_v19, %v1209_v57 }
0x1e3b   :  { %5277 = vmatmul.mubr.msk.f32.vlgmr.msra.gmra.mrb[22].mxu0 %vm1470_vm1, %v3138_v8 }
0x1e3c   :  { %5801 = vmatpush3.bf16.msra.mxu0 %v5800_v12  ;;  %5311 = vmatprep.mubr.msk.f32.mxu0 %vm7493_vm0, %v7494_v1 }
0x1e3d   :  { %5802 = vmatprep.subr.bf16.mxu0 %v7492_v0 }
0x1e40   :  { %5804 = vmatpush3.bf16.msra.mxu0 %v5803_v16 }
0x1e41   :  { %5805 = vmatprep.subr.bf16.mxu0 %v7492_v0 }
0x1e44   :  { %5807 = vmatpush3.bf16.msra.mxu0 %v5806_v18 }
0x1e45   :  { %5808 = vmatprep.subr.bf16.mxu0 %v7492_v0 }
0x1e48   :  { %5810 = vmatpush3.bf16.msra.mxu0 %v5809_v20 }
0x1e49   :  { %5811 = vmatprep.subr.bf16.mxu0 %v7492_v0 }
0x1e4c   :  { %5813 = vmatpush3.bf16.msra.mxu0 %v5812_v10  ;;  %v1195_v10 = vld [vmem:[%s9018_s30] sm:$0xff] }
0x1e4d   :  { %5814 = vmatprep.subr.bf16.mxu0 %v7492_v0 }
0x1e50   :  { %5816 = vmatpush3.bf16.msra.mxu0 %v5815_v25  ;;  %v5836_v25 = vpack.c.bf16 %v1196_v23, %v1195_v10 }
0x1e51   :  { %5817 = vmatprep.subr.bf16.mxu0 %v7492_v0 }
0x1e54   :  { %5819 = vmatpush3.bf16.msra.mxu0 %v5818_v28 }
0x1e55   :  { %5820 = vmatprep.subr.bf16.mxu0 %v7492_v0 }
0x1e58   :  { %5822 = vmatpush3.bf16.msra.mxu0 %v5821_v31 }
0x1e59   :  { %5853 = vmatprep.subr.bf16.mxu0 %v7492_v0 }
0x1e5b   :  { %5312 = vmatmul.mubr.f32.vlgmr.msra.gmra.mrb[24].mxu0 %v8291_v61 }
0x1e5c   :  { %5371 = vmatprep.mubr.msk.f32.mxu0 %vm7493_vm0, %v7494_v1 }
0x1f0e   :  { %v3214_v33 = vpop.f32.mrb[22].mxu0 }
0x1f0f   :  { %v3215_v34 = vadd.f32 %v4531_v32, %v3214_v33  ;;  %v5278_v35 = vpop.f32.mrb[23].mxu0  ;;  %v4538_v32 = vld [vmem:[#allocation58] ss:$0 sm:$0xff] }
0x1f11   :  { %v8600_v37 = vsel %vm1470_vm1, %v3215_v34, %v3220_v36  ;;  %v4539_v34 = vld [vmem:[#allocation57] ss:$0 sm:$0xff] }
0x1f12   :  { %v3223_v38 = vsel %vm1544_vm2, %v8600_v37, 0.0 }
0x1f13   :  { %3224 = vadd.xlane.f32.xlu1 %v3223_v38 }
0x1f2e   :  { %v3323_v39 = vpop.f32.mrb[24].mxu0 }
0x1f2f   :  { %v5313_v40 = vpop.f32.mrb[25].mxu0 }
0x1fa0   :  { %v3225_v41 = vpop.xlane.xlu1 %3224 }
0x1fa1   :  { %v3226_v42 = vmul.f32 0.015625, %v3225_v41  ;;  %v1177_v41 = vld [vmem:[%s9019_s6] sm:$0xff] }
0x1fa3   :  { %v3227_v43 = vsub.f32 %v8600_v37, %v3226_v42  ;;  %v1178_v42 = vld [vmem:[%s9019_s6 + $0x8] sm:$0xff] }
0x1fa5   :  { %v3228_v6 = vmul.f32 %v3227_v43, %v3227_v43 }
0x1fa7   :  { %v3229_v2 = vsel %vm1544_vm2, %v3228_v6, 0.0  ;;  %v5842_v6 = vpack.c.bf16 %v1178_v42, %v1177_v41  ;;  %v4545_v41 = vld [vmem:[#allocation45] ss:$0 sm:$0xff] }
0x1fa8   :  { %3230 = vadd.xlane.f32.xlu1 %v3229_v2 }
0x2035   :  { %v3231_v56 = vpop.xlane.xlu1 %3230 }
0x2036   :  { %v3232_v59 = vmul.f32 0.015625, %v3231_v56  ;;  %v1284_v56 = vld [vmem:[%s7975_s27 + $0x10] sm:$0xff] }
0x2038   :  { %v3233_v60 = vadd.f32 1e-05, %v3232_v59  ;;  %v1285_v59 = vld [vmem:[%s7975_s27 + $0x18] sm:$0xff] }
0x203a   :  { %6192 = vrsqrt.f32 %v3233_v60  ;;  %v5869_v60 = vpack.c.bf16 %v1285_v59, %v1284_v56 }
0x2044   :  { %v6193_v62 = vpop.eup %6192 }
0x2045   :  { %v3235_v3 = vmul.f32 %v6193_v62, %v3227_v43  ;;  %v1286_v62 = vld [vmem:[%s7975_s27 + $0x20] sm:$0xff] }
0x2047   :  { %v3242_v5 = vmul.f32 %v4533_v63, %v3235_v3  ;;  %v1287_v63 = vld [vmem:[%s7975_s27 + $0x28] sm:$0xff] }
0x2048   :  { %v5872_v3 = vpack.c.bf16 %v1287_v63, %v1286_v62  ;;  %v3787_v62 = vpop.permute.xlu0 %3786 }
0x2049   :  { %v3249_v7 = vadd.f32 %v4534_v4, %v3242_v5  ;;  %v1288_v4 = vld [vmem:[%s7975_s27 + $0x30] sm:$0xff] }
0x204b   :  { %v4535_v9 = vmul.f32 -1.442695, %v3249_v7 }
0x204d   :  { %6194 = vpow2.f32 %v4535_v9  ;;  %v1291_v9 = vld [vmem:[%s7975_s27 + $0x48] sm:$0xff] }
0x2057   :  { %v6195_v11 = vpop.eup %6194 }
0x2058   :  { %v3253_v58 = vadd.f32 1.0, %v6195_v11 }
0x205a   :  { %6196 = vrcp.f32 %v3253_v58  ;;  %v1292_v58 = vld [vmem:[%s7975_s27 + $0x50] sm:$0xff] }
0x2064   :  { %v6197_v12 = vpop.eup %6196 }
0x2065   :  { %v3256_v8 = vmul.f32 %v6197_v12, %v3249_v7  ;;  %v1290_v7 = vld [vmem:[%s7975_s27 + $0x40] sm:$0xff]  ;;  %v1293_v12 = vld [vmem:[%s7975_s27 + $0x58] sm:$0xff] }
0x2066   :  { %v5878_v11 = vpack.c.bf16 %v1291_v9, %v1290_v7  ;;  %v1253_v7 = vld [vmem:[%s9022_s4] sm:$0xff]  ;;  %v1254_v9 = vld [vmem:[%s9022_s4 + $0x8] sm:$0xff] }
0x2067   :  { %5331 = vmatmul.mubr.msk.f32.vlgmr.msra.gmra.mrb[16].mxu1 %vm1544_vm2, %v3256_v8  ;;  %v5881_v8 = vpack.c.bf16 %v1293_v12, %v1292_v58  ;;  %v5890_v58 = vpack.c.bf16 %v1254_v9, %v1253_v7  ;;  %v1256_v12 = vld [vmem:[%s9022_s4 + $0x18] sm:$0xff] }
0x2068   :  { %5341 = vmatprep.mubr.msk.f32.mxu1 %vm7493_vm0, %v7494_v1  ;;  %5837 = vmatpush3.bf16.msra.mxu1 %v5836_v25 }
0x2069   :  { %5838 = vmatprep.subr.bf16.mxu1 %v7492_v0 }
0x206c   :  { %5840 = vmatpush3.bf16.msra.mxu1 %v5839_v27 }
0x206d   :  { %5841 = vmatprep.subr.bf16.mxu1 %v7492_v0 }
0x213a   :  { %v3396_v14 = vpop.f32.mrb[16].mxu1 }
0x213b   :  { %v3397_v16 = vadd.f32 %v3396_v14, %v3323_v39  ;;  %v5332_v13 = vpop.f32.mrb[17].mxu1  ;;  %v1294_v14 = vld [vmem:[%s7975_s27 + $0x60] sm:$0xff] }
0x213c   :  { %v1296_v13 = vld [vmem:[%s7975_s27 + $0x70] sm:$0xff] }
0x213d   :  { %v3406_v17 = vadd.f32 %v4537_v15, %v3397_v16  ;;  %v1295_v15 = vld [vmem:[%s7975_s27 + $0x68] sm:$0xff] }
0x213e   :  { %v5884_v16 = vpack.c.bf16 %v1295_v15, %v1294_v14  ;;  %v1257_v14 = vld [vmem:[%s9022_s4 + $0x20] sm:$0xff]  ;;  %v1258_v15 = vld [vmem:[%s9022_s4 + $0x28] sm:$0xff] }
0x213f   :  { %v3407_v18 = vsel %vm1470_vm1, %v3406_v17, 0.0 }
0x2140   :  { %3408 = vadd.xlane.f32.xlu1 %v3407_v18 }
0x21cd   :  { %v3409_v57 = vpop.xlane.xlu1 %3408 }
0x21ce   :  { %v3410_v19 = vmul.f32 0.03125, %v3409_v57  ;;  %v4543_v57 = vld [vmem:[#allocation49] ss:$0 sm:$0xff] }
0x21d0   :  { %v3411_v20 = vsub.f32 %v3406_v17, %v3410_v19  ;;  %v1297_v17 = vld [vmem:[%s7975_s27 + $0x78] sm:$0xff]  ;;  %v4541_v19 = vld [vmem:[#allocation52] ss:$0 sm:$0xff] }
0x21d1   :  { %v5887_v18 = vpack.c.bf16 %v1297_v17, %v1296_v13  ;;  %v1259_v13 = vld [vmem:[%s9022_s4 + $0x30] sm:$0xff]  ;;  %v1260_v17 = vld [vmem:[%s9022_s4 + $0x38] sm:$0xff] }
0x21d2   :  { %v3412_v21 = vmul.f32 %v3411_v20, %v3411_v20 }
0x21d4   :  { %v3413_v22 = vsel %vm1470_vm1, %v3412_v21, 0.0 }
0x21d5   :  { %3414 = vadd.xlane.f32.xlu1 %v3413_v22 }
0x2262   :  { %v3415_v28 = vpop.xlane.xlu1 %3414 }
0x2263   :  { %v3416_v29 = vmul.f32 0.03125, %v3415_v28 }
0x2265   :  { %v3417_v30 = vadd.f32 1e-05, %v3416_v29 }
0x2267   :  { %6198 = vrsqrt.f32 %v3417_v30  ;;  %v1167_v30 = vld [vmem:[%s9020_s2] sm:$0xff] }
0x2271   :  { %v6199_v31 = vpop.eup %6198 }
0x2272   :  { %v3419_v33 = vmul.f32 %v6199_v31, %v3411_v20  ;;  %v5973_v20 = vadd.f32 %v4543_v57, %v4541_v19  ;;  %v1168_v31 = vld [vmem:[%s9020_s2 + $0x8] sm:$0xff]  ;;  %v1261_v57 = vld [vmem:[%s9022_s4 + $0x40] sm:$0xff] }
0x2273   :  { %v1262_v19 = vld [vmem:[%s9022_s4 + $0x48] sm:$0xff] }
0x2274   :  { %v3426_v35 = vmul.f32 %v4538_v32, %v3419_v33  ;;  %v5854_v32 = vpack.c.bf16 %v1168_v31, %v1167_v30  ;;  %v1169_v33 = vld [vmem:[%s9020_s2 + $0x10] sm:$0xff] }
0x2276   :  { %v3433_v36 = vadd.f32 %v4539_v34, %v3426_v35  ;;  %5855 = vmatpush3.bf16.msra.mxu0 %v5854_v32  ;;  %v1170_v34 = vld [vmem:[%s9020_s2 + $0x18] sm:$0xff] }
0x2277   :  { %5856 = vmatprep.subr.bf16.mxu0 %v7492_v0  ;;  %v5857_v35 = vpack.c.bf16 %v1170_v34, %v1169_v33  ;;  %v4551_v33 = vld [vmem:[#allocation72] ss:$0 sm:$0xff] }
0x2278   :  { %v4540_v38 = vmul.f32 -1.442695, %v3433_v36 }
0x227a   :  { %6200 = vpow2.f32 %v4540_v38  ;;  %5858 = vmatpush3.bf16.msra.mxu0 %v5857_v35  ;;  %v4552_v35 = vld [vmem:[#allocation70] ss:$0 sm:$0xff] }
0x227b   :  { %5859 = vmatprep.subr.bf16.mxu0 %v7492_v0 }
0x2284   :  { %v6201_v39 = vpop.eup %6200 }
0x2285   :  { %v3437_v40 = vadd.f32 1.0, %v6201_v39 }
0x2287   :  { %6202 = vrcp.f32 %v3437_v40 }
0x2291   :  { %v6203_v43 = vpop.eup %6202 }
0x2292   :  { %v3440_v2 = vmul.f32 %v6203_v43, %v3433_v36 }
0x2294   :  { %5342 = vmatmul.mubr.msk.f32.vlgmr.msra.gmra.mrb[18].mxu1 %vm1470_vm1, %v3440_v2  ;;  %v4546_v2 = vld [vmem:[#allocation43] ss:$0 sm:$0xff] }
0x2295   :  { %5843 = vmatpush3.bf16.msra.mxu1 %v5842_v6  ;;  %5360 = vmatprep.mubr.msk.f32.mxu1 %vm7493_vm0, %v7494_v1 }
0x2296   :  { %5844 = vmatprep.subr.bf16.mxu1 %v7492_v0 }
0x2299   :  { %5846 = vmatpush3.bf16.msra.mxu1 %v5845_v46 }
0x229a   :  { %5847 = vmatprep.subr.bf16.mxu1 %v7492_v0 }
0x229d   :  { %5849 = vmatpush3.bf16.msra.mxu1 %v5848_v49 }
0x229e   :  { %5850 = vmatprep.subr.bf16.mxu1 %v7492_v0 }
0x22a1   :  { %5852 = vmatpush3.bf16.msra.mxu1 %v5851_v52 }
0x22a2   :  { %5865 = vmatprep.subr.bf16.mxu1 %v7492_v0 }
0x22a4   :  { %5361 = vmatmul.mubr.msk.f32.vlgmr.msra.gmra.mrb[18].mxu1 %vm1544_vm2, %v8600_v37  ;;  %v1289_v37 = vld [vmem:[%s7975_s27 + $0x38] sm:$0xff]  ;;  %s9021_s27 = sld [smem:[#allocation170_spill]] }
0x22a5   :  { %5867 = vmatpush3.bf16.msra.mxu1 %v5866_v55  ;;  %5417 = vmatprep.mubr.msk.f32.mxu1 %vm7493_vm0, %v7494_v1  ;;  %v5875_v5 = vpack.c.bf16 %v1289_v37, %v1288_v4  ;;  %v4549_v55 = vld [vmem:[#allocation64] ss:$0 sm:$0xff] }
0x22a6   :  { %5868 = vmatprep.subr.bf16.mxu1 %v7492_v0 }
0x22a9   :  { %5870 = vmatpush3.bf16.msra.mxu1 %v5869_v60 }
0x22aa   :  { %5871 = vmatprep.subr.bf16.mxu1 %v7492_v0  ;;  %v1231_v43 = vld [vmem:[%s9021_s27] sm:$0xff]  ;;  %v1232_v6 = vld [vmem:[%s9021_s27 + $0x8] sm:$0xff]  ;;  %v1233_v47 = vld [vmem:[%s9021_s27 + $0x10] sm:$0xff] }
0x22ab   :  { %v5860_v45 = vpack.c.bf16 %v1232_v6, %v1231_v43  ;;  %v1234_v48 = vld [vmem:[%s9021_s27 + $0x18] sm:$0xff] }
0x22ac   :  { %v5863_v49 = vpack.c.bf16 %v1234_v48, %v1233_v47 }
0x22ad   :  { %5873 = vmatpush3.bf16.msra.mxu1 %v5872_v3 }
0x22ae   :  { %5874 = vmatprep.subr.bf16.mxu1 %v7492_v0 }
0x22b1   :  { %5876 = vmatpush3.bf16.msra.mxu1 %v5875_v5 }
0x22b2   :  { %5877 = vmatprep.subr.bf16.mxu1 %v7492_v0 }
0x22b5   :  { %5879 = vmatpush3.bf16.msra.mxu1 %v5878_v11  ;;  %v1255_v11 = vld [vmem:[%s9022_s4 + $0x10] sm:$0xff] }
0x22b6   :  { %5880 = vmatprep.subr.bf16.mxu1 %v7492_v0 }
0x22b9   :  { %5882 = vmatpush3.bf16.msra.mxu1 %v5881_v8  ;;  %v5893_v8 = vpack.c.bf16 %v1256_v12, %v1255_v11  ;;  %v4555_v12 = vld [vmem:[#allocation75] ss:$0 sm:$0xff] }
0x22ba   :  { %5883 = vmatprep.subr.bf16.mxu1 %v7492_v0 }
0x22bd   :  { %5885 = vmatpush3.bf16.msra.mxu1 %v5884_v16  ;;  %v5896_v16 = vpack.c.bf16 %v1258_v15, %v1257_v14  ;;  %v4556_v14 = vld [vmem:[#allocation73] ss:$0 sm:$0xff] }
0x22be   :  { %5886 = vmatprep.subr.bf16.mxu1 %v7492_v0 }
0x22c1   :  { %5888 = vmatpush3.bf16.msra.mxu1 %v5887_v18  ;;  %v5899_v18 = vpack.c.bf16 %v1260_v17, %v1259_v13 }
0x22c2   :  { %5913 = vmatprep.subr.bf16.mxu1 %v7492_v0 }
0x22c4   :  { %5418 = vmatmul.mubr.f32.vlgmr.msra.gmra.mrb[20].mxu1 %v8291_v61 }
0x22c5   :  { %5471 = vmatprep.mubr.msk.f32.mxu1 %vm7493_vm0, %v7494_v1 }
0x2377   :  { %v3595_v21 = vpop.f32.mrb[18].mxu1 }
0x2378   :  { %v5974_v22 = vadd.f32 %v5973_v20, %v3595_v21  ;;  %v5362_v10 = vpop.f32.mrb[19].mxu1  ;;  %v5902_v20 = vpack.c.bf16 %v1262_v19, %v1261_v57  ;;  %v1263_v21 = vld [vmem:[%s9022_s4 + $0x50] sm:$0xff]  ;;  %v1236_v57 = vld [vmem:[%s9024_s10] sm:$0xff]  ;;  %v1237_v19 = vld [vmem:[%s9024_s10 + $0x8] sm:$0xff] }
0x237a   :  { %v3600_v23 = vsel %vm1470_vm1, %v5974_v22, 0.0 }
0x237b   :  { %3601 = vadd.xlane.f32.xlu1 %v3600_v23  ;;  %v1265_v23 = vld [vmem:[%s9022_s4 + $0x60] sm:$0xff] }
0x2397   :  { %v8676_v24 = vpop.f32.mrb[20].mxu1 }
0x2398   :  { %v5419_v25 = vpop.f32.mrb[21].mxu1 }
0x2399   :  { %v1266_v25 = vld [vmem:[%s9022_s4 + $0x68] sm:$0xff] }
0x2408   :  { %v3602_v61 = vpop.xlane.xlu1 %3601 }
0x2409   :  { %v3603_v26 = vmul.f32 0.03125, %v3602_v61  ;;  %v5908_v61 = vpack.c.bf16 %v1266_v25, %v1265_v23  ;;  %v1239_v23 = vld [vmem:[%s9024_s10 + $0x18] sm:$0xff] }
0x240b   :  { %v3604_v27 = vsub.f32 %v5974_v22, %v3603_v26  ;;  %v1267_v26 = vld [vmem:[%s9022_s4 + $0x70] sm:$0xff] }
0x240d   :  { %v3605_v28 = vmul.f32 %v3604_v27, %v3604_v27 }
0x240f   :  { %v3606_v29 = vsel %vm1470_vm1, %v3605_v28, 0.0 }
0x2410   :  { %3607 = vadd.xlane.f32.xlu1 %v3606_v29 }
0x249d   :  { %v3608_v36 = vpop.xlane.xlu1 %3607 }
0x249e   :  { %v3609_v38 = vmul.f32 0.03125, %v3608_v36 }
0x24a0   :  { %v3610_v39 = vadd.f32 1e-05, %v3609_v38 }
0x24a2   :  { %6204 = vrsqrt.f32 %v3610_v39 }
0x24ac   :  { %v6205_v40 = vpop.eup %6204 }
0x24ad   :  { %v3612_v42 = vmul.f32 %v6205_v40, %v3604_v27  ;;  %v1268_v27 = vld [vmem:[%s9022_s4 + $0x78] sm:$0xff] }
0x24ae   :  { %v5911_v28 = vpack.c.bf16 %v1268_v27, %v1267_v26  ;;  %v1241_v26 = vld [vmem:[%s9024_s10 + $0x28] sm:$0xff] }
0x24af   :  { %v3619_v44 = vmul.f32 %v4545_v41, %v3612_v42 }
0x24b1   :  { %v3626_v46 = vadd.f32 %v4546_v2, %v3619_v44  ;;  %v4554_v2 = vld [vmem:[#allocation67] ss:$0 sm:$0xff] }
0x24b3   :  { %5372 = vmatmul.mubr.msk.f32.vlgmr.msra.gmra.mrb[26].mxu0 %vm1470_vm1, %v3626_v46 }
0x24b4   :  { %5861 = vmatpush3.bf16.msra.mxu0 %v5860_v45  ;;  %5382 = vmatprep.mubr.msk.f32.mxu0 %vm7493_vm0, %v7494_v1 }
0x24b5   :  { %5862 = vmatprep.subr.bf16.mxu0 %v7492_v0 }
0x24b8   :  { %5864 = vmatpush3.bf16.msra.mxu0 %v5863_v49 }
0x24b9   :  { %5889 = vmatprep.subr.bf16.mxu0 %v7492_v0 }
0x2586   :  { %v3702_v51 = vpop.f32.mrb[26].mxu0 }
0x2587   :  { %v3703_v52 = vadd.f32 %v4547_v50, %v3702_v51  ;;  %v5373_v53 = vpop.f32.mrb[27].mxu0 }
0x2588   :  { %v1270_v53 = vld [vmem:[%s9023_s7] sm:$0xff] }
0x2589   :  { %v3706_v54 = vadd.f32 %v5974_v22, %v3703_v52  ;;  %v1264_v22 = vld [vmem:[%s9022_s4 + $0x58] sm:$0xff] }
0x258a   :  { %v5905_v10 = vpack.c.bf16 %v1264_v22, %v1263_v21  ;;  %v5926_v21 = vpack.c.bf16 %v1237_v19, %v1236_v57  ;;  %v1057_v57 = vld [vmem:[%s9026_s15 + $0x10] sm:$0xff]  ;;  %v1058_v19 = vld [vmem:[%s9026_s15 + $0x18] sm:$0xff] }
0x258b   :  { %5383 = vmatmul.mubr.msk.f32.vlgmr.msra.gmra.mrb[28].mxu0 %vm1470_vm1, %v3706_v54  ;;  %v1271_v54 = vld [vmem:[%s9023_s7 + $0x8] sm:$0xff] }
0x258c   :  { %5452 = vmatprep.mubr.msk.f32.mxu0 %vm7493_vm0, %v7494_v1  ;;  %5891 = vmatpush3.bf16.msra.mxu0 %v5890_v58 }
0x258d   :  { %5892 = vmatprep.subr.bf16.mxu0 %v7492_v0 }
0x2590   :  { %5894 = vmatpush3.bf16.msra.mxu0 %v5893_v8 }
0x2591   :  { %5895 = vmatprep.subr.bf16.mxu0 %v7492_v0 }
0x2594   :  { %5897 = vmatpush3.bf16.msra.mxu0 %v5896_v16 }
0x2595   :  { %5898 = vmatprep.subr.bf16.mxu0 %v7492_v0 }
0x2598   :  { %5900 = vmatpush3.bf16.msra.mxu0 %v5899_v18 }
0x2599   :  { %5901 = vmatprep.subr.bf16.mxu0 %v7492_v0 }
0x259c   :  { %5903 = vmatpush3.bf16.msra.mxu0 %v5902_v20 }
0x259d   :  { %5904 = vmatprep.subr.bf16.mxu0 %v7492_v0 }
0x25a0   :  { %5906 = vmatpush3.bf16.msra.mxu0 %v5905_v10  ;;  %v1238_v10 = vld [vmem:[%s9024_s10 + $0x10] sm:$0xff] }
0x25a1   :  { %5907 = vmatprep.subr.bf16.mxu0 %v7492_v0  ;;  %v5929_v25 = vpack.c.bf16 %v1239_v23, %v1238_v10  ;;  %v1061_v23 = vld [vmem:[%s9026_s15 + $0x30] sm:$0xff] }
0x25a4   :  { %5909 = vmatpush3.bf16.msra.mxu0 %v5908_v61  ;;  %v1240_v61 = vld [vmem:[%s9024_s10 + $0x20] sm:$0xff] }
0x25a5   :  { %5910 = vmatprep.subr.bf16.mxu0 %v7492_v0  ;;  %v5932_v27 = vpack.c.bf16 %v1241_v26, %v1240_v61  ;;  %v4563_v26 = vld [vmem:[#allocation63] ss:$0 sm:$0xff] }
0x25a8   :  { %5912 = vmatpush3.bf16.msra.mxu0 %v5911_v28  ;;  %v1242_v28 = vld [vmem:[%s9024_s10 + $0x30] sm:$0xff] }
0x25a9   :  { %5949 = vmatprep.subr.bf16.mxu0 %v7492_v0 }
0x265e   :  { %v3782_v56 = vpop.f32.mrb[28].mxu0 }
0x265f   :  { %v3783_v59 = vadd.f32 %v4549_v55, %v3782_v56  ;;  %v5384_v60 = vpop.f32.mrb[29].mxu0  ;;  %v1272_v55 = vld [vmem:[%s9023_s7 + $0x10] sm:$0xff]  ;;  %v1273_v56 = vld [vmem:[%s9023_s7 + $0x18] sm:$0xff] }
0x2660   :  { %v1274_v60 = vld [vmem:[%s9023_s7 + $0x20] sm:$0xff] }
0x2661   :  { %v8698_v63 = vsel %vm1544_vm2, %v3783_v59, %v3787_v62  ;;  %v5917_v59 = vpack.c.bf16 %v1273_v56, %v1272_v55  ;;  %v1275_v62 = vld [vmem:[%s9023_s7 + $0x28] sm:$0xff]  ;;  %v1225_v56 = vld [vmem:[%s9025_s11 + $0x18] sm:$0xff] }
0x2662   :  { %3790 = vadd.xlane.f32.xlu1 %v8698_v63 }
0x26ef   :  { %v3791_v3 = vpop.xlane.xlu1 %3790 }
0x26f0   :  { %v3793_v4 = vmul.f32 0.0078125, %v3791_v3  ;;  %v5920_v3 = vpack.c.bf16 %v1275_v62, %v1274_v60  ;;  %v1226_v60 = vld [vmem:[%s9025_s11 + $0x20] sm:$0xff]  ;;  %v1227_v62 = vld [vmem:[%s9025_s11 + $0x28] sm:$0xff] }
0x26f2   :  { %v3794_v37 = vsub.f32 %v8698_v63, %v3793_v4  ;;  %v1276_v4 = vld [vmem:[%s9023_s7 + $0x30] sm:$0xff] }
0x26f4   :  { %v3795_v5 = vmul.f32 %v3794_v37, %v3794_v37 }
0x26f6   :  { %3796 = vadd.xlane.f32.xlu0 %v3795_v5 }
0x2783   :  { %v3797_v29 = vpop.xlane.xlu0 %3796 }
0x2784   :  { %v3798_v30 = vmul.f32 0.0078125, %v3797_v29  ;;  %v1243_v29 = vld [vmem:[%s9024_s10 + $0x38] sm:$0xff] }
0x2786   :  { %v3799_v31 = vadd.f32 1e-05, %v3798_v30  ;;  %v5935_v30 = vpack.c.bf16 %v1243_v29, %v1242_v28 }
0x2788   :  { %6206 = vrsqrt.f32 %v3799_v31  ;;  %v1244_v31 = vld [vmem:[%s9024_s10 + $0x40] sm:$0xff] }
0x2792   :  { %v6207_v32 = vpop.eup %6206 }
0x2793   :  { %v3801_v34 = vmul.f32 %v6207_v32, %v3794_v37  ;;  %v1277_v37 = vld [vmem:[%s9023_s7 + $0x38] sm:$0xff]  ;;  %v1245_v32 = vld [vmem:[%s9024_s10 + $0x48] sm:$0xff] }
0x2794   :  { %v5923_v5 = vpack.c.bf16 %v1277_v37, %v1276_v4  ;;  %v1228_v4 = vld [vmem:[%s9025_s11 + $0x30] sm:$0xff]  ;;  %v1229_v37 = vld [vmem:[%s9025_s11 + $0x38] sm:$0xff] }
0x2795   :  { %v3808_v36 = vmul.f32 %v4551_v33, %v3801_v34  ;;  %v5938_v33 = vpack.c.bf16 %v1245_v32, %v1244_v31  ;;  %v1246_v34 = vld [vmem:[%s9024_s10 + $0x50] sm:$0xff] }
0x2797   :  { %v3815_v38 = vadd.f32 %v4552_v35, %v3808_v36  ;;  %v1247_v35 = vld [vmem:[%s9024_s10 + $0x58] sm:$0xff] }
0x2798   :  { %v5941_v36 = vpack.c.bf16 %v1247_v35, %v1246_v34 }
0x2799   :  { %v4553_v39 = vmul.f32 -1.442695, %v3815_v38 }
0x279b   :  { %6208 = vpow2.f32 %v4553_v39  ;;  %v1249_v39 = vld [vmem:[%s9024_s10 + $0x68] sm:$0xff] }
0x27a5   :  { %v6209_v40 = vpop.eup %6208 }
0x27a6   :  { %v3819_v41 = vadd.f32 1.0, %v6209_v40 }
0x27a8   :  { %6210 = vrcp.f32 %v3819_v41  ;;  %v1250_v41 = vld [vmem:[%s9024_s10 + $0x70] sm:$0xff] }
0x27b2   :  { %v6211_v42 = vpop.eup %6210 }
0x27b3   :  { %v3822_v43 = vmul.f32 %v6211_v42, %v3815_v38  ;;  %v1248_v38 = vld [vmem:[%s9024_s10 + $0x60] sm:$0xff]  ;;  %v1251_v42 = vld [vmem:[%s9024_s10 + $0x78] sm:$0xff] }
0x27b4   :  { %v5944_v40 = vpack.c.bf16 %v1249_v39, %v1248_v38 }
0x27b5   :  { %5453 = vmatmul.mubr.f32.vlgmr.msra.gmra.mrb[30].mxu0 %v3822_v43  ;;  %v5947_v43 = vpack.c.bf16 %v1251_v42, %v1250_v41 }
0x27b6   :  { %5525 = vmatprep.mubr.msk.f32.mxu0 %vm7493_vm0, %v7494_v1 }
0x2888   :  { %v3959_v6 = vpop.f32.mrb[30].mxu0 }
0x2889   :  { %v3960_v44 = vadd.f32 %v3959_v6, %v8676_v24  ;;  %v5454_v45 = vpop.f32.mrb[31].mxu0  ;;  %v5914_v24 = vpack.c.bf16 %v1271_v54, %v1270_v53  ;;  %v4560_v6 = vld [vmem:[#allocation66] ss:$0 sm:$0xff]  ;;  %v1222_v53 = vld [vmem:[%s9025_s11] sm:$0xff]  ;;  %v1223_v54 = vld [vmem:[%s9025_s11 + $0x8] sm:$0xff] }
0x288a   :  { %v5950_v55 = vpack.c.bf16 %v1223_v54, %v1222_v53 }
0x288b   :  { %v3969_v46 = vadd.f32 %v4554_v2, %v3960_v44  ;;  %5915 = vmatpush3.bf16.msra.mxu1 %v5914_v24  ;;  %v4558_v2 = vld [vmem:[#allocation69] ss:$0 sm:$0xff]  ;;  %v1224_v24 = vld [vmem:[%s9025_s11 + $0x10] sm:$0xff] }
0x288c   :  { %5916 = vmatprep.subr.bf16.mxu1 %v7492_v0  ;;  %v5975_v44 = vadd.f32 %v4560_v6, %v4558_v2  ;;  %5951 = vmatpush3.bf16.msra.mxu0 %v5950_v55 }
0x288d   :  { %v3970_v47 = vsel %vm1544_vm2, %v3969_v46, 0.0  ;;  %5952 = vmatprep.subr.bf16.mxu0 %v7492_v0 }
0x288e   :  { %3971 = vadd.xlane.f32.xlu1 %v3970_v47 }
0x288f   :  { %5918 = vmatpush3.bf16.msra.mxu1 %v5917_v59  ;;  %v5953_v59 = vpack.c.bf16 %v1225_v56, %v1224_v24 }
0x2890   :  { %5919 = vmatprep.subr.bf16.mxu1 %v7492_v0 }
0x2891   :  { %5954 = vmatpush3.bf16.msra.mxu0 %v5953_v59 }
0x2892   :  { %5955 = vmatprep.subr.bf16.mxu0 %v7492_v0 }
0x2893   :  { %5921 = vmatpush3.bf16.msra.mxu1 %v5920_v3  ;;  %v5956_v3 = vpack.c.bf16 %v1227_v62, %v1226_v60 }
0x2894   :  { %5922 = vmatprep.subr.bf16.mxu1 %v7492_v0 }
0x2895   :  { %5957 = vmatpush3.bf16.msra.mxu0 %v5956_v3 }
0x2896   :  { %5958 = vmatprep.subr.bf16.mxu0 %v7492_v0 }
0x2897   :  { %5924 = vmatpush3.bf16.msra.mxu1 %v5923_v5  ;;  %v5959_v5 = vpack.c.bf16 %v1229_v37, %v1228_v4 }
0x2898   :  { %5925 = vmatprep.subr.bf16.mxu1 %v7492_v0 }
0x2899   :  { %5960 = vmatpush3.bf16.msra.mxu0 %v5959_v5 }
0x289a   :  { %5961 = vmatprep.subr.bf16.mxu0 %v7492_v0 }
0x291b   :  { %v3972_v48 = vpop.xlane.xlu1 %3971 }
0x291c   :  { %v3973_v49 = vmul.f32 0.015625, %v3972_v48 }
0x291e   :  { %v3974_v50 = vsub.f32 %v3969_v46, %v3973_v49 }
0x2920   :  { %v3975_v51 = vmul.f32 %v3974_v50, %v3974_v50 }
0x2922   :  { %v3976_v52 = vsel %vm1544_vm2, %v3975_v51, 0.0 }
0x2923   :  { %3977 = vadd.xlane.f32.xlu1 %v3976_v52 }
0x29b0   :  { %v3978_v7 = vpop.xlane.xlu1 %3977 }
0x29b1   :  { %v3979_v9 = vmul.f32 0.015625, %v3978_v7 }
0x29b3   :  { %v3980_v11 = vadd.f32 1e-05, %v3979_v9 }
0x29b5   :  { %6212 = vrsqrt.f32 %v3980_v11 }
0x29bf   :  { %v6213_v58 = vpop.eup %6212 }
0x29c0   :  { %v3982_v8 = vmul.f32 %v6213_v58, %v3974_v50 }
0x29c2   :  { %v3989_v15 = vmul.f32 %v4555_v12, %v3982_v8  ;;  %v4561_v12 = vld [vmem:[#allocation61] ss:$0 sm:$0xff] }
0x29c4   :  { %v3996_v16 = vadd.f32 %v4556_v14, %v3989_v15  ;;  %v1055_v14 = vld [vmem:[%s9026_s15] sm:$0xff]  ;;  %v1056_v15 = vld [vmem:[%s9026_s15 + $0x8] sm:$0xff] }
0x29c6   :  { %v4557_v13 = vmul.f32 -1.442695, %v3996_v16 }
0x29c8   :  { %6214 = vpow2.f32 %v4557_v13 }
0x29d2   :  { %v6215_v17 = vpop.eup %6214 }
0x29d3   :  { %v4000_v18 = vadd.f32 1.0, %v6215_v17  ;;  %v5962_v17 = vpack.c.bf16 %v1056_v15, %v1055_v14 }
0x29d5   :  { %6216 = vrcp.f32 %v4000_v18 }
0x29df   :  { %v6217_v20 = vpop.eup %6216 }
0x29e0   :  { %v4003_v22 = vmul.f32 %v6217_v20, %v3996_v16  ;;  %v4562_v16 = vld [vmem:[#allocation60] ss:$0 sm:$0xff]  ;;  %v5965_v20 = vpack.c.bf16 %v1058_v19, %v1057_v57 }
0x29e2   :  { %5472 = vmatmul.mubr.msk.f32.vlgmr.msra.gmra.mrb[22].mxu1 %vm1544_vm2, %v4003_v22  ;;  %v1060_v22 = vld [vmem:[%s9026_s15 + $0x28] sm:$0xff] }
0x29e3   :  { %5927 = vmatpush3.bf16.msra.mxu1 %v5926_v21  ;;  %5506 = vmatprep.mubr.msk.f32.mxu1 %vm7493_vm0, %v7494_v1  ;;  %v1059_v21 = vld [vmem:[%s9026_s15 + $0x20] sm:$0xff] }
0x29e4   :  { %5928 = vmatprep.subr.bf16.mxu1 %v7492_v0  ;;  %v5968_v10 = vpack.c.bf16 %v1060_v22, %v1059_v21 }
0x29e7   :  { %5930 = vmatpush3.bf16.msra.mxu1 %v5929_v25  ;;  %v1062_v25 = vld [vmem:[%s9026_s15 + $0x38] sm:$0xff] }
0x29e8   :  { %5931 = vmatprep.subr.bf16.mxu1 %v7492_v0  ;;  %v5971_v61 = vpack.c.bf16 %v1062_v25, %v1061_v23 }
0x29eb   :  { %5933 = vmatpush3.bf16.msra.mxu1 %v5932_v27 }
0x29ec   :  { %5934 = vmatprep.subr.bf16.mxu1 %v7492_v0 }
0x29ef   :  { %5936 = vmatpush3.bf16.msra.mxu1 %v5935_v30  ;;  %v4565_v30 = vld [vmem:[#allocation16] ss:$0 sm:$0xff] }
0x29f0   :  { %5937 = vmatprep.subr.bf16.mxu1 %v7492_v0 }
0x29f3   :  { %5939 = vmatpush3.bf16.msra.mxu1 %v5938_v33 }
0x29f4   :  { %5940 = vmatprep.subr.bf16.mxu1 %v7492_v0 }
0x29f7   :  { %5942 = vmatpush3.bf16.msra.mxu1 %v5941_v36 }
0x29f8   :  { %5943 = vmatprep.subr.bf16.mxu1 %v7492_v0 }
0x29fb   :  { %5945 = vmatpush3.bf16.msra.mxu1 %v5944_v40 }
0x29fc   :  { %5946 = vmatprep.subr.bf16.mxu1 %v7492_v0 }
0x29ff   :  { %5948 = vmatpush3.bf16.msra.mxu1 %v5947_v43 }
0x2a02   :  { %5507 = vmatmul.mubr.f32.vlgmr.msra.gmra.mrb[22].mxu1 %v8698_v63 }
0x2ad5   :  { %v4155_v45 = vpop.f32.mrb[22].mxu1 }
0x2ad6   :  { %v8770_v46 = vadd.f32 %v5975_v44, %v4155_v45  ;;  %v5508_v47 = vpop.f32.mrb[23].mxu1 }
0x2ad8   :  { %v4160_v48 = vsel %vm1544_vm2, %v8770_v46, 0.0 }
0x2ad9   :  { %4161 = vadd.xlane.f32.xlu1 %v4160_v48 }
0x2b66   :  { %v4162_v49 = vpop.xlane.xlu1 %4161 }
0x2b67   :  { %v4163_v50 = vmul.f32 0.015625, %v4162_v49 }
0x2b69   :  { %v4164_v63 = vsub.f32 %v8770_v46, %v4163_v50 }
0x2b6b   :  { %v4165_v51 = vmul.f32 %v4164_v63, %v4164_v63 }
0x2b6d   :  { %v4166_v52 = vsel %vm1544_vm2, %v4165_v51, 0.0 }
0x2b6e   :  { %4167 = vadd.xlane.f32.xlu1 %v4166_v52 }
0x2bfb   :  { %v4168_v7 = vpop.xlane.xlu1 %4167 }
0x2bfc   :  { %v4169_v9 = vmul.f32 0.015625, %v4168_v7 }
0x2bfe   :  { %v4170_v11 = vadd.f32 1e-05, %v4169_v9 }
0x2c00   :  { %6218 = vrsqrt.f32 %v4170_v11 }
0x2c0a   :  { %v6219_v58 = vpop.eup %6218 }
0x2c0b   :  { %v4172_v8 = vmul.f32 %v6219_v58, %v4164_v63 }
0x2c0d   :  { %v4179_v13 = vmul.f32 %v4561_v12, %v4172_v8 }
0x2c0f   :  { %v4186_v18 = vadd.f32 %v4562_v16, %v4179_v13 }
0x2c11   :  { %5526 = vmatmul.mubr.msk.f32.vlgmr.msra.gmra.mrb[32].mxu0 %vm1544_vm2, %v4186_v18 }
0x2c12   :  { %5963 = vmatpush3.bf16.msra.mxu0 %v5962_v17  ;;  %5544 = vmatprep.mubr.msk.f32.mxu0 %vm7493_vm0, %v7494_v1 }
0x2c13   :  { %5964 = vmatprep.subr.bf16.mxu0 %v7492_v0 }
0x2c16   :  { %5966 = vmatpush3.bf16.msra.mxu0 %v5965_v20 }
0x2c17   :  { %5967 = vmatprep.subr.bf16.mxu0 %v7492_v0 }
0x2c1a   :  { %5969 = vmatpush3.bf16.msra.mxu0 %v5968_v10 }
0x2c1b   :  { %5970 = vmatprep.subr.bf16.mxu0 %v7492_v0 }
0x2c1e   :  { %5972 = vmatpush3.bf16.msra.mxu0 %v5971_v61 }
0x2ce4   :  { %v4262_v27 = vpop.f32.mrb[32].mxu0 }
0x2ce5   :  { %v4263_v28 = vadd.f32 %v4563_v26, %v4262_v27  ;;  %v5527_v1 = vpop.f32.mrb[33].mxu0 }
0x2ce7   :  { %v4266_v29 = vadd.f32 %v8770_v46, %v4263_v28 }
0x2ce9   :  { %5545 = vmatmul.mubr.msk.f32.vlgmr.msra.gmra.mrb[34].mxu0 %vm1544_vm2, %v4266_v29 }
0x2dbc   :  { %v4342_v31 = vpop.f32.mrb[34].mxu0 }
0x2dbd   :  { %v4343_v32 = vadd.f32 %v4565_v30, %v4342_v31  ;;  %v5546_v33 = vpop.f32.mrb[35].mxu0 }
0x2dbf   :  { %4346 = vst.msk [vmem:[%s7980_s29] sm:$0xff] %vm1470_vm1, %v4343_v32 }
0x2dc0   :  { %4351 = vsyncpa [#allocation3], 1 }
0x2dc1   :  { %4352 = vsyncpa [#allocation5], 1 }
0x2dc2   :  { %4353 = vsyncpa [#allocation8], 1 }
0x2dc3   :  { %4354 = vsyncpa [#allocation11], 1 }
0x2dc4   :  { %4355 = vsyncpa [#allocation14], 1 }
0x2dc5   :  { %4356 = vsyncpa [#allocation17], 1 }
0x2dc6   :  { %4357 = vsyncpa [#allocation20], 1 }
0x2dc7   :  { %4358 = vsyncpa [#allocation23], 1 }
0x2dc8   :  { %4359 = vsyncpa [#allocation26], 1 }
0x2dc9   :  { %4360 = vsyncpa [#allocation29], 1 }
0x2dca   :  { %4361 = vsyncpa [#allocation32], 1 }
0x2dcb   :  { %4362 = vsyncpa [#allocation35], 1 }
0x2dcc   :  { %4363 = vsyncpa [#allocation38], 1 }
0x2dcd   :  { %4364 = vsyncpa [#allocation41], 1 }
0x2dce   :  { %4365 = vsyncpa [#allocation44], 1 }
0x2dcf   :  { %4366 = vsyncpa [#allocation47], 1 }
0x2dd0   :  { %4367 = vsyncpa [#allocation50], 1 }
0x2dd1   :  { %4368 = vsyncpa [#allocation53], 1 }
0x2dd2   :  { %4369 = vsyncpa [#allocation56], 1 }
0x2dd3   :  { %4370 = vsyncpa [#allocation59], 1 }
0x2dd4   :  { %4371 = vsyncpa [#allocation62], 1 }
0x2dd5   :  { %4372 = vsyncpa [#allocation65], 1 }
0x2dd6   :  { %4373 = vsyncpa [#allocation68], 1 }
0x2dd7   :  { %4374 = vsyncpa [#allocation71], 1 }
0x2dd8   :  { %4375 = vsyncpa [#allocation74], 1 }

</bundles_post_ra>
